<compile_context>
chip_gen: v6e
topology: v6e:2x2x1
jax: 0.10.0
libtpu: 0.0.40
codegen_flags: <defaults>
</compile_context>

<pallas_src>
import jax
import jax.numpy as jnp
import numpy as np
from jax.experimental import pallas as pl
from jax.experimental.pallas import tpu as pltpu

LANE = 128


def _round_up(x, m):
    return (x + m - 1) // m * m


def _pick_row_tile(h, target=8):
    """Largest divisor of h that is <= target (row-tile height)."""
    th = min(h, max(1, target))
    while h % th:
        th -= 1
    return th


def _pick_vmem_limit():
    """~3/4 of physical VMEM (96MB on v5e/v6e, 48MB on v7x), capped at 100MB."""
    try:
        cap = int(pltpu.get_tpu_info().vmem_capacity_bytes)
    except Exception:
        cap = 64 * 1024 * 1024  # conservative (v7x-sized) default
    return min((cap * 3) // 4, 100 * 1024 * 1024)


# ------------------------------ fused kernel --------------------------------

def _bottleneck_kernel(x_ref, w1_ref, b1_ref, w2_ref, b2_ref, w3_ref, b3_ref,
                       o_ref, t1p_ref):
    """One (image n, row-tile h) pair per grid step.

    x_ref  : (H+2, W, Cp)       input (1 zero row top/bottom, channels padded), f32
    w1_ref : (Cp, C1p)          conv1 1x1 weight, BN1 scale folded, bf16
    b1_ref : (1, C1p)           BN1 bias, f32
    w2_ref : (3, 3*C1p, C1p)    conv2 taps: per dy, the 3 dx taps concatenated on K, bf16
    b2_ref : (1, C1p)           BN2 bias, f32
    w3_ref : (C1p, Cp)          conv3 1x1 weight, BN3 scale folded, bf16
    b3_ref : (1, Cp)            BN3 bias, f32
    o_ref  : (TH, W, Cp)        output row tile
    t1p_ref: VMEM (TH+2, W+2, C1p) bf16 scratch — stage-1 tile with zero halo
    """
    TH, W, Cp = o_ref.shape
    C1p = w1_ref.shape[1]
    h = pl.program_id(1)
    n_h = pl.num_programs(1)
    r0 = pl.multiple_of(h * TH, TH)          # start row of this tile in padded x

    # -- stage 1: 1x1 conv (+ folded BN) + ReLU over TH+2 rows (incl. halo rows) ----
    xt = x_ref[pl.ds(r0, TH + 2), :, :].reshape((TH + 2) * W, Cp).astype(jnp.bfloat16)
    t1 = jnp.dot(xt, w1_ref[...], preferred_element_type=jnp.float32)
    t1 = jnp.maximum(t1 + b1_ref[...], 0.0)
    t1p_ref[:, 1:W + 1, :] = t1.reshape(TH + 2, W, C1p).astype(t1p_ref.dtype)

    # Zero ONLY the border of the halo scratch (not the whole scratch):
    #   * the 2 pad columns every step,
    #   * the top/bottom halo ROW only at image boundaries (stage-1 of the HBM zero
    #     pad rows would be relu(b1) != 0, so they must be overwritten with zeros).
    zcol = jnp.zeros((TH + 2, 1, C1p), t1p_ref.dtype)
    t1p_ref[:, 0:1, :] = zcol
    t1p_ref[:, W + 1:W + 2, :] = zcol

    @pl.when(h == 0)
    def _():
        t1p_ref[0:1, :, :] = jnp.zeros((1, W + 2, C1p), t1p_ref.dtype)

    @pl.when(h == n_h - 1)
    def _():
        t1p_ref[TH + 1:TH + 2, :, :] = jnp.zeros((1, W + 2, C1p), t1p_ref.dtype)

    # -- stage 2: 3x3 conv as 3 matmuls with K = 3*C1p (dx taps concatenated) -------
    acc = jnp.zeros((TH * W, C1p), jnp.float32)
    for dy in range(3):                       # dy = cheap static offset on dim 0
        rows = t1p_ref[dy:dy + TH, :, :]      # (TH, W+2, C1p) bf16
        opnd = jnp.concatenate(
            [rows[:, 0:W, :], rows[:, 1:W + 1, :], rows[:, 2:W + 2, :]],
            axis=-1).reshape(TH * W, 3 * C1p)
        acc = acc + jnp.dot(opnd, w2_ref[dy], preferred_element_type=jnp.float32)
    t2 = jnp.maximum(acc + b2_ref[...], 0.0)

    # -- stage 3: 1x1 conv (+ BN) + identity (re-read from resident block) + ReLU ---
    y = jnp.dot(t2.astype(jnp.bfloat16), w3_ref[...],
                preferred_element_type=jnp.float32)
    idn = x_ref[pl.ds(r0 + 1, TH), :, :].reshape(TH * W, Cp).astype(jnp.float32)
    y = jnp.maximum(y + b3_ref[...] + idn, 0.0)
    o_ref[...] = y.reshape(TH, W, Cp).astype(o_ref.dtype)


# ------------------------------ wrapper --------------------------------------

def fold_bn(gamma, beta, mean, var, eps=1e-5):
    scale = gamma / jnp.sqrt(var + eps)
    bias = beta - mean * scale
    return scale, bias


def bottleneck_forward(x_nchw, params, *, row_block=8):
    """Fused Pallas Bottleneck.forward (stride=1, downsample=None, eval-mode BN)."""
    N, Cin, H, W = x_nchw.shape
    w1, w2, w3 = params["w1"], params["w2"], params["w3"]
    width, out_ch = w1.shape[1], w3.shape[1]
    assert Cin == out_ch, (
        "no-downsample residual requires inplanes == planes*expansion; "
        "stride>1 / downsample branch not implemented")

    s1, b1 = fold_bn(*params["bn1"])
    s2, b2 = fold_bn(*params["bn2"])
    s3, b3 = fold_bn(*params["bn3"])

    Cp = _round_up(Cin, LANE)     # lane-dense in/out channel count
    C1p = _round_up(width, LANE)  # lane-dense mid channel count
    # NOTE: for width < 128 this padding wastes ~(C1p/width)x MXU FLOPs on zero lanes
    # (see TODO at top); for width >= 128 it is a no-op.

    # Fold BN scales into conv weights in f32, then cast ONCE to bf16 (MXU-native).
    w1f = jnp.zeros((Cp, C1p), jnp.float32).at[:Cin, :width].set(w1 * s1[None, :])
    w3f = jnp.zeros((C1p, Cp), jnp.float32).at[:width, :out_ch].set(w3 * s3[None, :])
    w2s = w2 * s2[None, None, :]
    w2f = jnp.zeros((3, 3 * C1p, C1p), jnp.float32)
    for dy in range(3):
        for dx in range(3):
            w2f = w2f.at[dy, dx * C1p:dx * C1p + width, :width].set(w2s[dy * 3 + dx])
    w1f = w1f.astype(jnp.bfloat16)
    w2f = w2f.astype(jnp.bfloat16)
    w3f = w3f.astype(jnp.bfloat16)

    b1f = jnp.zeros((1, C1p), jnp.float32).at[0, :width].set(b1)
    b2f = jnp.zeros((1, C1p), jnp.float32).at[0, :width].set(b2)
    b3f = jnp.zeros((1, Cp), jnp.float32).at[0, :out_ch].set(b3)

    # NCHW -> NHWC, channel pad to lane width, and ONE zero row top/bottom so every
    # row tile can read TH+2 contiguous rows (the stage-1 result of those pad rows is
    # discarded/zeroed in-kernel; the 3x3 halo is zero-padding of the stage-1 OUTPUT).
    x = jnp.transpose(x_nchw, (0, 2, 3, 1))
    x = jnp.pad(x, ((0, 0), (1, 1), (0, 0), (0, Cp - Cin)))

    TH = _pick_row_tile(H, row_block)
    n_h = H // TH
    vmem_limit = _pick_vmem_limit()

    def _run(single_buffer_weights):
        # Grid-invariant weights/biases: request single buffering to save VMEM
        # (important for width=512 on v7x); fall back if unsupported.
        wkw = dict(pipeline_mode=pl.Buffered(1)) if single_buffer_weights else {}
        out = pl.pallas_call(
            _bottleneck_kernel,
            out_shape=jax.ShapeDtypeStruct((N, H, W, Cp), x_nchw.dtype),
            grid=(N, n_h),
            in_specs=[
                pl.BlockSpec((None, H + 2, W, Cp), lambda n, h: (n, 0, 0, 0)),
                pl.BlockSpec((Cp, C1p), lambda n, h: (0, 0), **wkw),
                pl.BlockSpec((1, C1p), lambda n, h: (0, 0), **wkw),
                pl.BlockSpec((3, 3 * C1p, C1p), lambda n, h: (0, 0, 0), **wkw),
                pl.BlockSpec((1, C1p), lambda n, h: (0, 0), **wkw),
                pl.BlockSpec((C1p, Cp), lambda n, h: (0, 0), **wkw),
                pl.BlockSpec((1, Cp), lambda n, h: (0, 0), **wkw),
            ],
            out_specs=pl.BlockSpec((None, TH, W, Cp), lambda n, h: (n, h, 0, 0)),
            scratch_shapes=[pltpu.VMEM((TH + 2, W + 2, C1p), jnp.bfloat16)],
            compiler_params=pltpu.CompilerParams(
                dimension_semantics=("parallel", "parallel"),
                vmem_limit_bytes=vmem_limit,
            ),
        )(x, w1f, b1f, w2f, b2f, w3f, b3f)
        return jax.block_until_ready(out)

    try:
        out = _run(True)
    except Exception:
        # pl.Buffered(1) not supported by this jax version -> default buffering.
        out = _run(False)

    out = out[..., :out_ch]                    # drop channel padding
    return jnp.transpose(out, (0, 3, 1, 2))    # NHWC -> NCHW


# ----------------------------- pure-JAX reference ----------------------------

def _ref_forward(x_nchw, params):
    x = jnp.transpose(x_nchw, (0, 2, 3, 1))
    s1, b1 = fold_bn(*params["bn1"])
    s2, b2 = fold_bn(*params["bn2"])
    s3, b3 = fold_bn(*params["bn3"])

    def c1x1(t, w):
        return jnp.einsum("nhwc,cd->nhwd", t, w)

    def c3x3(t, w9):
        H, W = t.shape[1], t.shape[2]
        tp = jnp.pad(t, ((0, 0), (1, 1), (1, 1), (0, 0)))
        acc = 0.0
        for dy in range(3):
            for dx in range(3):
                acc = acc + jnp.einsum(
                    "nhwc,cd->nhwd", tp[:, dy:dy + H, dx:dx + W, :], w9[dy * 3 + dx])
        return acc

    out = jnp.maximum(c1x1(x, params["w1"]) * s1 + b1, 0.0)
    out = jnp.maximum(c3x3(out, params["w2"]) * s2 + b2, 0.0)
    out = jnp.maximum(c1x1(out, params["w3"]) * s3 + b3 + x, 0.0)
    return jnp.transpose(out, (0, 3, 1, 2))


# ----------------------------- test harness -----------------------------------

def _bn_params(key, c):
    k1, k2, k3, k4 = jax.random.split(key, 4)
    gamma = 1.0 + 0.1 * jax.random.normal(k1, (c,), jnp.float32)
    beta = 0.1 * jax.random.normal(k2, (c,), jnp.float32)
    mean = 0.1 * jax.random.normal(k3, (c,), jnp.float32)
    var = jnp.abs(1.0 + 0.1 * jax.random.normal(k4, (c,), jnp.float32))
    return gamma, beta, mean, var


def _make_params(key, inplanes, planes):
    # width = planes * (base_width/64) * groups = planes ; out = planes * expansion
    width = planes
    out_ch = planes * 4
    assert out_ch == inplanes
    ks = jax.random.split(key, 6)
    return {
        # conv weights stored in matmul layout:
        #   1x1: (Cin, Cout)   3x3: (9, Cin, Cout) with taps row-major over (dy, dx)
        "w1": 0.1 * jax.random.normal(ks[0], (inplanes, width), jnp.float32),
        "w2": 0.1 * jax.random.normal(ks[1], (9, width, width), jnp.float32),
        "w3": 0.1 * jax.random.normal(ks[2], (width, out_ch), jnp.float32),
        "bn1": _bn_params(ks[3], width),
        "bn2": _bn_params(ks[4], width),
        "bn3": _bn_params(ks[5], out_ch),
    }


if __name__ == "__main__":
    key = jax.random.PRNGKey(0)
    configs = [
        # (N, inplanes, planes, H, W) — first exercises multiple row tiles (halo
        # handoff across tiles), second the single-tile / both-boundaries path.
        (2, 16, 4, 16, 16),
        (1, 16, 4, 8, 8),
    ]
    for idx, (N, inplanes, planes, H, W) in enumerate(configs):
        kp, kx, key = jax.random.split(key, 3)
        params = _make_params(kp, inplanes, planes)
        x = jax.random.normal(kx, (N, inplanes, H, W), jnp.float32)  # NCHW

        out = jax.block_until_ready(bottleneck_forward(x, params))
        ref = jax.block_until_ready(_ref_forward(x, params))

        assert out.shape == (N, planes * 4, H, W), out.shape
        # bf16 matmul operands -> relaxed tolerance vs. the f32 reference.
        err = float(np.max(np.abs(np.asarray(out) - np.asarray(ref))))
        assert np.allclose(np.asarray(out), np.asarray(ref), atol=2e-2, rtol=2e-2), \
            (idx, err)

    print("KERNEL_OK")
</pallas_src>

<mosaic_0001>
module attributes {stable_mosaic.version = 11 : i64} {
  func.func @_bottleneck_kernel(%arg0: i32, %arg1: i32, %arg2: memref<1x18x16x128xf32, #tpu.memory_space<vmem>>, %arg3: memref<128x128xbf16, #tpu.memory_space<vmem>>, %arg4: memref<1x128xf32, #tpu.memory_space<vmem>>, %arg5: memref<3x384x128xbf16, #tpu.memory_space<vmem>>, %arg6: memref<1x128xf32, #tpu.memory_space<vmem>>, %arg7: memref<128x128xbf16, #tpu.memory_space<vmem>>, %arg8: memref<1x128xf32, #tpu.memory_space<vmem>>, %arg9: memref<1x8x16x128xf32, #tpu.memory_space<vmem>>, %arg10: memref<10x18x128xbf16, #tpu.memory_space<vmem>>) attributes {dimension_semantics = [#tpu.dimension_semantics<parallel>, #tpu.dimension_semantics<parallel>], iteration_bounds = array<i64: 2, 2>, scalar_prefetch = 0 : i64, scratch_operands = 1 : i64, tpu.core_type = #tpu.core_type<tc>, window_params = [{transform_indices = @transform_0, window_bounds = array<i64: 1, 18, 16, 128>}, {pipeline_mode = #tpu.pipeline_mode<synchronous>, transform_indices = @transform_1, window_bounds = array<i64: 128, 128>}, {pipeline_mode = #tpu.pipeline_mode<synchronous>, transform_indices = @transform_2, window_bounds = array<i64: 1, 128>}, {pipeline_mode = #tpu.pipeline_mode<synchronous>, transform_indices = @transform_3, window_bounds = array<i64: 3, 384, 128>}, {pipeline_mode = #tpu.pipeline_mode<synchronous>, transform_indices = @transform_4, window_bounds = array<i64: 1, 128>}, {pipeline_mode = #tpu.pipeline_mode<synchronous>, transform_indices = @transform_5, window_bounds = array<i64: 128, 128>}, {pipeline_mode = #tpu.pipeline_mode<synchronous>, transform_indices = @transform_6, window_bounds = array<i64: 1, 128>}, {transform_indices = @transform_7, window_bounds = array<i64: 1, 8, 16, 128>}]} {
    %c8_i32 = arith.constant 8 : i32
    %0 = arith.muli %arg1, %c8_i32 : i32
    %1 = tpu.assume_multiple %0, 8 : i32
    %c0 = arith.constant 0 : index
    %2 = arith.index_cast %1 : i32 to index
    %c0_0 = arith.constant 0 : index
    %c0_1 = arith.constant 0 : index
    %3 = vector.load %arg2[%c0, %2, %c0_0, %c0_1] : memref<1x18x16x128xf32, #tpu.memory_space<vmem>>, vector<1x10x16x128xf32>
    %4 = vector.shape_cast %3 : vector<1x10x16x128xf32> to vector<10x16x128xf32>
    %5 = vector.shape_cast %4 : vector<10x16x128xf32> to vector<160x128xf32>
    %6 = arith.truncf %5 : vector<160x128xf32> to vector<160x128xbf16>
    %c0_2 = arith.constant 0 : index
    %c0_3 = arith.constant 0 : index
    %7 = vector.load %arg3[%c0_2, %c0_3] : memref<128x128xbf16, #tpu.memory_space<vmem>>, vector<128x128xbf16>
    %cst = arith.constant dense<0.000000e+00> : vector<160x128xf32>
    %8 = tpu.matmul %6, %7, %cst {dimension_numbers = #tpu.dot_dimension_numbers<[1], [0], [0], [1], [0, 0, 1, 1], [], []>} : vector<160x128xbf16>, vector<128x128xbf16>, vector<160x128xf32> -> vector<160x128xf32>
    %c0_4 = arith.constant 0 : index
    %c0_5 = arith.constant 0 : index
    %9 = vector.load %arg4[%c0_4, %c0_5] : memref<1x128xf32, #tpu.memory_space<vmem>>, vector<1x128xf32>
    %10 = vector.broadcast %9 : vector<1x128xf32> to vector<160x128xf32>
    %11 = arith.addf %8, %10 : vector<160x128xf32>
    %cst_6 = arith.constant 0.000000e+00 : f32
    %12 = vector.broadcast %cst_6 : f32 to vector<160x128xf32>
    %13 = arith.maximumf %11, %12 : vector<160x128xf32>
    %14 = vector.shape_cast %13 : vector<160x128xf32> to vector<10x16x128xf32>
    %15 = arith.truncf %14 : vector<10x16x128xf32> to vector<10x16x128xbf16>
    %c0_7 = arith.constant 0 : index
    %c1 = arith.constant 1 : index
    %c0_8 = arith.constant 0 : index
    %16 = vector.load %arg10[%c0_7, %c1, %c0_8] : memref<10x18x128xbf16, #tpu.memory_space<vmem>>, vector<10x16x128xbf16>
    tpu.vector_store %arg10[%c0_7, %c1, %c0_8], %15 {strides = array<i32>} : memref<10x18x128xbf16, #tpu.memory_space<vmem>>, vector<10x16x128xbf16>,
    %cst_9 = arith.constant 0.000000e+00 : bf16
    %17 = vector.broadcast %cst_9 : bf16 to vector<10x1x128xbf16>
    %c0_10 = arith.constant 0 : index
    %c0_11 = arith.constant 0 : index
    %c0_12 = arith.constant 0 : index
    %18 = vector.load %arg10[%c0_10, %c0_11, %c0_12] : memref<10x18x128xbf16, #tpu.memory_space<vmem>>, vector<10x1x128xbf16>
    tpu.vector_store %arg10[%c0_10, %c0_11, %c0_12], %17 {strides = array<i32>} : memref<10x18x128xbf16, #tpu.memory_space<vmem>>, vector<10x1x128xbf16>,
    %c0_13 = arith.constant 0 : index
    %c17 = arith.constant 17 : index
    %c0_14 = arith.constant 0 : index
    %19 = vector.load %arg10[%c0_13, %c17, %c0_14] : memref<10x18x128xbf16, #tpu.memory_space<vmem>>, vector<10x1x128xbf16>
    tpu.vector_store %arg10[%c0_13, %c17, %c0_14], %17 {strides = array<i32>} : memref<10x18x128xbf16, #tpu.memory_space<vmem>>, vector<10x1x128xbf16>,
    %c0_i32 = arith.constant 0 : i32
    %20 = arith.cmpi eq, %arg1, %c0_i32 : i32
    %21 = arith.extui %20 : i1 to i32
    %c0_i32_15 = arith.constant 0 : i32
    %22 = arith.cmpi ne, %21, %c0_i32_15 : i32
    scf.if %22 {
      %cst_55 = arith.constant 0.000000e+00 : bf16
      %80 = vector.broadcast %cst_55 : bf16 to vector<1x18x128xbf16>
      %c0_56 = arith.constant 0 : index
      %c0_57 = arith.constant 0 : index
      %c0_58 = arith.constant 0 : index
      %81 = vector.load %arg10[%c0_56, %c0_57, %c0_58] : memref<10x18x128xbf16, #tpu.memory_space<vmem>>, vector<1x18x128xbf16>
      tpu.vector_store %arg10[%c0_56, %c0_57, %c0_58], %80 {strides = array<i32>} : memref<10x18x128xbf16, #tpu.memory_space<vmem>>, vector<1x18x128xbf16>,
    } else {
    }
    %c1_i32 = arith.constant 1 : i32
    %23 = arith.cmpi eq, %arg1, %c1_i32 : i32
    %24 = arith.extui %23 : i1 to i32
    %c0_i32_16 = arith.constant 0 : i32
    %25 = arith.cmpi ne, %24, %c0_i32_16 : i32
    scf.if %25 {
      %cst_55 = arith.constant 0.000000e+00 : bf16
      %80 = vector.broadcast %cst_55 : bf16 to vector<1x18x128xbf16>
      %c9 = arith.constant 9 : index
      %c0_56 = arith.constant 0 : index
      %c0_57 = arith.constant 0 : index
      %81 = vector.load %arg10[%c9, %c0_56, %c0_57] : memref<10x18x128xbf16, #tpu.memory_space<vmem>>, vector<1x18x128xbf16>
      tpu.vector_store %arg10[%c9, %c0_56, %c0_57], %80 {strides = array<i32>} : memref<10x18x128xbf16, #tpu.memory_space<vmem>>, vector<1x18x128xbf16>,
    } else {
    }
    %cst_17 = arith.constant 0.000000e+00 : f32
    %26 = vector.broadcast %cst_17 : f32 to vector<128x128xf32>
    %c0_18 = arith.constant 0 : index
    %c0_19 = arith.constant 0 : index
    %c0_20 = arith.constant 0 : index
    %27 = vector.load %arg10[%c0_18, %c0_19, %c0_20] : memref<10x18x128xbf16, #tpu.memory_space<vmem>>, vector<8x18x128xbf16>
    %28 = vector.extract_strided_slice %27 {offsets = [0, 0, 0], sizes = [8, 16, 128], strides = [1, 1, 1]} : vector<8x18x128xbf16> to vector<8x16x128xbf16>
    %29 = vector.extract_strided_slice %27 {offsets = [0, 1, 0], sizes = [8, 16, 128], strides = [1, 1, 1]} : vector<8x18x128xbf16> to vector<8x16x128xbf16>
    %30 = vector.extract_strided_slice %27 {offsets = [0, 2, 0], sizes = [8, 16, 128], strides = [1, 1, 1]} : vector<8x18x128xbf16> to vector<8x16x128xbf16>
    %31 = tpu.concatenate %28, %29, %30 in 2 : vector<8x16x128xbf16>, vector<8x16x128xbf16>, vector<8x16x128xbf16> -> vector<8x16x384xbf16>
    %32 = vector.shape_cast %31 : vector<8x16x384xbf16> to vector<128x384xbf16>
    %c0_21 = arith.constant 0 : index
    %c0_22 = arith.constant 0 : index
    %c0_23 = arith.constant 0 : index
    %33 = vector.load %arg5[%c0_21, %c0_22, %c0_23] : memref<3x384x128xbf16, #tpu.memory_space<vmem>>, vector<1x384x128xbf16>
    %34 = vector.shape_cast %33 : vector<1x384x128xbf16> to vector<384x128xbf16>
    %cst_24 = arith.constant dense<0.000000e+00> : vector<128x128xf32>
    %35 = tpu.matmul %32, %34, %cst_24 {dimension_numbers = #tpu.dot_dimension_numbers<[1], [0], [0], [1], [0, 0, 1, 1], [], []>} : vector<128x384xbf16>, vector<384x128xbf16>, vector<128x128xf32> -> vector<128x128xf32>
    %36 = arith.addf %26, %35 : vector<128x128xf32>
    %c1_25 = arith.constant 1 : index
    %c0_26 = arith.constant 0 : index
    %c0_27 = arith.constant 0 : index
    %37 = vector.load %arg10[%c1_25, %c0_26, %c0_27] : memref<10x18x128xbf16, #tpu.memory_space<vmem>>, vector<8x18x128xbf16>
    %38 = vector.extract_strided_slice %37 {offsets = [0, 0, 0], sizes = [8, 16, 128], strides = [1, 1, 1]} : vector<8x18x128xbf16> to vector<8x16x128xbf16>
    %39 = vector.extract_strided_slice %37 {offsets = [0, 1, 0], sizes = [8, 16, 128], strides = [1, 1, 1]} : vector<8x18x128xbf16> to vector<8x16x128xbf16>
    %40 = vector.extract_strided_slice %37 {offsets = [0, 2, 0], sizes = [8, 16, 128], strides = [1, 1, 1]} : vector<8x18x128xbf16> to vector<8x16x128xbf16>
    %41 = tpu.concatenate %38, %39, %40 in 2 : vector<8x16x128xbf16>, vector<8x16x128xbf16>, vector<8x16x128xbf16> -> vector<8x16x384xbf16>
    %42 = vector.shape_cast %41 : vector<8x16x384xbf16> to vector<128x384xbf16>
    %c1_28 = arith.constant 1 : index
    %c0_29 = arith.constant 0 : index
    %c0_30 = arith.constant 0 : index
    %43 = vector.load %arg5[%c1_28, %c0_29, %c0_30] : memref<3x384x128xbf16, #tpu.memory_space<vmem>>, vector<1x384x128xbf16>
    %44 = vector.shape_cast %43 : vector<1x384x128xbf16> to vector<384x128xbf16>
    %cst_31 = arith.constant dense<0.000000e+00> : vector<128x128xf32>
    %45 = tpu.matmul %42, %44, %cst_31 {dimension_numbers = #tpu.dot_dimension_numbers<[1], [0], [0], [1], [0, 0, 1, 1], [], []>} : vector<128x384xbf16>, vector<384x128xbf16>, vector<128x128xf32> -> vector<128x128xf32>
    %46 = arith.addf %36, %45 : vector<128x128xf32>
    %c2 = arith.constant 2 : index
    %c0_32 = arith.constant 0 : index
    %c0_33 = arith.constant 0 : index
    %47 = vector.load %arg10[%c2, %c0_32, %c0_33] : memref<10x18x128xbf16, #tpu.memory_space<vmem>>, vector<8x18x128xbf16>
    %48 = vector.extract_strided_slice %47 {offsets = [0, 0, 0], sizes = [8, 16, 128], strides = [1, 1, 1]} : vector<8x18x128xbf16> to vector<8x16x128xbf16>
    %49 = vector.extract_strided_slice %47 {offsets = [0, 1, 0], sizes = [8, 16, 128], strides = [1, 1, 1]} : vector<8x18x128xbf16> to vector<8x16x128xbf16>
    %50 = vector.extract_strided_slice %47 {offsets = [0, 2, 0], sizes = [8, 16, 128], strides = [1, 1, 1]} : vector<8x18x128xbf16> to vector<8x16x128xbf16>
    %51 = tpu.concatenate %48, %49, %50 in 2 : vector<8x16x128xbf16>, vector<8x16x128xbf16>, vector<8x16x128xbf16> -> vector<8x16x384xbf16>
    %52 = vector.shape_cast %51 : vector<8x16x384xbf16> to vector<128x384xbf16>
    %c2_34 = arith.constant 2 : index
    %c0_35 = arith.constant 0 : index
    %c0_36 = arith.constant 0 : index
    %53 = vector.load %arg5[%c2_34, %c0_35, %c0_36] : memref<3x384x128xbf16, #tpu.memory_space<vmem>>, vector<1x384x128xbf16>
    %54 = vector.shape_cast %53 : vector<1x384x128xbf16> to vector<384x128xbf16>
    %cst_37 = arith.constant dense<0.000000e+00> : vector<128x128xf32>
    %55 = tpu.matmul %52, %54, %cst_37 {dimension_numbers = #tpu.dot_dimension_numbers<[1], [0], [0], [1], [0, 0, 1, 1], [], []>} : vector<128x384xbf16>, vector<384x128xbf16>, vector<128x128xf32> -> vector<128x128xf32>
    %56 = arith.addf %46, %55 : vector<128x128xf32>
    %c0_38 = arith.constant 0 : index
    %c0_39 = arith.constant 0 : index
    %57 = vector.load %arg6[%c0_38, %c0_39] : memref<1x128xf32, #tpu.memory_space<vmem>>, vector<1x128xf32>
    %58 = vector.broadcast %57 : vector<1x128xf32> to vector<128x128xf32>
    %59 = arith.addf %56, %58 : vector<128x128xf32>
    %cst_40 = arith.constant 0.000000e+00 : f32
    %60 = vector.broadcast %cst_40 : f32 to vector<128x128xf32>
    %61 = arith.maximumf %59, %60 : vector<128x128xf32>
    %62 = arith.truncf %61 : vector<128x128xf32> to vector<128x128xbf16>
    %c0_41 = arith.constant 0 : index
    %c0_42 = arith.constant 0 : index
    %63 = vector.load %arg7[%c0_41, %c0_42] : memref<128x128xbf16, #tpu.memory_space<vmem>>, vector<128x128xbf16>
    %cst_43 = arith.constant dense<0.000000e+00> : vector<128x128xf32>
    %64 = tpu.matmul %62, %63, %cst_43 {dimension_numbers = #tpu.dot_dimension_numbers<[1], [0], [0], [1], [0, 0, 1, 1], [], []>} : vector<128x128xbf16>, vector<128x128xbf16>, vector<128x128xf32> -> vector<128x128xf32>
    %c1_i32_44 = arith.constant 1 : i32
    %65 = arith.addi %1, %c1_i32_44 : i32
    %c0_45 = arith.constant 0 : index
    %66 = arith.index_cast %65 : i32 to index
    %c0_46 = arith.constant 0 : index
    %c0_47 = arith.constant 0 : index
    %67 = vector.load %arg2[%c0_45, %66, %c0_46, %c0_47] : memref<1x18x16x128xf32, #tpu.memory_space<vmem>>, vector<1x8x16x128xf32>
    %68 = vector.shape_cast %67 : vector<1x8x16x128xf32> to vector<8x16x128xf32>
    %69 = vector.shape_cast %68 : vector<8x16x128xf32> to vector<128x128xf32>
    %c0_48 = arith.constant 0 : index
    %c0_49 = arith.constant 0 : index
    %70 = vector.load %arg8[%c0_48, %c0_49] : memref<1x128xf32, #tpu.memory_space<vmem>>, vector<1x128xf32>
    %71 = vector.broadcast %70 : vector<1x128xf32> to vector<128x128xf32>
    %72 = arith.addf %64, %71 : vector<128x128xf32>
    %73 = arith.addf %72, %69 : vector<128x128xf32>
    %cst_50 = arith.constant 0.000000e+00 : f32
    %74 = vector.broadcast %cst_50 : f32 to vector<128x128xf32>
    %75 = arith.maximumf %73, %74 : vector<128x128xf32>
    %76 = vector.shape_cast %75 : vector<128x128xf32> to vector<8x16x128xf32>
    %c0_51 = arith.constant 0 : index
    %c0_52 = arith.constant 0 : index
    %c0_53 = arith.constant 0 : index
    %c0_54 = arith.constant 0 : index
    %77 = vector.load %arg9[%c0_51, %c0_52, %c0_53, %c0_54] : memref<1x8x16x128xf32, #tpu.memory_space<vmem>>, vector<1x8x16x128xf32>
    %78 = vector.shape_cast %77 : vector<1x8x16x128xf32> to vector<8x16x128xf32>
    %79 = vector.shape_cast %76 : vector<8x16x128xf32> to vector<1x8x16x128xf32>
    tpu.vector_store %arg9[%c0_51, %c0_52, %c0_53, %c0_54], %79 {strides = array<i32>} : memref<1x8x16x128xf32, #tpu.memory_space<vmem>>, vector<1x8x16x128xf32>,
    return
  }
  func.func @transform_0(%arg0: i32, %arg1: i32) -> (i32, i32, i32, i32) {
    %c0_i32 = arith.constant 0 : i32
    %c0_i32_0 = arith.constant 0 : i32
    %c0_i32_1 = arith.constant 0 : i32
    %c0_i32_2 = arith.constant 0 : i32
    return %arg0, %c0_i32, %c0_i32_0, %c0_i32_1 : i32, i32, i32, i32
  }
  func.func @transform_1(%arg0: i32, %arg1: i32) -> (i32, i32) {
    %c0_i32 = arith.constant 0 : i32
    %c0_i32_0 = arith.constant 0 : i32
    %c0_i32_1 = arith.constant 0 : i32
    return %c0_i32, %c0_i32_0 : i32, i32
  }
  func.func @transform_2(%arg0: i32, %arg1: i32) -> (i32, i32) {
    %c0_i32 = arith.constant 0 : i32
    %c0_i32_0 = arith.constant 0 : i32
    %c0_i32_1 = arith.constant 0 : i32
    return %c0_i32, %c0_i32_0 : i32, i32
  }
  func.func @transform_3(%arg0: i32, %arg1: i32) -> (i32, i32, i32) {
    %c0_i32 = arith.constant 0 : i32
    %c0_i32_0 = arith.constant 0 : i32
    %c0_i32_1 = arith.constant 0 : i32
    %c0_i32_2 = arith.constant 0 : i32
    return %c0_i32, %c0_i32_0, %c0_i32_1 : i32, i32, i32
  }
  func.func @transform_4(%arg0: i32, %arg1: i32) -> (i32, i32) {
    %c0_i32 = arith.constant 0 : i32
    %c0_i32_0 = arith.constant 0 : i32
    %c0_i32_1 = arith.constant 0 : i32
    return %c0_i32, %c0_i32_0 : i32, i32
  }
  func.func @transform_5(%arg0: i32, %arg1: i32) -> (i32, i32) {
    %c0_i32 = arith.constant 0 : i32
    %c0_i32_0 = arith.constant 0 : i32
    %c0_i32_1 = arith.constant 0 : i32
    return %c0_i32, %c0_i32_0 : i32, i32
  }
  func.func @transform_6(%arg0: i32, %arg1: i32) -> (i32, i32) {
    %c0_i32 = arith.constant 0 : i32
    %c0_i32_0 = arith.constant 0 : i32
    %c0_i32_1 = arith.constant 0 : i32
    return %c0_i32, %c0_i32_0 : i32, i32
  }
  func.func @transform_7(%arg0: i32, %arg1: i32) -> (i32, i32, i32, i32) {
    %c0_i32 = arith.constant 0 : i32
    %c0_i32_0 = arith.constant 0 : i32
    %c0_i32_1 = arith.constant 0 : i32
    return %arg0, %arg1, %c0_i32, %c0_i32_0 : i32, i32, i32, i32
  }
}

module attributes {stable_mosaic.version = 11 : i64} {
  func.func @_bottleneck_kernel(%arg0: i32, %arg1: i32, %arg2: memref<1x18x16x128xf32, #tpu.memory_space<vmem>>, %arg3: memref<128x128xbf16, #tpu.memory_space<vmem>>, %arg4: memref<1x128xf32, #tpu.memory_space<vmem>>, %arg5: memref<3x384x128xbf16, #tpu.memory_space<vmem>>, %arg6: memref<1x128xf32, #tpu.memory_space<vmem>>, %arg7: memref<128x128xbf16, #tpu.memory_space<vmem>>, %arg8: memref<1x128xf32, #tpu.memory_space<vmem>>, %arg9: memref<1x8x16x128xf32, #tpu.memory_space<vmem>>, %arg10: memref<10x18x128xbf16, #tpu.memory_space<vmem>>) attributes {dimension_semantics = [#tpu.dimension_semantics<parallel>, #tpu.dimension_semantics<parallel>], iteration_bounds = array<i64: 2, 2>, scalar_prefetch = 0 : i64, scratch_operands = 1 : i64, tpu.core_type = #tpu.core_type<tc>, window_params = [{transform_indices = @transform_0, window_bounds = array<i64: 1, 18, 16, 128>}, {pipeline_mode = #tpu.pipeline_mode<synchronous>, transform_indices = @transform_1, window_bounds = array<i64: 128, 128>}, {pipeline_mode = #tpu.pipeline_mode<synchronous>, transform_indices = @transform_2, window_bounds = array<i64: 1, 128>}, {pipeline_mode = #tpu.pipeline_mode<synchronous>, transform_indices = @transform_3, window_bounds = array<i64: 3, 384, 128>}, {pipeline_mode = #tpu.pipeline_mode<synchronous>, transform_indices = @transform_4, window_bounds = array<i64: 1, 128>}, {pipeline_mode = #tpu.pipeline_mode<synchronous>, transform_indices = @transform_5, window_bounds = array<i64: 128, 128>}, {pipeline_mode = #tpu.pipeline_mode<synchronous>, transform_indices = @transform_6, window_bounds = array<i64: 1, 128>}, {transform_indices = @transform_7, window_bounds = array<i64: 1, 8, 16, 128>}]} {
    %c8_i32 = arith.constant 8 : i32
    %0 = arith.muli %arg1, %c8_i32 : i32
    %1 = tpu.assume_multiple %0, 8 : i32
    %c0 = arith.constant 0 : index
    %2 = arith.index_cast %1 : i32 to index
    %c0_0 = arith.constant 0 : index
    %c0_1 = arith.constant 0 : index
    %3 = vector.load %arg2[%c0, %2, %c0_0, %c0_1] : memref<1x18x16x128xf32, #tpu.memory_space<vmem>>, vector<1x10x16x128xf32>
    %4 = vector.shape_cast %3 : vector<1x10x16x128xf32> to vector<10x16x128xf32>
    %5 = vector.shape_cast %4 : vector<10x16x128xf32> to vector<160x128xf32>
    %6 = arith.truncf %5 : vector<160x128xf32> to vector<160x128xbf16>
    %c0_2 = arith.constant 0 : index
    %c0_3 = arith.constant 0 : index
    %7 = vector.load %arg3[%c0_2, %c0_3] : memref<128x128xbf16, #tpu.memory_space<vmem>>, vector<128x128xbf16>
    %cst = arith.constant dense<0.000000e+00> : vector<160x128xf32>
    %8 = tpu.matmul %6, %7, %cst {dimension_numbers = #tpu.dot_dimension_numbers<[1], [0], [0], [1], [0, 0, 1, 1], [], []>} : vector<160x128xbf16>, vector<128x128xbf16>, vector<160x128xf32> -> vector<160x128xf32>
    %c0_4 = arith.constant 0 : index
    %c0_5 = arith.constant 0 : index
    %9 = vector.load %arg4[%c0_4, %c0_5] : memref<1x128xf32, #tpu.memory_space<vmem>>, vector<1x128xf32>
    %10 = vector.broadcast %9 : vector<1x128xf32> to vector<160x128xf32>
    %11 = arith.addf %8, %10 : vector<160x128xf32>
    %cst_6 = arith.constant 0.000000e+00 : f32
    %12 = vector.broadcast %cst_6 : f32 to vector<160x128xf32>
    %13 = arith.maximumf %11, %12 : vector<160x128xf32>
    %14 = vector.shape_cast %13 : vector<160x128xf32> to vector<10x16x128xf32>
    %15 = arith.truncf %14 : vector<10x16x128xf32> to vector<10x16x128xbf16>
    %c0_7 = arith.constant 0 : index
    %c1 = arith.constant 1 : index
    %c0_8 = arith.constant 0 : index
    %16 = vector.load %arg10[%c0_7, %c1, %c0_8] : memref<10x18x128xbf16, #tpu.memory_space<vmem>>, vector<10x16x128xbf16>
    tpu.vector_store %arg10[%c0_7, %c1, %c0_8], %15 {strides = array<i32>} : memref<10x18x128xbf16, #tpu.memory_space<vmem>>, vector<10x16x128xbf16>,
    %cst_9 = arith.constant 0.000000e+00 : bf16
    %17 = vector.broadcast %cst_9 : bf16 to vector<10x1x128xbf16>
    %c0_10 = arith.constant 0 : index
    %c0_11 = arith.constant 0 : index
    %c0_12 = arith.constant 0 : index
    %18 = vector.load %arg10[%c0_10, %c0_11, %c0_12] : memref<10x18x128xbf16, #tpu.memory_space<vmem>>, vector<10x1x128xbf16>
    tpu.vector_store %arg10[%c0_10, %c0_11, %c0_12], %17 {strides = array<i32>} : memref<10x18x128xbf16, #tpu.memory_space<vmem>>, vector<10x1x128xbf16>,
    %c0_13 = arith.constant 0 : index
    %c17 = arith.constant 17 : index
    %c0_14 = arith.constant 0 : index
    %19 = vector.load %arg10[%c0_13, %c17, %c0_14] : memref<10x18x128xbf16, #tpu.memory_space<vmem>>, vector<10x1x128xbf16>
    tpu.vector_store %arg10[%c0_13, %c17, %c0_14], %17 {strides = array<i32>} : memref<10x18x128xbf16, #tpu.memory_space<vmem>>, vector<10x1x128xbf16>,
    %c0_i32 = arith.constant 0 : i32
    %20 = arith.cmpi eq, %arg1, %c0_i32 : i32
    %21 = arith.extui %20 : i1 to i32
    %c0_i32_15 = arith.constant 0 : i32
    %22 = arith.cmpi ne, %21, %c0_i32_15 : i32
    scf.if %22 {
      %cst_55 = arith.constant 0.000000e+00 : bf16
      %80 = vector.broadcast %cst_55 : bf16 to vector<1x18x128xbf16>
      %c0_56 = arith.constant 0 : index
      %c0_57 = arith.constant 0 : index
      %c0_58 = arith.constant 0 : index
      %81 = vector.load %arg10[%c0_56, %c0_57, %c0_58] : memref<10x18x128xbf16, #tpu.memory_space<vmem>>, vector<1x18x128xbf16>
      tpu.vector_store %arg10[%c0_56, %c0_57, %c0_58], %80 {strides = array<i32>} : memref<10x18x128xbf16, #tpu.memory_space<vmem>>, vector<1x18x128xbf16>,
    } else {
    }
    %c1_i32 = arith.constant 1 : i32
    %23 = arith.cmpi eq, %arg1, %c1_i32 : i32
    %24 = arith.extui %23 : i1 to i32
    %c0_i32_16 = arith.constant 0 : i32
    %25 = arith.cmpi ne, %24, %c0_i32_16 : i32
    scf.if %25 {
      %cst_55 = arith.constant 0.000000e+00 : bf16
      %80 = vector.broadcast %cst_55 : bf16 to vector<1x18x128xbf16>
      %c9 = arith.constant 9 : index
      %c0_56 = arith.constant 0 : index
      %c0_57 = arith.constant 0 : index
      %81 = vector.load %arg10[%c9, %c0_56, %c0_57] : memref<10x18x128xbf16, #tpu.memory_space<vmem>>, vector<1x18x128xbf16>
      tpu.vector_store %arg10[%c9, %c0_56, %c0_57], %80 {strides = array<i32>} : memref<10x18x128xbf16, #tpu.memory_space<vmem>>, vector<1x18x128xbf16>,
    } else {
    }
    %cst_17 = arith.constant 0.000000e+00 : f32
    %26 = vector.broadcast %cst_17 : f32 to vector<128x128xf32>
    %c0_18 = arith.constant 0 : index
    %c0_19 = arith.constant 0 : index
    %c0_20 = arith.constant 0 : index
    %27 = vector.load %arg10[%c0_18, %c0_19, %c0_20] : memref<10x18x128xbf16, #tpu.memory_space<vmem>>, vector<8x18x128xbf16>
    %28 = vector.extract_strided_slice %27 {offsets = [0, 0, 0], sizes = [8, 16, 128], strides = [1, 1, 1]} : vector<8x18x128xbf16> to vector<8x16x128xbf16>
    %29 = vector.extract_strided_slice %27 {offsets = [0, 1, 0], sizes = [8, 16, 128], strides = [1, 1, 1]} : vector<8x18x128xbf16> to vector<8x16x128xbf16>
    %30 = vector.extract_strided_slice %27 {offsets = [0, 2, 0], sizes = [8, 16, 128], strides = [1, 1, 1]} : vector<8x18x128xbf16> to vector<8x16x128xbf16>
    %31 = tpu.concatenate %28, %29, %30 in 2 : vector<8x16x128xbf16>, vector<8x16x128xbf16>, vector<8x16x128xbf16> -> vector<8x16x384xbf16>
    %32 = vector.shape_cast %31 : vector<8x16x384xbf16> to vector<128x384xbf16>
    %c0_21 = arith.constant 0 : index
    %c0_22 = arith.constant 0 : index
    %c0_23 = arith.constant 0 : index
    %33 = vector.load %arg5[%c0_21, %c0_22, %c0_23] : memref<3x384x128xbf16, #tpu.memory_space<vmem>>, vector<1x384x128xbf16>
    %34 = vector.shape_cast %33 : vector<1x384x128xbf16> to vector<384x128xbf16>
    %cst_24 = arith.constant dense<0.000000e+00> : vector<128x128xf32>
    %35 = tpu.matmul %32, %34, %cst_24 {dimension_numbers = #tpu.dot_dimension_numbers<[1], [0], [0], [1], [0, 0, 1, 1], [], []>} : vector<128x384xbf16>, vector<384x128xbf16>, vector<128x128xf32> -> vector<128x128xf32>
    %36 = arith.addf %26, %35 : vector<128x128xf32>
    %c1_25 = arith.constant 1 : index
    %c0_26 = arith.constant 0 : index
    %c0_27 = arith.constant 0 : index
    %37 = vector.load %arg10[%c1_25, %c0_26, %c0_27] : memref<10x18x128xbf16, #tpu.memory_space<vmem>>, vector<8x18x128xbf16>
    %38 = vector.extract_strided_slice %37 {offsets = [0, 0, 0], sizes = [8, 16, 128], strides = [1, 1, 1]} : vector<8x18x128xbf16> to vector<8x16x128xbf16>
    %39 = vector.extract_strided_slice %37 {offsets = [0, 1, 0], sizes = [8, 16, 128], strides = [1, 1, 1]} : vector<8x18x128xbf16> to vector<8x16x128xbf16>
    %40 = vector.extract_strided_slice %37 {offsets = [0, 2, 0], sizes = [8, 16, 128], strides = [1, 1, 1]} : vector<8x18x128xbf16> to vector<8x16x128xbf16>
    %41 = tpu.concatenate %38, %39, %40 in 2 : vector<8x16x128xbf16>, vector<8x16x128xbf16>, vector<8x16x128xbf16> -> vector<8x16x384xbf16>
    %42 = vector.shape_cast %41 : vector<8x16x384xbf16> to vector<128x384xbf16>
    %c1_28 = arith.constant 1 : index
    %c0_29 = arith.constant 0 : index
    %c0_30 = arith.constant 0 : index
    %43 = vector.load %arg5[%c1_28, %c0_29, %c0_30] : memref<3x384x128xbf16, #tpu.memory_space<vmem>>, vector<1x384x128xbf16>
    %44 = vector.shape_cast %43 : vector<1x384x128xbf16> to vector<384x128xbf16>
    %cst_31 = arith.constant dense<0.000000e+00> : vector<128x128xf32>
    %45 = tpu.matmul %42, %44, %cst_31 {dimension_numbers = #tpu.dot_dimension_numbers<[1], [0], [0], [1], [0, 0, 1, 1], [], []>} : vector<128x384xbf16>, vector<384x128xbf16>, vector<128x128xf32> -> vector<128x128xf32>
    %46 = arith.addf %36, %45 : vector<128x128xf32>
    %c2 = arith.constant 2 : index
    %c0_32 = arith.constant 0 : index
    %c0_33 = arith.constant 0 : index
    %47 = vector.load %arg10[%c2, %c0_32, %c0_33] : memref<10x18x128xbf16, #tpu.memory_space<vmem>>, vector<8x18x128xbf16>
    %48 = vector.extract_strided_slice %47 {offsets = [0, 0, 0], sizes = [8, 16, 128], strides = [1, 1, 1]} : vector<8x18x128xbf16> to vector<8x16x128xbf16>
    %49 = vector.extract_strided_slice %47 {offsets = [0, 1, 0], sizes = [8, 16, 128], strides = [1, 1, 1]} : vector<8x18x128xbf16> to vector<8x16x128xbf16>
    %50 = vector.extract_strided_slice %47 {offsets = [0, 2, 0], sizes = [8, 16, 128], strides = [1, 1, 1]} : vector<8x18x128xbf16> to vector<8x16x128xbf16>
    %51 = tpu.concatenate %48, %49, %50 in 2 : vector<8x16x128xbf16>, vector<8x16x128xbf16>, vector<8x16x128xbf16> -> vector<8x16x384xbf16>
    %52 = vector.shape_cast %51 : vector<8x16x384xbf16> to vector<128x384xbf16>
    %c2_34 = arith.constant 2 : index
    %c0_35 = arith.constant 0 : index
    %c0_36 = arith.constant 0 : index
    %53 = vector.load %arg5[%c2_34, %c0_35, %c0_36] : memref<3x384x128xbf16, #tpu.memory_space<vmem>>, vector<1x384x128xbf16>
    %54 = vector.shape_cast %53 : vector<1x384x128xbf16> to vector<384x128xbf16>
    %cst_37 = arith.constant dense<0.000000e+00> : vector<128x128xf32>
    %55 = tpu.matmul %52, %54, %cst_37 {dimension_numbers = #tpu.dot_dimension_numbers<[1], [0], [0], [1], [0, 0, 1, 1], [], []>} : vector<128x384xbf16>, vector<384x128xbf16>, vector<128x128xf32> -> vector<128x128xf32>
    %56 = arith.addf %46, %55 : vector<128x128xf32>
    %c0_38 = arith.constant 0 : index
    %c0_39 = arith.constant 0 : index
    %57 = vector.load %arg6[%c0_38, %c0_39] : memref<1x128xf32, #tpu.memory_space<vmem>>, vector<1x128xf32>
    %58 = vector.broadcast %57 : vector<1x128xf32> to vector<128x128xf32>
    %59 = arith.addf %56, %58 : vector<128x128xf32>
    %cst_40 = arith.constant 0.000000e+00 : f32
    %60 = vector.broadcast %cst_40 : f32 to vector<128x128xf32>
    %61 = arith.maximumf %59, %60 : vector<128x128xf32>
    %62 = arith.truncf %61 : vector<128x128xf32> to vector<128x128xbf16>
    %c0_41 = arith.constant 0 : index
    %c0_42 = arith.constant 0 : index
    %63 = vector.load %arg7[%c0_41, %c0_42] : memref<128x128xbf16, #tpu.memory_space<vmem>>, vector<128x128xbf16>
    %cst_43 = arith.constant dense<0.000000e+00> : vector<128x128xf32>
    %64 = tpu.matmul %62, %63, %cst_43 {dimension_numbers = #tpu.dot_dimension_numbers<[1], [0], [0], [1], [0, 0, 1, 1], [], []>} : vector<128x128xbf16>, vector<128x128xbf16>, vector<128x128xf32> -> vector<128x128xf32>
    %c1_i32_44 = arith.constant 1 : i32
    %65 = arith.addi %1, %c1_i32_44 : i32
    %c0_45 = arith.constant 0 : index
    %66 = arith.index_cast %65 : i32 to index
    %c0_46 = arith.constant 0 : index
    %c0_47 = arith.constant 0 : index
    %67 = vector.load %arg2[%c0_45, %66, %c0_46, %c0_47] : memref<1x18x16x128xf32, #tpu.memory_space<vmem>>, vector<1x8x16x128xf32>
    %68 = vector.shape_cast %67 : vector<1x8x16x128xf32> to vector<8x16x128xf32>
    %69 = vector.shape_cast %68 : vector<8x16x128xf32> to vector<128x128xf32>
    %c0_48 = arith.constant 0 : index
    %c0_49 = arith.constant 0 : index
    %70 = vector.load %arg8[%c0_48, %c0_49] : memref<1x128xf32, #tpu.memory_space<vmem>>, vector<1x128xf32>
    %71 = vector.broadcast %70 : vector<1x128xf32> to vector<128x128xf32>
    %72 = arith.addf %64, %71 : vector<128x128xf32>
    %73 = arith.addf %72, %69 : vector<128x128xf32>
    %cst_50 = arith.constant 0.000000e+00 : f32
    %74 = vector.broadcast %cst_50 : f32 to vector<128x128xf32>
    %75 = arith.maximumf %73, %74 : vector<128x128xf32>
    %76 = vector.shape_cast %75 : vector<128x128xf32> to vector<8x16x128xf32>
    %c0_51 = arith.constant 0 : index
    %c0_52 = arith.constant 0 : index
    %c0_53 = arith.constant 0 : index
    %c0_54 = arith.constant 0 : index
    %77 = vector.load %arg9[%c0_51, %c0_52, %c0_53, %c0_54] : memref<1x8x16x128xf32, #tpu.memory_space<vmem>>, vector<1x8x16x128xf32>
    %78 = vector.shape_cast %77 : vector<1x8x16x128xf32> to vector<8x16x128xf32>
    %79 = vector.shape_cast %76 : vector<8x16x128xf32> to vector<1x8x16x128xf32>
    tpu.vector_store %arg9[%c0_51, %c0_52, %c0_53, %c0_54], %79 {strides = array<i32>} : memref<1x8x16x128xf32, #tpu.memory_space<vmem>>, vector<1x8x16x128xf32>,
    return
  }
  func.func @transform_0(%arg0: i32, %arg1: i32) -> (i32, i32, i32, i32) {
    %c0_i32 = arith.constant 0 : i32
    %c0_i32_0 = arith.constant 0 : i32
    %c0_i32_1 = arith.constant 0 : i32
    %c0_i32_2 = arith.constant 0 : i32
    return %arg0, %c0_i32, %c0_i32_0, %c0_i32_1 : i32, i32, i32, i32
  }
  func.func @transform_1(%arg0: i32, %arg1: i32) -> (i32, i32) {
    %c0_i32 = arith.constant 0 : i32
    %c0_i32_0 = arith.constant 0 : i32
    %c0_i32_1 = arith.constant 0 : i32
    return %c0_i32, %c0_i32_0 : i32, i32
  }
  func.func @transform_2(%arg0: i32, %arg1: i32) -> (i32, i32) {
    %c0_i32 = arith.constant 0 : i32
    %c0_i32_0 = arith.constant 0 : i32
    %c0_i32_1 = arith.constant 0 : i32
    return %c0_i32, %c0_i32_0 : i32, i32
  }
  func.func @transform_3(%arg0: i32, %arg1: i32) -> (i32, i32, i32) {
    %c0_i32 = arith.constant 0 : i32
    %c0_i32_0 = arith.constant 0 : i32
    %c0_i32_1 = arith.constant 0 : i32
    %c0_i32_2 = arith.constant 0 : i32
    return %c0_i32, %c0_i32_0, %c0_i32_1 : i32, i32, i32
  }
  func.func @transform_4(%arg0: i32, %arg1: i32) -> (i32, i32) {
    %c0_i32 = arith.constant 0 : i32
    %c0_i32_0 = arith.constant 0 : i32
    %c0_i32_1 = arith.constant 0 : i32
    return %c0_i32, %c0_i32_0 : i32, i32
  }
  func.func @transform_5(%arg0: i32, %arg1: i32) -> (i32, i32) {
    %c0_i32 = arith.constant 0 : i32
    %c0_i32_0 = arith.constant 0 : i32
    %c0_i32_1 = arith.constant 0 : i32
    return %c0_i32, %c0_i32_0 : i32, i32
  }
  func.func @transform_6(%arg0: i32, %arg1: i32) -> (i32, i32) {
    %c0_i32 = arith.constant 0 : i32
    %c0_i32_0 = arith.constant 0 : i32
    %c0_i32_1 = arith.constant 0 : i32
    return %c0_i32, %c0_i32_0 : i32, i32
  }
  func.func @transform_7(%arg0: i32, %arg1: i32) -> (i32, i32, i32, i32) {
    %c0_i32 = arith.constant 0 : i32
    %c0_i32_0 = arith.constant 0 : i32
    %c0_i32_1 = arith.constant 0 : i32
    return %arg0, %arg1, %c0_i32, %c0_i32_0 : i32, i32, i32, i32
  }
}

</mosaic_0001>

<bundles_post_ra>
// kernel: tpu_custom_call.1
= control target key start
LH: loop header
LB: loop body
LE: loop exit
PB: predicated region body
PF: predicated region fallthrough
CT: control target
= control target key end

     0   :  { %s5501_s0 = inlined_call_operand.hbm [shape: f32[2,18,16,128], index: 0, kind: input, shape index: {}]   ;;  %s5502_s1 = inlined_call_operand.hbm [shape: bf16[128,128], index: 1, kind: input, shape index: {}]   ;;  %s5503_s2 = inlined_call_operand.vmem [shape: f32[1,128], index: 2, kind: input, shape index: {}]   ;;  %s5504_s3 = inlined_call_operand.hbm [shape: bf16[3,384,128], index: 3, kind: input, shape index: {}]   ;;  %s5505_s4 = inlined_call_operand.vmem [shape: f32[1,128], index: 4, kind: input, shape index: {}]   ;;  %s5506_s5 = inlined_call_operand.hbm [shape: bf16[128,128], index: 5, kind: input, shape index: {}]   ;;  %s5507_s6 = inlined_call_operand.vmem [shape: f32[1,128], index: 6, kind: input, shape index: {}]   ;;  %s5508_s7 = inlined_call_operand.hbm [shape: f32[2,16,16,128], index: 7, kind: output, shape index: {}]  }
   0x1   :  { %5521 = sst [smem:[#allocation23_spill]] %s5502_s1 }
   0x2   :  { %5522 = sst [smem:[#allocation24_spill]] %s5504_s3 }
   0x3   :  { %5523 = sst [smem:[#allocation25_spill]] %s5506_s5 }
   0x4   :  { %5524 = sst [smem:[#allocation26_spill]] %s5508_s7 }
   0x5   :  { %12 = vsyncpa [#allocation4], 0 }
   0x6   :  { %14 = vsyncpa [#allocation4 + $0x1], 0 }
   0x7   :  { %15 = vsyncpa [#allocation7], 0 }
   0x8   :  { %16 = vsyncpa [#allocation10], 0 }
   0x9   :  { %17 = vsyncpa [#allocation5], 0 }
   0xa   :  { %19 = vsyncpa [#allocation5 + $0x1], 0  ;;  %s4552_s24 = smov 0   ;;  %s4554_s25 = smov 0  }
   0xb   :  { %s4556_s26 = smov 0   ;;  %s4558_s27 = smov 0  }
   0xc   :  { %s4560_s28 = smov 0   ;;  %s4562_s29 = smov 0  }
   0xd   :  { %s4564_s30 = smov 0   ;;  %s4566_s8 = smov 0  }
   0xe   :  { %s4568_s9 = smov 0   ;;  %s4570_s10 = smov 0  }
   0xf   :  { %s4572_s11 = smov 0  }
  0x10 LB: > { %5525 = sst [smem:[#allocation16_spill]] %s4457_s24  ;;  %s3305_s12 = sadd.s32 4294967295, %s4497_s11   ;;  %s4497_s11 = sphi %s4572_s11, %s25_s11   ;;  %s4493_s10 = sphi %s4570_s10, %s5571_s10   ;;  %s4489_s9 = sphi %s4568_s9, %s5562_s9   ;;  %s4485_s8 = sphi %s4566_s8, %s5570_s8   ;;  %s4481_s30 = sphi %s4564_s30, %s5561_s30   ;;  %s4477_s29 = sphi %s4562_s29, %s5569_s29   ;;  %s4473_s28 = sphi %s4560_s28, %s5568_s28   ;;  %s4469_s27 = sphi %s4558_s27, %s5567_s27   ;;  %s4465_s26 = sphi %s4556_s26, %s5566_s26   ;;  %s4461_s25 = sphi %s4554_s25, %s5565_s25   ;;  %s4457_s24 = sphi %s4552_s24, %s5564_s24  }
  0x11   : > { %5526 = sst [smem:[#allocation17_spill]] %s4485_s8  ;;  %s3306_s13 = sadd.s32 4294967294, %s4497_s11  }
  0x12   : > { %5527 = sst [smem:[#allocation18_spill]] %s4489_s9  ;;  %p57_p0 = scmp.ne.s32.totalorder %s4473_s28, %s4469_s27 }
  0x13   : > { %p4608_p1 = scmp.eq.s32.totalorder %s3305_s12, 0  ;;  %p208_p2 = scmp.ne.s32.totalorder %s4465_s26, %s4461_s25 }
  0x14   : > { %p209_p4 = scmp.eq.s32.totalorder %s3305_s12, 3  ;;  %p214_p5 = scmp.ne.s32.totalorder %s4461_s25, %s4457_s24 }
  0x15   : > { %s5528_s14 = scalar_select %p4608_p1, 1, 0 }
  0x16   : > { %p4617_p3 = por %p4608_p1, %p57_p0  ;;  %p215_p6 = scmp.eq.s32.totalorder %s3306_s13, 3 }
  0x17   : > { %p4623_p7 = por %p209_p4, %p208_p2  ;;  %p3307_p8 = scmp.ge.s32.totalorder %s4497_s11, 1 }
  0x18   : > { %s5529_s16 = scalar_select %p4617_p3, 1, 0 }
  0x19   : > { %s5530_s17 = scalar_select %p4623_p7, 1, 0 }
  0x1a   : > { %p4628_p9 = por %p215_p6, %p214_p5  ;;  %p222_p10 = scmp.lt.s32.totalorder %s4497_s11, 5 }
  0x1b   : > { %5531 = sst [smem:[#allocation19_spill]] %s5530_s17  ;;  %s4499_s20 = smov [#allocation6]  }
  0x1c   : > { %s5532_s18 = scalar_select %p4628_p9, 1, 0 }
  0x1d   : > { %p4633_p11 = pnand %p3307_p8, %p222_p10  ;;  %s234_s21 = sshll.u32 %s4499_s20, 4  ;;  %s235_s21 = int_to_ptr.vmem [resolvable:$true] %s234_s21 }
  0x1e   : > { %5533 = sst [smem:[#allocation20_spill]] %s5532_s18  ;;  %s4500_s23 = smov [#allocation8]  }
  0x1f   : > { %p4002_p12 = pneg %p4633_p11  ;;  %s250_s27 = sshll.u32 %s4500_s23, 4  ;;  %s251_s27 = int_to_ptr.vmem [resolvable:$true] %s250_s27 }
  0x20   : > { %s4501_s12 = smov [#allocation9]   ;;  %s4274_s15 = scalar_lea.vmem %s235_s21, 1024 }
  0x21   : > { %p4641_p13 = pnand %p4002_p12, %p4608_p1  ;;  %s266_s13 = sshll.u32 %s4501_s12, 4  ;;  %s267_s13 = int_to_ptr.vmem [resolvable:$true] %s266_s13 }
  0x22   : > { %p4275_p2 = scmp.ne.s32.totalorder %s235_s21, %s4274_s15  ;;  %p4282_p6 = scmp.lt.s32.totalorder %s235_s21, %s235_s21 }
  0x23   : > { %p4265_p0 = pneg %p4641_p13  ;;  %p4283_p8 = scmp.lt.s32.totalorder %s4274_s15, %s4274_s15 }
  0x25   : > { %p4277_p4 = pnand %p4275_p2, %p4265_p0  ;;  %p4284_p10 = por %p4283_p8, %p4282_p6 }
  0x27   : > { %p4278_p5 = pneg %p4277_p4 }
  0x29   : > { %p4285_p12 = pnand %p4284_p10, %p4278_p5 }
  0x2b   : > { %4288 = shalt.err (!%p4285_p12)
}
  0x2c   : > { %s4502_s20 = smov 64   ;;  %s4503_s23 = smov 4  }
  0x2d   : > { %s5536_s1 = sld [smem:[#allocation23_spill]]  ;;  %s4300_s24 = scalar_lea.vmem %s251_s27, 9216 }
  0x2e   : > { %p4301_p9 = scmp.ne.s32.totalorder %s251_s27, %s4300_s24  ;;  %p4308_p7 = scmp.lt.s32.totalorder %s251_s27, %s251_s27 }
  0x2f   : > { %p4309_p1 = scmp.lt.s32.totalorder %s4300_s24, %s4300_s24 }
  0x30   : > { %p4303_p2 = pnand %p4301_p9, %p4265_p0 }
  0x31   : > { %p4310_p6 = por %p4309_p1, %p4308_p7 }
  0x32   : > { %p4304_p4 = pneg %p4303_p2 }
  0x33   : > { %4005 = dma.hbm_to_vmem [thread:$0]  (!%p4641_p13), %s5536_s1, 1024, %s235_s21, [#allocation7], %s4502_s20, %s4502_s20, %s4503_s23  }
  0x34   : > { %p4311_p5 = pnand %p4310_p6, %p4304_p4 }
  0x36   : > { %4314 = shalt.err (!%p4311_p5)
}
  0x37   : > { %s5537_s3 = sld [smem:[#allocation24_spill]]  ;;  %s4326_s18 = scalar_lea.vmem %s267_s13, 1024 }
  0x38   : > { %p4327_p8 = scmp.ne.s32.totalorder %s267_s13, %s4326_s18  ;;  %p4334_p12 = scmp.lt.s32.totalorder %s267_s13, %s267_s13 }
  0x39   : > { %p4335_p2 = scmp.lt.s32.totalorder %s4326_s18, %s4326_s18 }
  0x3a   : > { %p4329_p10 = pnand %p4327_p8, %p4265_p0 }
  0x3b   : > { %p4336_p3 = por %p4335_p2, %p4334_p12 }
  0x3c   : > { %p4330_p9 = pneg %p4329_p10 }
  0x3d   : > { %4008 = dma.hbm_to_vmem [thread:$0]  (!%p4641_p13), %s5537_s3, 9216, %s251_s27, [#allocation7], %s4502_s20, %s4502_s20, %s4503_s23  }
  0x3e   : > { %p4337_p1 = pnand %p4336_p3, %p4330_p9 }
  0x40   : > { %4340 = shalt.err (!%p4337_p1)
}
  0x41   : > { %s5538_s5 = sld [smem:[#allocation25_spill]]  ;;  %s34_s7 = sadd.s32 1, %s4489_s9 }
  0x42   : > { %p35_p3 = scmp.ge.s32.totalorder %s34_s7, 2  ;;  %s37_s27 = sadd.s32 1, %s4493_s10 }
  0x43   : > { %s44_s22 = sadd.s32 1, %s4477_s29  ;;  %p51_p7 = scmp.ne.s32.totalorder %s4477_s29, %s4473_s28 }
  0x44   : > { %s5573_s7 = smov (%p35_p3, %s34_s7), 0  ;;  %s5575_s27 = smov (!%p35_p3, %s37_s27), %s4493_s10 }
  0x45   : > { %5539 = sst [smem:[#allocation21_spill]] %s5573_s7  ;;  %p52_p0 = scmp.eq.s32.totalorder %s4497_s11, 0 }
  0x46   : > { %s194_s12 = ssub.s32 %s4489_s9, %s5573_s7  ;;  %p39_p4 = scmp.ge.s32.totalorder %s5575_s27, 2 }
  0x47   : > { %4011 = dma.hbm_to_vmem [thread:$0]  (!%p4641_p13), %s5538_s5, 1024, %s267_s13, [#allocation10], %s4502_s20, %s4502_s20, %s4503_s23  }
  0x48   : > { %p4023_p6 = scmp.lt.s32.totalorder %s4497_s11, 4  ;;  %p4683_p13 = por %p52_p0, %p51_p7 }
  0x49   : > { %s283_s20 = sand.u32 1, %s4477_s29   ;;  %s5577_s27 = smov (%p39_p4, %s5575_s27), 0 }
  0x4a   : > { %5541 = sst [smem:[#allocation22_spill]] %s5577_s27  ;;  %s3983_s23 = smul.u32 288, %s283_s20 }
  0x4b   : > { %s41_s15 = ssub.s32 %s4493_s10, %s5577_s27  ;;  %s3984_s18 = smul.u32 4608, %s4493_s10 }
  0x4c   : > { %p42_p5 = scmp.eq.s32.totalorder %s41_s15, 0  ;;  %s195_s24 = sor.u32 %s194_s12, %s41_s15 }
  0x4d   : > { %p196_p8 = scmp.eq.s32.totalorder %s195_s24, 0  ;;  %s5542_s1 = sadd.s32 1, %s4465_s26 }
  0x4e   : > { %s4694_s21 = scalar_select %p42_p5, %s4477_s29, %s44_s22  }
  0x4f   : > { %s4699_s3 = scalar_select %p196_p8, %s4465_s26, %s5542_s1  }
  0x50   : > { %s293_s9 = scalar_lea.hbm %s5501_s0, %s3984_s18  ;;  %s287_s17 = scalar_lea.vmem [#allocation3], %s3983_s23 }
  0x51   : > { %s294_s8 = sshll.u32 %s287_s17, 4  ;;  %p4708_p10 = pnand %p4023_p6, %p4683_p13  ;;  %s295_s8 = int_to_ptr.vmem [resolvable:$true] %s294_s8 }
  0x52   : > { %s284_s12 = scalar_lea.sflag [#allocation4], %s283_s20  ;;  %s4354_s22 = scalar_lea.vmem %s295_s8, 4608 }
  0x53   : > { %p4343_p9 = pneg %p4708_p10  ;;  %p4355_p12 = scmp.ne.s32.totalorder %s295_s8, %s4354_s22 }
  0x54   : > { %s4504_s1 = smov [#allocation3]  }
  0x55   : > { %p4357_p2 = pnand %p4355_p12, %p4343_p9  ;;  %s4359_s5 = sshll.u32 %s4504_s1, 4  ;;  %s4360_s5 = int_to_ptr.vmem [resolvable:$false] %s4359_s5 }
  0x56   : > { %s4361_s7 = scalar_lea.vmem %s4360_s5, 9216  ;;  %p4362_p3 = scmp.lt.s32.totalorder %s295_s8, %s4360_s5 }
  0x57   : > { %p4358_p1 = pneg %p4357_p2  ;;  %p4363_p7 = scmp.lt.s32.totalorder %s4361_s7, %s4354_s22 }
  0x59   : > { %p4364_p0 = por %p4363_p7, %p4362_p3 }
  0x5b   : > { %p4365_p4 = pnand %p4364_p0, %p4358_p1 }
  0x5d   : > { %4368 = shalt.err (!%p4365_p4)
}
  0x5e   : > { %s4505_s17 = smov 128   ;;  %s4506_s13 = smov 8  }
  0x5f   : > { %4015 = dma.hbm_to_vmem [thread:$0]  (!%p4708_p10), %s293_s9, 4608, %s295_s8, %s284_s12, %s4505_s17, %s4505_s17, %s4506_s13  }
  0x60   : > { %306 = sbr.rel (%p4633_p11) target bundleno = 1034 (0x40a), region = 48  ;;  %s308_s20 = sand.u32 (!%p4633_p11), 1, %s4473_s28  }
  0x61   : > { %s3985_s23 = smul.u32 (!%p4633_p11), 288, %s308_s20  ;;  %s309_s15 = scalar_lea.sflag (!%p4633_p11), [#allocation4], %s308_s20 }
  0x62   : > { %p5544_p6 = scmp.ne.s32.totalorder (!%p4633_p11), %s5529_s16, 0 }
  0x63   : > { %s312_s18 = scalar_lea.vmem (!%p4633_p11), [#allocation3], %s3985_s23 }
  0x65   : > { %4440 = dma.done.wait (%p5544_p6), %s309_s15, 4608  }
  0x66   : > { %4442 = vsyncadd (%p5544_p6), %s309_s15, 4294962688  ;;  %p5545_p13 = scmp.ne.s32.totalorder %s5528_s14, 0 }
  0x68   : > { %4444 = dma.done.wait (%p5545_p13), [#allocation7], 10240  }
  0x69   : > { %4446 = vsyncadd (%p5545_p13), [#allocation7], 4294957056 }
  0x6a   : > { %4448 = dma.done.wait (%p5545_p13), [#allocation10], 1024  }
  0x6b   : > { %4450 = vsyncadd (%p5545_p13), [#allocation10], 4294966272  ;;  %s352_s8 = sand.u32 1, %s4461_s25   ;;  %v4127_v0 = vld [vmem:[#allocation6 + $0x38] sm:$0xff]   ;;  %v4128_v1 = vld [vmem:[#allocation6 + $0x30] sm:$0xff]   ;;  %s3506_s16 = sshll.u32 %s4481_s30, 7 }
  0x6c   : > { %s4734_s9 = sshll.u32 %s352_s8, 7  ;;  %3803 = vmatprep.subr.bf16.mxu0 %v4127_v0  ;;  %v4129_v2 = vld [vmem:[#allocation6 + $0x28] sm:$0xff]   ;;  %s4737_s19 = scalar_lea.vmem %s312_s18, %s3506_s16 [#allocation3]  ;;  %v4130_v3 = vld [vmem:[#allocation6 + $0x20] sm:$0xff]   ;;  %v4131_v7 = vld [vmem:[#allocation6 + $0x18] sm:$0xff]   ;;  %vm857_vm0 = vcmask 1043456   ;;  %vm864_vm3 = vcmask 1040384  }
  0x6d   : > { %3804 = vmatpush3.bf16.msra.mxu0 %v4127_v0  ;;  %v360_v4 = vld [vmem:[%s4737_s19] sm:$0xff]  ;;  %v361_v5 = vld [vmem:[%s4737_s19 + $0x8] sm:$0xff]  ;;  %v4134_v10 = vld [vmem:[#allocation6] sm:$0xff]   ;;  %vm858_vm1 = vsmask.f32 7938  ;;  %s4923_s24 = scalar_lea.vmem [#allocation11], %s4734_s9 }
  0x6e   : > { %3805 = vmatprep.subr.bf16.mxu0 %v4128_v1  ;;  %v380_v6 = vpack.c.bf16 %v361_v5, %v360_v4  ;;  %v4132_v8 = vld [vmem:[#allocation6 + $0x10] sm:$0xff]   ;;  %v4133_v9 = vld [vmem:[#allocation6 + $0x8] sm:$0xff]   ;;  %v362_v11 = vld [vmem:[%s4737_s19 + $0x10] sm:$0xff]  ;;  %vm654_vm2 = vsmask.f32 256  ;;  %p3349_p11 = scmp.ne.s32.totalorder %s4481_s30, 0 }
  0x6f   : > { %v363_v12 = vld [vmem:[%s4737_s19 + $0x18] sm:$0xff]  ;;  %v364_v13 = vld [vmem:[%s4737_s19 + $0x20] sm:$0xff]  ;;  %v365_v14 = vld [vmem:[%s4737_s19 + $0x28] sm:$0xff]  ;;  %vm655_vm5 = vsmask.f32 4368 }
  0x70   : > { %3819 = vmatprep.mubr.bf16.mxu0 %v380_v6  ;;  %v381_v15 = vpack.c.bf16 %v363_v12, %v362_v11  ;;  %v382_v16 = vpack.c.bf16 %v365_v14, %v364_v13  ;;  %v366_v17 = vld [vmem:[%s4737_s19 + $0x30] sm:$0xff]  ;;  %v367_v18 = vld [vmem:[%s4737_s19 + $0x38] sm:$0xff]  ;;  %v368_v19 = vld [vmem:[%s4737_s19 + $0x40] sm:$0xff] }
  0x71   : > { %3806 = vmatpush3.bf16.msra.mxu0 %v4128_v1  ;;  %v369_v20 = vld [vmem:[%s4737_s19 + $0x48] sm:$0xff]  ;;  %v383_v21 = vpack.c.bf16 %v367_v18, %v366_v17  ;;  %v370_v23 = vld [vmem:[%s4737_s19 + $0x50] sm:$0xff]  ;;  %v371_v24 = vld [vmem:[%s4737_s19 + $0x58] sm:$0xff] }
  0x72   : > { %3807 = vmatprep.subr.bf16.mxu0 %v4129_v2  ;;  %v384_v22 = vpack.c.bf16 %v369_v20, %v368_v19  ;;  %v372_v25 = vld [vmem:[%s4737_s19 + $0x60] sm:$0xff]  ;;  %v373_v26 = vld [vmem:[%s4737_s19 + $0x68] sm:$0xff]  ;;  %v385_v27 = vpack.c.bf16 %v371_v24, %v370_v23  ;;  %v374_v29 = vld [vmem:[%s4737_s19 + $0x70] sm:$0xff] }
  0x73   : > { %v386_v28 = vpack.c.bf16 %v373_v26, %v372_v25  ;;  %v375_v30 = vld [vmem:[%s4737_s19 + $0x78] sm:$0xff]  ;;  %v376_v31 = vld [vmem:[%s4737_s19 + $0x80] sm:$0xff]  ;;  %v377_v32 = vld [vmem:[%s4737_s19 + $0x88] sm:$0xff] }
  0x74   : > { %v387_v33 = vpack.c.bf16 %v375_v30, %v374_v29  ;;  %v388_v34 = vpack.c.bf16 %v377_v32, %v376_v31  ;;  %v378_v35 = vld [vmem:[%s4737_s19 + $0x90] sm:$0xff]  ;;  %v379_v36 = vld [vmem:[%s4737_s19 + $0x98] sm:$0xff]  ;;  %v4762_v38 = vld [vmem:[%s5503_s2] ss:$0 sm:$0xff] }
  0x75   : > { %3808 = vmatpush3.bf16.msra.mxu0 %v4129_v2  ;;  %v389_v37 = vpack.c.bf16 %v379_v36, %v378_v35  ;;  %vm4769_vm4 = vmand %vm857_vm0, %vm858_vm1  ;;  %v869_v59 = vld [vmem:[#allocation2 + $0xc] sm:$0xf]  ;;  %v860_v4 = vld [vmem:[#allocation2] sm:$0xf] }
  0x76   : > { %3809 = vmatprep.subr.bf16.mxu0 %v4130_v3  ;;  %vm4777_vm6 = vmand %vm864_vm3, %vm654_vm2 }
  0x77   : > { %vm4785_vm7 = vmor %vm654_vm2, %vm655_vm5 }
  0x78   : > { %vm4809_vm8 = vmand %vm864_vm3, %vm858_vm1 }
  0x79   : > { %3810 = vmatpush3.bf16.msra.mxu0 %v4130_v3 }
  0x7a   : > { %3811 = vmatprep.subr.bf16.mxu0 %v4131_v7 }
  0x7d   : > { %3812 = vmatpush3.bf16.msra.mxu0 %v4131_v7 }
  0x7e   : > { %3813 = vmatprep.subr.bf16.mxu0 %v4132_v8 }
  0x81   : > { %3814 = vmatpush3.bf16.msra.mxu0 %v4132_v8 }
  0x82   : > { %3815 = vmatprep.subr.bf16.mxu0 %v4133_v9 }
  0x85   : > { %3816 = vmatpush3.bf16.msra.mxu0 %v4133_v9 }
  0x86   : > { %3817 = vmatprep.subr.bf16.mxu0 %v4134_v10 }
  0x89   : > { %3818 = vmatpush3.bf16.msra.mxu0 %v4134_v10 }
  0x8c   : > { %3820 = vmatmul.mubr.bf16.vlgmr.msra.gmra.mxu0 %v381_v15 }
  0x8d   : > { %3823 = vmatprep.mubr.bf16.mxu0 %v382_v16  ;;  %v873_v16 = vld [vmem:[#allocation2 + $0x14] sm:$0x1] }
  0x94   : > { %3824 = vmatmul.mubr.bf16.gmra.mxu0 %v383_v21 }
  0x95   : > { %3827 = vmatprep.mubr.bf16.mxu0 %v384_v22 }
  0x9c   : > { %3828 = vmatmul.mubr.bf16.gmra.mxu0 %v385_v27 }
  0x9d   : > { %3831 = vmatprep.mubr.bf16.mxu0 %v386_v28 }
  0xa4   : > { %3832 = vmatmul.mubr.bf16.gmra.mxu0 %v387_v33  ;;  %v866_v33 = vld [vmem:[#allocation2 + $0x8] sm:$0x1] }
  0xa5   : > { %3835 = vmatprep.mubr.bf16.mxu0 %v388_v34 }
  0xac   : > { %3836 = vmatmul.mubr.bf16.gmra.mxu0 %v389_v37 }
 0x14c   : > { %v3821_v39 = vpop.f32.mrf.mxu0 }
 0x14d   : > { %v504_v40 = vadd.f32 %v3821_v39, %v4762_v38 }
 0x14e   : > { %v495_v41 = vpop.f32.mrf.mxu0 }
 0x14f   : > { %v576_v42 = vmax.f32 %v504_v40, 0.0  ;;  %v496_v43 = vadd.f32 %v4762_v38, %v495_v41 }
 0x150   : > { %v3822_v44 = vpop.f32.mrf.mxu0 }
 0x151   : > { %v3509_v45 = vpack.c.bf16 %v576_v42, %v576_v42  ;;  %v574_v46 = vmax.f32 %v496_v43, 0.0  ;;  %v507_v47 = vadd.f32 %v3822_v44, %v4762_v38  ;;  %v883_v42 = vld [vmem:[#allocation2 + $0x24] sm:$0xf] }
 0x152   : > { %v498_v48 = vpop.f32.mrf.mxu0 }
 0x153   : > { %v675_v49 = vshrl.u32 %v3509_v45, 16  ;;  %v3507_v50 = vpack.c.bf16 %v574_v46, %v574_v46  ;;  %v577_v51 = vmax.f32 %v507_v47, 0.0  ;;  %v499_v52 = vadd.f32 %v4762_v38, %v498_v48 }
 0x154   : > { %v3825_v53 = vpop.f32.mrf.mxu0  ;;  %v678_v55 = vshll.u32 %v3509_v45, 16 }
 0x155   : > { %v677_v54 = vrot.slane %v675_v49, 7  ;;  %v658_v56 = vshrl.u32 %v3507_v50, 16  ;;  %v3510_v57 = vpack.c.bf16 %v577_v51, %v577_v51  ;;  %v661_v60 = vshll.u32 %v3507_v50, 16 }
 0x156   : > { %v575_v61 = vmax.f32 %v499_v52, 0.0  ;;  %v520_v62 = vadd.f32 %v3825_v53, %v4762_v38  ;;  %v511_v63 = vpop.f32.mrf.mxu0 }
 0x157   : > { %v680_v0 = vor.u32 %v678_v55, %v677_v54  ;;  %v681_v1 = vrot.slane %v677_v54, 4  ;;  %v660_v2 = vrot.slane %v658_v56, 7  ;;  %v683_v3 = vshrl.u32 %v3510_v57, 16 }
 0x158   : > { %v686_v5 = vshll.u32 %v3510_v57, 16  ;;  %v3508_v6 = vpack.c.bf16 %v575_v61, %v575_v61  ;;  %v580_v7 = vmax.f32 %v520_v62, 0.0  ;;  %v512_v8 = vadd.f32 %v4762_v38, %v511_v63  ;;  %v3826_v9 = vpop.f32.mrf.mxu0 }
 0x159   : > { %v870_v11 = vsel %vm4769_vm4, %v680_v0, %v869_v59  ;;  %v663_v12 = vor.u32 %v661_v60, %v660_v2  ;;  %v664_v13 = vrot.slane %v660_v2, 4  ;;  %v685_v14 = vrot.slane %v683_v3, 7  ;;  %v876_v60 = vld [vmem:[#allocation2 + $0x18] sm:$0xf] }
 0x15a   : > { %871 = vst [vmem:[#allocation2 + $0xc] sm:$0xf] %v870_v11  ;;  %v666_v17 = vshrl.u32 %v3508_v6, 16  ;;  %v669_v18 = vshll.u32 %v3508_v6, 16  ;;  %v3513_v19 = vpack.c.bf16 %v580_v7, %v580_v7  ;;  %v578_v20 = vmax.f32 %v512_v8, 0.0  ;;  %v514_v21 = vpop.f32.mrf.mxu0 }
 0x15b   : > { %v861_v22 = vsel %vm4769_vm4, %v663_v12, %v860_v4  ;;  %v688_v23 = vor.u32 %v686_v5, %v685_v14  ;;  %v690_v24 = vrot.slane %v685_v14, 4  ;;  %v523_v25 = vadd.f32 %v3826_v9, %v4762_v38  ;;  %v887_v7 = vld [vmem:[#allocation2 + $0x2c] sm:$0x1] }
 0x15c   : > { %862 = vst [vmem:[#allocation2] sm:$0xf] %v861_v22  ;;  %v668_v26 = vrot.slane %v666_v17, 7  ;;  %v709_v27 = vshrl.u32 %v3513_v19, 16  ;;  %v712_v28 = vshll.u32 %v3513_v19, 16  ;;  %v3511_v29 = vpack.c.bf16 %v578_v20, %v578_v20  ;;  %v3829_v30 = vpop.f32.mrf.mxu0 }
 0x15d   : > { %v689_v31 = vsel %vm4785_vm7, %v681_v1, %v688_v23  ;;  %v874_v32 = vsel %vm4777_vm6, %v690_v24, %v873_v16  ;;  %v581_v34 = vmax.f32 %v523_v25, 0.0  ;;  %v515_v35 = vadd.f32 %v4762_v38, %v514_v21  ;;  %v880_v20 = vld [vmem:[#allocation2 + $0x20] sm:$0x1] }
 0x15e   : > { %872 = vst [vmem:[#allocation2 + $0x10] sm:$0xf] %v689_v31  ;;  %875 = vst [vmem:[#allocation2 + $0x14] sm:$0x1] %v874_v32  ;;  %v671_v36 = vor.u32 %v669_v18, %v668_v26  ;;  %v673_v37 = vrot.slane %v668_v26, 4  ;;  %v711_v39 = vrot.slane %v709_v27, 7  ;;  %v527_v41 = vpop.f32.mrf.mxu0  ;;  %v536_v46 = vadd.f32 %v3829_v30, %v4762_v38 }
 0x15f   : > { %v692_v40 = vshrl.u32 %v3511_v29, 16  ;;  %v695_v43 = vshll.u32 %v3511_v29, 16  ;;  %v3514_v44 = vpack.c.bf16 %v581_v34, %v581_v34  ;;  %v579_v45 = vmax.f32 %v515_v35, 0.0 }
 0x160   : > { %v672_v47 = vsel %vm4785_vm7, %v664_v13, %v671_v36  ;;  %v867_v48 = vsel %vm4777_vm6, %v673_v37, %v866_v33  ;;  %v714_v49 = vor.u32 %v712_v28, %v711_v39  ;;  %v715_v50 = vrot.slane %v711_v39, 4  ;;  %v3830_v51 = vpop.f32.mrf.mxu0  ;;  %v897_v39 = vld [vmem:[#allocation2 + $0x3c] sm:$0xf] }
 0x161   : > { %v935_v52 = vld [vmem:[#allocation2 + $0xc] sm:$0x1]  ;;  %863 = vst [vmem:[#allocation2 + $0x4] sm:$0xf] %v672_v47  ;;  %868 = vst [vmem:[#allocation2 + $0x8] sm:$0x1] %v867_v48  ;;  %v3512_v56 = vpack.c.bf16 %v579_v45, %v579_v45  ;;  %v528_v62 = vadd.f32 %v4762_v38, %v527_v41  ;;  %v539_v33 = vadd.f32 %v3830_v51, %v4762_v38 }
 0x162   : > { %v694_v53 = vrot.slane %v692_v40, 7  ;;  %v717_v54 = vshrl.u32 %v3514_v44, 16  ;;  %v720_v55 = vshll.u32 %v3514_v44, 16  ;;  %v936_v57 = vsel %vm4777_vm6, 0, %v935_v52  ;;  %v530_v63 = vpop.f32.mrf.mxu0  ;;  %v890_v48 = vld [vmem:[#allocation2 + $0x30] sm:$0xf] }
 0x163   : > { %v884_v59 = vsel %vm4769_vm4, %v714_v49, %v883_v42  ;;  %v584_v61 = vmax.f32 %v536_v46, 0.0  ;;  %937 = vst [vmem:[#allocation2 + $0xc] sm:$0x1] %v936_v57  ;;  %v932_v1 = vld [vmem:[#allocation2] sm:$0x1]  ;;  %v700_v5 = vshrl.u32 %v3512_v56, 16  ;;  %v531_v40 = vadd.f32 %v4762_v38, %v530_v63 }
 0x164   : > { %885 = vst [vmem:[#allocation2 + $0x24] sm:$0xf] %v884_v59  ;;  %v697_v2 = vor.u32 %v695_v43, %v694_v53  ;;  %v698_v3 = vrot.slane %v694_v53, 4  ;;  %v719_v4 = vrot.slane %v717_v54, 7  ;;  %v933_v6 = vsel %vm4777_vm6, 0, %v932_v1  ;;  %v3833_v12 = vpop.f32.mrf.mxu0 }
 0x165   : > { %v703_v8 = vshll.u32 %v3512_v56, 16  ;;  %v3517_v9 = vpack.c.bf16 %v584_v61, %v584_v61  ;;  %v582_v11 = vmax.f32 %v528_v62, 0.0  ;;  %934 = vst [vmem:[#allocation2] sm:$0x1] %v933_v6  ;;  %v966_v13 = vld [vmem:[#allocation2 + $0x14] sm:$0x1] }
 0x166   : > { %v877_v14 = vsel %vm4769_vm4, %v697_v2, %v876_v60  ;;  %v722_v16 = vor.u32 %v720_v55, %v719_v4  ;;  %v724_v17 = vrot.slane %v719_v4, 4  ;;  %v702_v18 = vrot.slane %v700_v5, 7  ;;  %v543_v24 = vpop.f32.mrf.mxu0 }
 0x167   : > { %v967_v19 = vsel %vm4809_vm8, 0, %v966_v13  ;;  %878 = vst [vmem:[#allocation2 + $0x18] sm:$0xf] %v877_v14  ;;  %v743_v21 = vshrl.u32 %v3517_v9, 16  ;;  %v746_v22 = vshll.u32 %v3517_v9, 16  ;;  %v3515_v23 = vpack.c.bf16 %v582_v11, %v582_v11 }
 0x168   : > { %968 = vst [vmem:[#allocation2 + $0x14] sm:$0x1] %v967_v19  ;;  %v723_v25 = vsel %vm4785_vm7, %v715_v50, %v722_v16  ;;  %v888_v26 = vsel %vm4777_vm6, %v724_v17, %v887_v7  ;;  %v705_v27 = vor.u32 %v703_v8, %v702_v18  ;;  %v707_v28 = vrot.slane %v702_v18, 4  ;;  %v963_v29 = vld [vmem:[#allocation2 + $0x8] sm:$0x1]  ;;  %v3834_v34 = vpop.f32.mrf.mxu0 }
 0x169   : > { %886 = vst [vmem:[#allocation2 + $0x28] sm:$0xf] %v723_v25  ;;  %889 = vst [vmem:[#allocation2 + $0x2c] sm:$0x1] %v888_v26  ;;  %v4823_v30 = vrot.slane %v743_v21, 7  ;;  %v726_v31 = vshrl.u32 %v3515_v23, 16  ;;  %v552_v50 = vadd.f32 %v3833_v12, %v4762_v38  ;;  %v544_v51 = vadd.f32 %v4762_v38, %v543_v24 }
 0x16a   : > { %v729_v32 = vshll.u32 %v3515_v23, 16  ;;  %v964_v35 = vsel %vm4809_vm8, 0, %v963_v29  ;;  %v706_v36 = vsel %vm4785_vm7, %v698_v3, %v705_v27  ;;  %v881_v37 = vsel %vm4777_vm6, %v707_v28, %v880_v20  ;;  %v546_v46 = vpop.f32.mrf.mxu0  ;;  %v901_v13 = vld [vmem:[#allocation2 + $0x44] sm:$0x1]  ;;  %v894_v25 = vld [vmem:[#allocation2 + $0x38] sm:$0x1] }
 0x16b   : > { %965 = vst [vmem:[#allocation2 + $0x8] sm:$0x1] %v964_v35  ;;  %v941_v41 = vld [vmem:[#allocation2 + $0x24] sm:$0x1]  ;;  %879 = vst [vmem:[#allocation2 + $0x1c] sm:$0xf] %v706_v36  ;;  %v748_v42 = vor.u32 %v746_v22, %v4823_v30  ;;  %v555_v62 = vadd.f32 %v3834_v34, %v4762_v38  ;;  %v547_v16 = vadd.f32 %v4762_v38, %v546_v46 }
 0x16c   : > { %882 = vst [vmem:[#allocation2 + $0x20] sm:$0x1] %v881_v37  ;;  %v749_v43 = vrot.slane %v4823_v30, 4  ;;  %v4835_v44 = vrot.slane %v726_v31, 7  ;;  %v585_v45 = vmax.f32 %v539_v33, 0.0  ;;  %v942_v47 = vsel %vm4777_vm6, 0, %v941_v41  ;;  %v4845_v56 = vpop.f32.mrf.mxu0 }
 0x16d   : > { %v583_v49 = vmax.f32 %v531_v40, 0.0  ;;  %943 = vst [vmem:[#allocation2 + $0x24] sm:$0x1] %v942_v47  ;;  %v898_v52 = vsel %vm4769_vm4, %v748_v42, %v897_v39  ;;  %v588_v60 = vmax.f32 %v552_v50, 0.0  ;;  %v586_v61 = vmax.f32 %v544_v51, 0.0 }
 0x16e   : > { %v731_v53 = vor.u32 %v729_v32, %v4835_v44  ;;  %v732_v54 = vrot.slane %v4835_v44, 4  ;;  %v3518_v55 = vpack.c.bf16 %v585_v45, %v585_v45  ;;  %v938_v57 = vld [vmem:[#allocation2 + $0x18] sm:$0x1]  ;;  %899 = vst [vmem:[#allocation2 + $0x3c] sm:$0xf] %v898_v52  ;;  %v559_v4 = vpop.f32.mrf.mxu0  ;;  %v589_v14 = vmax.f32 %v555_v62, 0.0 }
 0x16f   : > { %v3516_v59 = vpack.c.bf16 %v583_v49, %v583_v49  ;;  %v939_v63 = vsel %vm4777_vm6, 0, %v938_v57  ;;  %v3521_v8 = vpack.c.bf16 %v588_v60, %v588_v60  ;;  %v3519_v9 = vpack.c.bf16 %v586_v61, %v586_v61  ;;  %v911_v35 = vld [vmem:[#allocation2 + $0x54] sm:$0xf]  ;;  %v904_v44 = vld [vmem:[#allocation2 + $0x48] sm:$0xf] }
 0x170   : > { %v891_v1 = vsel %vm4769_vm4, %v731_v53, %v890_v48  ;;  %v751_v2 = vshrl.u32 %v3518_v55, 16  ;;  %v754_v3 = vshll.u32 %v3518_v55, 16  ;;  %940 = vst [vmem:[#allocation2 + $0x18] sm:$0x1] %v939_v63  ;;  %v972_v5 = vld [vmem:[#allocation2 + $0x2c] sm:$0x1]  ;;  %v3838_v27 = vpop.f32.mrf.mxu0  ;;  %v3522_v36 = vpack.c.bf16 %v589_v14, %v589_v14 }
 0x171   : > { %892 = vst [vmem:[#allocation2 + $0x30] sm:$0xf] %v891_v1  ;;  %v734_v6 = vshrl.u32 %v3516_v59, 16  ;;  %v737_v7 = vshll.u32 %v3516_v59, 16  ;;  %v973_v11 = vsel %vm4809_vm8, 0, %v972_v5  ;;  %v777_v19 = vshrl.u32 %v3521_v8, 16 }
 0x172   : > { %v753_v12 = vrot.slane %v751_v2, 7  ;;  %974 = vst [vmem:[#allocation2 + $0x2c] sm:$0x1] %v973_v11  ;;  %v780_v20 = vshll.u32 %v3521_v8, 16  ;;  %v760_v21 = vshrl.u32 %v3519_v9, 16  ;;  %v763_v26 = vshll.u32 %v3519_v9, 16  ;;  %v562_v48 = vpop.f32.mrf.mxu0 }
 0x173   : > { %v969_v17 = vld [vmem:[#allocation2 + $0x20] sm:$0x1]  ;;  %v736_v18 = vrot.slane %v734_v6, 7  ;;  %v779_v30 = vrot.slane %v777_v19, 7  ;;  %v587_v37 = vmax.f32 %v547_v16, 0.0  ;;  %v785_v47 = vshrl.u32 %v3522_v36, 16 }
 0x174   : > { %v970_v22 = vsel %vm4809_vm8, 0, %v969_v17  ;;  %v756_v23 = vor.u32 %v754_v3, %v753_v12  ;;  %v758_v24 = vrot.slane %v753_v12, 4  ;;  %v4857_v31 = vrot.slane %v760_v21, 7  ;;  %v915_v60 = vld [vmem:[#allocation2 + $0x5c] sm:$0x1] }
 0x175   : > { %971 = vst [vmem:[#allocation2 + $0x20] sm:$0x1] %v970_v22  ;;  %v739_v28 = vor.u32 %v737_v7, %v736_v18  ;;  %v741_v29 = vrot.slane %v736_v18, 4  ;;  %v947_v32 = vld [vmem:[#allocation2 + $0x3c] sm:$0x1]  ;;  %v782_v42 = vor.u32 %v780_v20, %v779_v30  ;;  %v783_v45 = vrot.slane %v779_v30, 4 }
 0x176   : > { %v757_v33 = vsel %vm4785_vm7, %v749_v43, %v756_v23  ;;  %v902_v34 = vsel %vm4777_vm6, %v758_v24, %v901_v13  ;;  %v948_v39 = vsel %vm4777_vm6, 0, %v947_v32  ;;  %v765_v46 = vor.u32 %v763_v26, %v4857_v31  ;;  %v908_v12 = vld [vmem:[#allocation2 + $0x50] sm:$0x1] }
 0x177   : > { %900 = vst [vmem:[#allocation2 + $0x40] sm:$0xf] %v757_v33  ;;  %903 = vst [vmem:[#allocation2 + $0x44] sm:$0x1] %v902_v34  ;;  %v740_v40 = vsel %vm4785_vm7, %v732_v54, %v739_v28  ;;  %v895_v41 = vsel %vm4777_vm6, %v741_v29, %v894_v25  ;;  %v912_v50 = vsel %vm4769_vm4, %v782_v42, %v911_v35  ;;  %v788_v51 = vshll.u32 %v3522_v36, 16 }
 0x178   : > { %949 = vst [vmem:[#allocation2 + $0x3c] sm:$0x1] %v948_v39  ;;  %v944_v43 = vld [vmem:[#allocation2 + $0x30] sm:$0x1]  ;;  %893 = vst [vmem:[#allocation2 + $0x34] sm:$0xf] %v740_v40  ;;  %v3520_v52 = vpack.c.bf16 %v587_v37, %v587_v37  ;;  %v905_v53 = vsel %vm4769_vm4, %v765_v46, %v904_v44  ;;  %v568_v55 = vadd.f32 %v4845_v56, %v4762_v38 }
 0x179   : > { %896 = vst [vmem:[#allocation2 + $0x38] sm:$0x1] %v895_v41  ;;  %v945_v49 = vsel %vm4777_vm6, 0, %v944_v43  ;;  %913 = vst [vmem:[#allocation2 + $0x54] sm:$0xf] %v912_v50  ;;  %v787_v54 = vrot.slane %v785_v47, 7  ;;  %v560_v57 = vadd.f32 %v4762_v38, %v559_v4  ;;  %v571_v62 = vadd.f32 %v3838_v27, %v4762_v38 }
 0x17a   : > { %946 = vst [vmem:[#allocation2 + $0x30] sm:$0x1] %v945_v49  ;;  %v766_v59 = vrot.slane %v4857_v31, 4  ;;  %906 = vst [vmem:[#allocation2 + $0x48] sm:$0xf] %v905_v53  ;;  %v768_v61 = vshrl.u32 %v3520_v52, 16  ;;  %v563_v63 = vadd.f32 %v4762_v38, %v562_v48 }
 0x17b   : > { %v790_v1 = vor.u32 %v788_v51, %v787_v54  ;;  %v792_v2 = vrot.slane %v787_v54, 4  ;;  %v592_v3 = vmax.f32 %v568_v55, 0.0  ;;  %v590_v5 = vmax.f32 %v560_v57, 0.0  ;;  %v925_v27 = vld [vmem:[#allocation2 + $0x6c] sm:$0xf] }
 0x17c   : > { %v770_v6 = vrot.slane %v768_v61, 7  ;;  %v771_v7 = vshll.u32 %v3520_v52, 16  ;;  %v593_v8 = vmax.f32 %v571_v62, 0.0  ;;  %v591_v9 = vmax.f32 %v563_v63, 0.0  ;;  %v918_v35 = vld [vmem:[#allocation2 + $0x60] sm:$0xf] }
 0x17d   : > { %v791_v4 = vsel %vm4785_vm7, %v783_v45, %v790_v1  ;;  %v916_v11 = vsel %vm4777_vm6, %v792_v2, %v915_v60  ;;  %v3525_v13 = vpack.c.bf16 %v592_v3, %v592_v3  ;;  %v3523_v14 = vpack.c.bf16 %v590_v5, %v590_v5  ;;  %v929_v42 = vld [vmem:[#allocation2 + $0x74] sm:$0x1]  ;;  %v922_v55 = vld [vmem:[#allocation2 + $0x68] sm:$0x1] }
 0x17e   : > { %v978_v56 = vld [vmem:[#allocation2 + $0x44] sm:$0x1]  ;;  %914 = vst [vmem:[#allocation2 + $0x58] sm:$0xf] %v791_v4  ;;  %917 = vst [vmem:[#allocation2 + $0x5c] sm:$0x1] %v916_v11  ;;  %v773_v17 = vor.u32 %v771_v7, %v770_v6  ;;  %v3526_v19 = vpack.c.bf16 %v593_v8, %v593_v8  ;;  %v3524_v39 = vpack.c.bf16 %v591_v9, %v591_v9 }
 0x17f   : > { %v979_v38 = vsel %vm4809_vm8, 0, %v978_v56  ;;  %v775_v18 = vrot.slane %v770_v6, 4  ;;  %v811_v21 = vshrl.u32 %v3525_v13, 16  ;;  %v794_v22 = vshrl.u32 %v3523_v14, 16 }
 0x180   : > { %v975_v16 = vld [vmem:[#allocation2 + $0x38] sm:$0x1]  ;;  %980 = vst [vmem:[#allocation2 + $0x44] sm:$0x1] %v979_v38  ;;  %v953_v23 = vld [vmem:[#allocation2 + $0x54] sm:$0x1]  ;;  %v774_v24 = vsel %vm4785_vm7, %v766_v59, %v773_v17 }
 0x181   : > { %v976_v20 = vsel %vm4809_vm8, 0, %v975_v16  ;;  %v909_v25 = vsel %vm4777_vm6, %v775_v18, %v908_v12  ;;  %v814_v26 = vshll.u32 %v3525_v13, 16  ;;  %v819_v28 = vshrl.u32 %v3526_v19, 16  ;;  %v950_v30 = vld [vmem:[#allocation2 + $0x48] sm:$0x1] }
 0x182   : > { %977 = vst [vmem:[#allocation2 + $0x38] sm:$0x1] %v976_v20  ;;  %v954_v29 = vsel %vm4777_vm6, 0, %v953_v23  ;;  %907 = vst [vmem:[#allocation2 + $0x4c] sm:$0xf] %v774_v24  ;;  %v813_v31 = vrot.slane %v811_v21, 7 }
 0x183   : > { %910 = vst [vmem:[#allocation2 + $0x50] sm:$0x1] %v909_v25  ;;  %v796_v32 = vrot.slane %v794_v22, 7  ;;  %v797_v33 = vshll.u32 %v3523_v14, 16  ;;  %955 = vst [vmem:[#allocation2 + $0x54] sm:$0x1] %v954_v29 }
 0x184   : > { %v951_v34 = vsel %vm4777_vm6, 0, %v950_v30  ;;  %v821_v36 = vrot.slane %v819_v28, 7  ;;  %v822_v37 = vshll.u32 %v3526_v19, 16  ;;  %v816_v40 = vor.u32 %v814_v26, %v813_v31 }
 0x185   : > { %952 = vst [vmem:[#allocation2 + $0x48] sm:$0x1] %v951_v34  ;;  %v799_v41 = vor.u32 %v797_v33, %v796_v32  ;;  %v817_v44 = vrot.slane %v813_v31, 4  ;;  %v802_v46 = vshrl.u32 %v3524_v39, 16  ;;  %v984_v47 = vld [vmem:[#allocation2 + $0x5c] sm:$0x1] }
 0x186   : > { %v824_v43 = vor.u32 %v822_v37, %v821_v36  ;;  %v826_v45 = vrot.slane %v821_v36, 4  ;;  %v926_v48 = vsel %vm4769_vm4, %v816_v40, %v925_v27  ;;  %v805_v50 = vshll.u32 %v3524_v39, 16 }
 0x187   : > { %v919_v49 = vsel %vm4769_vm4, %v799_v41, %v918_v35  ;;  %v985_v51 = vsel %vm4809_vm8, 0, %v984_v47  ;;  %927 = vst [vmem:[#allocation2 + $0x6c] sm:$0xf] %v926_v48  ;;  %v804_v54 = vrot.slane %v802_v46, 7  ;;  %v800_v58 = vrot.slane %v796_v32, 4 }
 0x188   : > { %920 = vst [vmem:[#allocation2 + $0x60] sm:$0xf] %v919_v49  ;;  %v825_v52 = vsel %vm4785_vm7, %v817_v44, %v824_v43  ;;  %v930_v53 = vsel %vm4777_vm6, %v826_v45, %v929_v42  ;;  %986 = vst [vmem:[#allocation2 + $0x5c] sm:$0x1] %v985_v51 }
 0x189   : > { %928 = vst [vmem:[#allocation2 + $0x70] sm:$0xf] %v825_v52  ;;  %931 = vst [vmem:[#allocation2 + $0x74] sm:$0x1] %v930_v53  ;;  %v807_v59 = vor.u32 %v805_v50, %v804_v54  ;;  %v809_v60 = vrot.slane %v804_v54, 4 }
 0x18a   : > { %v981_v57 = vld [vmem:[#allocation2 + $0x50] sm:$0x1] }
 0x18b   : > { %v982_v61 = vsel %vm4809_vm8, 0, %v981_v57  ;;  %v808_v62 = vsel %vm4785_vm7, %v800_v58, %v807_v59  ;;  %v923_v63 = vsel %vm4777_vm6, %v809_v60, %v922_v55 }
 0x18c   : > { %983 = vst [vmem:[#allocation2 + $0x50] sm:$0x1] %v982_v61  ;;  %921 = vst [vmem:[#allocation2 + $0x64] sm:$0xf] %v808_v62 }
 0x18d   : > { %924 = vst [vmem:[#allocation2 + $0x68] sm:$0x1] %v923_v63 }
 0x18e   : > { %v959_v1 = vld [vmem:[#allocation2 + $0x6c] sm:$0x1] }
 0x18f   : > { %v956_v2 = vld [vmem:[#allocation2 + $0x60] sm:$0x1]  ;;  %v960_v3 = vsel %vm4777_vm6, 0, %v959_v1 }
 0x190   : > { %v957_v5 = vsel %vm4777_vm6, 0, %v956_v2  ;;  %v990_v6 = vld [vmem:[#allocation2 + $0x74] sm:$0x1]  ;;  %961 = vst [vmem:[#allocation2 + $0x6c] sm:$0x1] %v960_v3 }
 0x191   : > { %958 = vst [vmem:[#allocation2 + $0x60] sm:$0x1] %v957_v5  ;;  %v991_v15 = vsel %vm4809_vm8, 0, %v990_v6 }
 0x192   : > { %992 = vst [vmem:[#allocation2 + $0x74] sm:$0x1] %v991_v15  ;;  %996 = sbr.rel (%p3349_p11) target bundleno = 410 (0x19a), region = 68 }
 0x194   : > { %v987_v7 = vld [vmem:[#allocation2 + $0x68] sm:$0x1] }
 0x195   : > { %v988_v8 = vsel %vm4809_vm8, 0, %v987_v7 }
 0x196   : > { %989 = vst [vmem:[#allocation2 + $0x68] sm:$0x1] %v988_v8 }
 0x197   : > { %v4507_v9 = vmov 0  }
 0x198   : > { %997 = vst [vmem:[#allocation2] sm:$0xf] %v4507_v9  ;;  %998 = vst [vmem:[#allocation2 + $0x4] sm:$0xf] %v4507_v9 }
 0x199   : > { %999 = vst [vmem:[#allocation2 + $0x8] sm:$0x1] %v4507_v9 }
 0x19a PF: > { %p3350_p5 = scmp.ne.s32.totalorder %s4481_s30, 1 }
 0x19c   : > { %1003 = sbr.rel (%p3350_p5) target bundleno = 420 (0x1a4), region = 72 }
 0x1a1   : > { %v4508_v10 = vmov 0  }
 0x1a2   : > { %1005 = vst [vmem:[#allocation2 + $0x6c] sm:$0xf] %v4508_v10  ;;  %1006 = vst [vmem:[#allocation2 + $0x70] sm:$0xf] %v4508_v10 }
 0x1a3   : > { %1007 = vst [vmem:[#allocation2 + $0x74] sm:$0x1] %v4508_v10 }
 0x1a4 PF: > { %v4135_v0 = vld [vmem:[#allocation8 + $0x138] sm:$0xff]   ;;  %v4138_v11 = vld [vmem:[#allocation8 + $0x130] sm:$0xff]   ;;  %v4141_v14 = vld [vmem:[#allocation8 + $0x128] sm:$0xff]   ;;  %vm1209_vm9 = vcmask 1046528   ;;  %vm1104_vm10 = vsmask.f32 7424 }
 0x1a5   : > { %v4136_v56 = vld [vmem:[#allocation8 + $0xf8] sm:$0xff]   ;;  %3547 = vmatprep.subr.bf16.mxu1 %v4135_v0  ;;  %v4139_v12 = vld [vmem:[#allocation8 + $0xf0] sm:$0xff]   ;;  %v4142_v38 = vld [vmem:[#allocation8 + $0xe8] sm:$0xff]   ;;  %s5554_s7 = sld [smem:[#allocation17_spill]]  ;;  %s3528_s17 = sshll.u32 %s4481_s30, 4 }
 0x1a6   : > { %v4137_v4 = vld [vmem:[#allocation8 + $0x178] sm:$0xff]   ;;  %3548 = vmatpush3.bf16.msra.mxu1 %v4136_v56  ;;  %v4140_v13 = vld [vmem:[#allocation8 + $0x170] sm:$0xff]   ;;  %v4143_v16 = vld [vmem:[#allocation8 + $0x168] sm:$0xff]   ;;  %s5555_s30 = sld [smem:[#allocation19_spill]]  ;;  %s3183_s15 = sshll.u32 %s4923_s24, 4  ;;  %s5435_s15 = int_to_ptr.vmem [resolvable:$true] %s3183_s15 }
 0x1a7   : > { %3839 = vmatprep.subr.bf16.mxu0 %v4137_v4  ;;  %3549 = vmatprep.subr.bf16.mxu1 %v4138_v11  ;;  %v4144_v17 = vld [vmem:[#allocation8 + $0x120] sm:$0xff]   ;;  %v4147_v20 = vld [vmem:[#allocation8 + $0x118] sm:$0xff]   ;;  %v4150_v23 = vld [vmem:[#allocation8 + $0x110] sm:$0xff]   ;;  %s5556_s16 = sld [smem:[#allocation26_spill]]  ;;  %s4369_s27 = scalar_lea.vmem %s5435_s15, 2048 }
 0x1a8   : > { %3840 = vmatpush3.bf16.msra.mxu0 %v4137_v4  ;;  %v4145_v18 = vld [vmem:[#allocation8 + $0xe0] sm:$0xff]   ;;  %v4149_v21 = vld [vmem:[#allocation8 + $0x158] sm:$0xff]   ;;  %v4152_v24 = vld [vmem:[#allocation8 + $0x150] sm:$0xff]   ;;  %p4370_p8 = scmp.ne.s32.totalorder %s5435_s15, %s4369_s27  ;;  %s4509_s12 = smov [#allocation11]  }
 0x1a9   : > { %3841 = vmatprep.subr.bf16.mxu0 %v4140_v13  ;;  %v4146_v19 = vld [vmem:[#allocation8 + $0x160] sm:$0xff]   ;;  %v4148_v22 = vld [vmem:[#allocation8 + $0xd8] sm:$0xff]   ;;  %v4151_v25 = vld [vmem:[#allocation8 + $0xd0] sm:$0xff]   ;;  %s4373_s22 = sshll.u32 %s4509_s12, 4  ;;  %s4374_s22 = int_to_ptr.vmem [resolvable:$false] %s4373_s22 }
 0x1aa   : > { %3550 = vmatpush3.bf16.msra.mxu1 %v4139_v12  ;;  %v4153_v26 = vld [vmem:[#allocation8 + $0x108] sm:$0xff]   ;;  %v4156_v29 = vld [vmem:[#allocation8 + $0x100] sm:$0xff]   ;;  %v4159_v32 = vld [vmem:[#allocation2 + $0xc] sm:$0xff]   ;;  %s4375_s1 = scalar_lea.vmem %s4374_s22, 4096  ;;  %p4376_p2 = scmp.lt.s32.totalorder %s5435_s15, %s4374_s22 }
 0x1ab   : > { %3551 = vmatprep.subr.bf16.mxu1 %v4141_v14  ;;  %v4154_v27 = vld [vmem:[#allocation8 + $0xc8] sm:$0xff]   ;;  %v4158_v30 = vld [vmem:[#allocation8 + $0x140] sm:$0xff]   ;;  %v4160_v33 = vld [vmem:[#allocation2 + $0x14] ss:$0 sps:$4 sm:$0x11]   ;;  %v1388_v34 = vshrl.u32 %v4159_v32, 16  ;;  %p4377_p1 = scmp.lt.s32.totalorder %s4375_s1, %s4369_s27 }
 0x1ac   : > { %3842 = vmatpush3.bf16.msra.mxu0 %v4140_v13  ;;  %v4155_v28 = vld [vmem:[#allocation8 + $0x148] sm:$0xff]   ;;  %v4157_v31 = vld [vmem:[#allocation8 + $0xc0] sm:$0xff]   ;;  %v1390_v35 = vshll.u32 %v4159_v32, 16  ;;  %v1395_v36 = vshll.u32 %v4160_v33, 16  ;;  %v1491_v37 = vrot.slane %v4159_v32, 1  ;;  %v4161_v39 = vld [vmem:[#allocation8 + $0x78] sm:$0xff]  }
 0x1ad   : > { %3843 = vmatprep.subr.bf16.mxu0 %v4143_v16  ;;  %v1492_v40 = vrot.slane %v4160_v33, 1  ;;  %v4163_v43 = vld [vmem:[#allocation2 + $0x18] sm:$0xff]   ;;  %v4164_v45 = vld [vmem:[#allocation2 + $0x20] ss:$0 sps:$4 sm:$0x11]   ;;  %v4162_v47 = vld [vmem:[#allocation8 + $0x38] sm:$0xff]   ;;  %p4378_p3 = por %p4377_p1, %p4376_p2 }
 0x1ae   : > { %3552 = vmatpush3.bf16.msra.mxu1 %v4142_v38  ;;  %v1392_v41 = vrot.slane %v1390_v35, 1  ;;  %v1397_v42 = vrot.slane %v1395_v36, 1  ;;  %v1494_v48 = vrot.slane %v4163_v43, 1  ;;  %v1495_v49 = vrot.slane %v4164_v45, 1  ;;  %v4165_v54 = vld [vmem:[#allocation8 + $0x70] sm:$0xff]   ;;  %v4169_v5 = vld [vmem:[#allocation8 + $0x68] sm:$0xff]  }
 0x1af   : > { %3553 = vmatprep.subr.bf16.mxu1 %v4144_v17  ;;  %v1493_v44 = vsel %vm1209_vm9, %v1491_v37, %v1492_v40  ;;  %v1400_v50 = vshrl.u32 %v4163_v43, 16  ;;  %v1402_v51 = vshll.u32 %v4163_v43, 16  ;;  %v1407_v53 = vshll.u32 %v4164_v45, 16  ;;  %v4930_v58 = vld [vmem:[#allocation2 + $0x24] sm:$0xff]   ;;  %v4935_v15 = vld [vmem:[#allocation2 + $0x30] sm:$0xff]   ;;  %v4173_v14 = vld [vmem:[#allocation8 + $0x60] sm:$0xff]  }
 0x1b0   : > { %3844 = vmatpush3.bf16.msra.mxu0 %v4143_v16  ;;  %v1393_v46 = vor.u32 %v1392_v41, %v1388_v34  ;;  %3855 = vmatprep.mubr.bf16.mxu0 %v1493_v44  ;;  %v1496_v55 = vsel %vm1209_vm9, %v1494_v48, %v1495_v49  ;;  %v4168_v60 = vld [vmem:[#allocation2 + $0x2c] ss:$0 sps:$4 sm:$0x11]   ;;  %v1412_v63 = vshrl.u32 %v4930_v58, 16  ;;  %v1414_v1 = vshll.u32 %v4930_v58, 16  ;;  %v4170_v9 = vld [vmem:[#allocation8 + $0x28] sm:$0xff]  }
 0x1b1   : > { %3845 = vmatprep.subr.bf16.mxu0 %v4146_v19  ;;  %v1404_v57 = vrot.slane %v1402_v51, 1  ;;  %v1409_v59 = vrot.slane %v1407_v53, 1  ;;  %v4166_v62 = vld [vmem:[#allocation8 + $0x30] sm:$0xff]   ;;  %v1497_v2 = vrot.slane %v4930_v58, 1  ;;  %v1419_v3 = vshll.u32 %v4168_v60, 16  ;;  %v4180_v35 = vld [vmem:[#allocation8 + $0x18] sm:$0xff]  }
 0x1b2   : > { %3554 = vmatpush3.bf16.msra.mxu1 %v4145_v18  ;;  %v1398_v52 = vsel %vm1104_vm10, %v1393_v46, %v1397_v42  ;;  %v1498_v6 = vrot.slane %v4168_v60, 1  ;;  %v1416_v8 = vrot.slane %v1414_v1, 1  ;;  %v4172_v56 = vld [vmem:[#allocation2 + $0x38] ss:$0 sps:$4 sm:$0x11]   ;;  %v1500_v11 = vrot.slane %v4935_v15, 1 }
 0x1b3   : > { %3555 = vmatprep.subr.bf16.mxu1 %v4147_v20  ;;  %1748 = vmatprep.mubr.bf16.mxu1 %v1398_v52  ;;  %v1405_v61 = vor.u32 %v1404_v57, %v1400_v50  ;;  %v1421_v10 = vrot.slane %v1419_v3, 1  ;;  %v1424_v12 = vshrl.u32 %v4935_v15, 16  ;;  %v1426_v13 = vshll.u32 %v4935_v15, 16  ;;  %v4175_v20 = vld [vmem:[#allocation8 + $0xb8] sm:$0xff]   ;;  %v4951_v37 = vld [vmem:[#allocation2 + $0x48] sm:$0xff]   ;;  %v4183_v40 = vld [vmem:[#allocation8 + $0xa8] sm:$0xff]  }
 0x1b4   : > { %3846 = vmatpush3.bf16.msra.mxu0 %v4146_v19  ;;  %v1499_v0 = vsel %vm1209_vm9, %v1497_v2, %v1498_v6  ;;  %v1417_v4 = vor.u32 %v1416_v8, %v1412_v63  ;;  %v1501_v38 = vrot.slane %v4172_v56, 1  ;;  %v1431_v16 = vshll.u32 %v4172_v56, 16  ;;  %v4174_v19 = vld [vmem:[#allocation8 + $0x20] sm:$0xff]   ;;  %v4185_v48 = vld [vmem:[#allocation8 + $0x50] sm:$0xff]   ;;  %v4192_v2 = vld [vmem:[#allocation8 + $0x8] sm:$0xff]   ;;  %s3502_s13 = sshll.u32 %s5554_s7, 5 }
 0x1b5   : > { %3847 = vmatprep.subr.bf16.mxu0 %v4149_v21  ;;  %v1410_v7 = vsel %vm1104_vm10, %v1405_v61, %v1409_v59  ;;  %v1428_v18 = vrot.slane %v1426_v13, 1  ;;  %v1506_v42 = vrot.slane %v4951_v37, 1  ;;  %v4184_v45 = vld [vmem:[#allocation8 + $0xa0] sm:$0xff]   ;;  %v1450_v46 = vshll.u32 %v4951_v37, 16  ;;  %v4186_v51 = vld [vmem:[#allocation8 + $0x10] sm:$0xff]   ;;  %v4965_v6 = vld [vmem:[#allocation2 + $0x60] sm:$0xff]   ;;  %s3180_s20 = sadd.s32 %s3528_s17, %s3502_s13 }
 0x1b6   : > { %3556 = vmatpush3.bf16.msra.mxu1 %v4148_v22  ;;  %v1422_v17 = vsel %vm1104_vm10, %v1417_v4, %v1421_v10  ;;  %v1433_v22 = vrot.slane %v1431_v16, 1  ;;  %v1448_v49 = vshrl.u32 %v4951_v37, 16  ;;  %v4190_v57 = vld [vmem:[#allocation2 + $0x5c] ss:$0 sps:$4 sm:$0x11]   ;;  %v4188_v60 = vld [vmem:[#allocation8 + $0x90] sm:$0xff]  }
 0x1b7   : > { %3557 = vmatprep.subr.bf16.mxu1 %v4150_v23  ;;  %v4176_v23 = vld [vmem:[#allocation8 + $0xb0] sm:$0xff]   ;;  %v1452_v53 = vrot.slane %v1450_v46, 1  ;;  %v1510_v1 = vrot.slane %v4190_v57, 1  ;;  %v1467_v3 = vshll.u32 %v4190_v57, 16  ;;  %v1512_v10 = vrot.slane %v4965_v6, 1  ;;  %v4195_v56 = vld [vmem:[#allocation8 + $0x88] sm:$0xff]  }
 0x1b8   : > { %3848 = vmatpush3.bf16.msra.mxu0 %v4149_v21  ;;  %v1502_v21 = vsel %vm1209_vm9, %v1500_v11, %v1501_v38  ;;  %v1474_v11 = vshll.u32 %v4965_v6, 16  ;;  %v4196_v13 = vld [vmem:[#allocation8 + $0x80] sm:$0xff]   ;;  %v4997_v46 = vld [vmem:[#allocation2 + $0x24] sm:$0xff]   ;;  %s3503_s23 = sshll.u32 %s3180_s20, 7  ;;  %p5557_p10 = scmp.ne.s32.totalorder %s5555_s30, 0 }
 0x1b9   : > { %3849 = vmatprep.subr.bf16.mxu0 %v4152_v24  ;;  %v1453_v63 = vor.u32 %v1452_v53, %v1448_v49  ;;  %v1469_v4 = vrot.slane %v1467_v3, 1  ;;  %v4197_v38 = vld [vmem:[#allocation8 + $0x40] sm:$0xff]   ;;  %s5433_s14 = scalar_lea.hbm %s5556_s16, %s3503_s23 }
 0x1ba   : > { %3558 = vmatpush3.bf16.msra.mxu1 %v4151_v25  ;;  %v4944_v25 = vld [vmem:[#allocation2 + $0x3c] sm:$0xff]   ;;  %v1476_v16 = vrot.slane %v1474_v11, 1  ;;  %v5013_v3 = vld [vmem:[#allocation2 + $0x38] ss:$0 sps:$4 sm:$0x11]   ;;  %p4371_p9 = pnand %p4370_p8, %p5557_p10 }
 0x1bb   : > { %3559 = vmatprep.subr.bf16.mxu1 %v4153_v26  ;;  %v4178_v26 = vld [vmem:[#allocation2 + $0x44] ss:$0 sps:$4 sm:$0x11]  }
 0x1bc   : > { %3850 = vmatpush3.bf16.msra.mxu0 %v4152_v24  ;;  %v1429_v24 = vor.u32 %v1428_v18, %v1424_v12  ;;  %v4198_v18 = vld [vmem:[#allocation8] sm:$0xff]   ;;  %p4372_p12 = pneg %p4371_p9 }
 0x1bd   : > { %3851 = vmatprep.subr.bf16.mxu0 %v4155_v28 }
 0x1be   : > { %3560 = vmatpush3.bf16.msra.mxu1 %v4154_v27  ;;  %v4179_v27 = vld [vmem:[#allocation8 + $0x58] sm:$0xff]   ;;  %v1434_v33 = vsel %vm1104_vm10, %v1429_v24, %v1433_v22  ;;  %p4379_p7 = pnand %p4378_p3, %p4372_p12 }
 0x1bf   : > { %3561 = vmatprep.subr.bf16.mxu1 %v4156_v29  ;;  %v1438_v29 = vshll.u32 %v4944_v25, 16  ;;  %v4979_v24 = vld [vmem:[#allocation2 + $0x14] ss:$0 sps:$4 sm:$0x11]  }
 0x1c0   : > { %3852 = vmatpush3.bf16.msra.mxu0 %v4155_v28  ;;  %v1436_v28 = vshrl.u32 %v4944_v25, 16 }
 0x1c1   : > { %3853 = vmatprep.subr.bf16.mxu0 %v4158_v30  ;;  %v1440_v34 = vrot.slane %v1438_v29, 1  ;;  %v1214_v29 = vrot.slane %v4979_v24, 1 }
 0x1c2   : > { %3562 = vmatpush3.bf16.msra.mxu1 %v4157_v31  ;;  %v1443_v31 = vshll.u32 %v4178_v26, 16 }
 0x1c3   : > { %3627 = vmatprep.subr.bf16.mxu1 %v4161_v39  ;;  %v4182_v39 = vld [vmem:[#allocation2 + $0x50] ss:$0 sps:$4 sm:$0x11]  }
 0x1c4   : > { %3854 = vmatpush3.bf16.msra.mxu0 %v4158_v30  ;;  %v1503_v30 = vrot.slane %v4944_v25, 1  ;;  %v1445_v41 = vrot.slane %v1443_v31, 1  ;;  %v1507_v44 = vrot.slane %v4182_v39, 1  ;;  %v1455_v50 = vshll.u32 %v4182_v39, 16 }
 0x1c5   : > { %1749 = vmatmul.mubr.bf16.vlgmr.msra.gmra.mxu1 %v4159_v32  ;;  %3871 = vmatprep.subr.bf16.mxu0 %v4175_v20  ;;  %v1504_v32 = vrot.slane %v4178_v26, 1  ;;  %v4203_v26 = vld [vmem:[#allocation8 + $0x1f8] sm:$0xff]  }
 0x1c6   : > { %3628 = vmatpush3.bf16.msra.mxu1 %v4162_v47  ;;  %1756 = vmatprep.mubr.bf16.mxu1 %v1410_v7  ;;  %v1508_v47 = vsel %vm1209_vm9, %v1506_v42, %v1507_v44  ;;  %v1457_v59 = vrot.slane %v1455_v50, 1  ;;  %v4989_v42 = vld [vmem:[#allocation8 + $0x238] sm:$0xff]   ;;  %v4991_v44 = vld [vmem:[#allocation2 + $0x18] sm:$0xff]   ;;  %v4212_v50 = vld [vmem:[#allocation8 + $0x1e8] sm:$0xff]  }
 0x1c7   : > { %3856 = vmatmul.mubr.bf16.vlgmr.msra.gmra.mxu0 %v1496_v55  ;;  %3629 = vmatprep.subr.bf16.mxu1 %v4165_v54  ;;  %v1505_v36 = vsel %vm1209_vm9, %v1503_v30, %v1504_v32  ;;  %v4187_v54 = vld [vmem:[#allocation8 + $0x98] sm:$0xff]  }
 0x1c8   : > { %3859 = vmatprep.mubr.bf16.mxu0 %v1499_v0  ;;  %3872 = vmatpush3.bf16.msra.mxu0 %v4175_v20  ;;  %v4959_v55 = vld [vmem:[#allocation2 + $0x54] sm:$0xff]   ;;  %v1458_v8 = vsel %vm1104_vm10, %v1453_v63, %v1457_v59 }
 0x1c9   : > { %3873 = vmatprep.subr.bf16.mxu0 %v4176_v23  ;;  %v1462_v61 = vshll.u32 %v4959_v55, 16  ;;  %v1460_v7 = vshrl.u32 %v4959_v55, 16  ;;  %v4204_v32 = vld [vmem:[#allocation8 + $0x1b8] sm:$0xff]   ;;  %v4214_v59 = vld [vmem:[#allocation8 + $0x1e0] sm:$0xff]  }
 0x1ca   : > { %3630 = vmatpush3.bf16.msra.mxu1 %v4166_v62  ;;  %v1509_v62 = vrot.slane %v4959_v55, 1 }
 0x1cb   : > { %3631 = vmatprep.subr.bf16.mxu1 %v4169_v5 }
 0x1cc   : > { %3874 = vmatpush3.bf16.msra.mxu0 %v4176_v23  ;;  %v1511_v5 = vsel %vm1209_vm9, %v1509_v62, %v1510_v1  ;;  %v4977_v23 = vld [vmem:[#allocation2 + $0xc] sm:$0xff]   ;;  %v1125_v1 = vshll.u32 %v4979_v24, 16 }
 0x1cd   : > { %1757 = vmatmul.mubr.bf16.gmra.mxu1 %v4163_v43  ;;  %v1441_v43 = vor.u32 %v1440_v34, %v1436_v28  ;;  %3875 = vmatprep.subr.bf16.mxu0 %v4183_v40  ;;  %v1213_v28 = vrot.slane %v4977_v23, 1 }
 0x1ce   : > { %1764 = vmatprep.mubr.bf16.mxu1 %v1422_v17  ;;  %3632 = vmatpush3.bf16.msra.mxu1 %v4170_v9  ;;  %v1464_v9 = vrot.slane %v1462_v61, 1  ;;  %v1120_v61 = vshll.u32 %v4977_v23, 16 }
 0x1cf   : > { %3860 = vmatmul.mubr.bf16.gmra.mxu0 %v1502_v21  ;;  %3633 = vmatprep.subr.bf16.mxu1 %v4173_v14  ;;  %v1446_v52 = vsel %vm1104_vm10, %v1441_v43, %v1445_v41  ;;  %v1472_v14 = vshrl.u32 %v4965_v6, 16  ;;  %v4200_v21 = vld [vmem:[#allocation2 + $0x8] ss:$0 sps:$4 sm:$0x11]  }
 0x1d0   : > { %3863 = vmatprep.mubr.bf16.mxu0 %v1505_v36  ;;  %3876 = vmatpush3.bf16.msra.mxu0 %v4183_v40  ;;  %v1465_v20 = vor.u32 %v1464_v9, %v1460_v7  ;;  %v1215_v36 = vsel %vm1209_vm9, %v1213_v28, %v1214_v29  ;;  %v1113_v41 = vshll.u32 %v4200_v21, 16  ;;  %v4994_v43 = vld [vmem:[#allocation2 + $0x20] ss:$0 sps:$4 sm:$0x11]   ;;  %v1122_v63 = vrot.slane %v1120_v61, 1  ;;  %v4237_v61 = vld [vmem:[#allocation8 + $0x218] sm:$0xff]  }
 0x1d1   : > { %3877 = vmatprep.subr.bf16.mxu0 %v4184_v45  ;;  %v1477_v39 = vor.u32 %v1476_v16, %v1472_v14  ;;  %v1217_v49 = vrot.slane %v4994_v43, 1  ;;  %v5017_v7 = vld [vmem:[#allocation2 + $0x3c] sm:$0xff]   ;;  %v1223_v9 = vrot.slane %v5013_v3, 1  ;;  %v1130_v16 = vshrl.u32 %v4991_v44, 16 }
 0x1d2   : > { %3634 = vmatpush3.bf16.msra.mxu1 %v4174_v19  ;;  %v4974_v19 = vld [vmem:[#allocation2] sm:$0xff]   ;;  %v1115_v53 = vrot.slane %v1113_v41, 1  ;;  %v5038_v28 = vld [vmem:[#allocation2 + $0x5c] ss:$0 sps:$4 sm:$0x11]   ;;  %v1144_v41 = vshll.u32 %v4997_v46, 16 }
 0x1d3   : > { %3635 = vmatprep.subr.bf16.mxu1 %v4179_v27  ;;  %v1210_v22 = vrot.slane %v4974_v19, 1  ;;  %v1470_v27 = vsel %vm1104_vm10, %v1465_v20, %v1469_v4  ;;  %v1106_v34 = vshrl.u32 %v4974_v19, 16  ;;  %v1127_v4 = vrot.slane %v1125_v1, 1  ;;  %v4225_v29 = vld [vmem:[#allocation8 + $0x228] sm:$0xff]  }
 0x1d4   : > { %3878 = vmatpush3.bf16.msra.mxu0 %v4184_v45  ;;  %v1216_v45 = vrot.slane %v4991_v44, 1  ;;  %v1137_v20 = vshll.u32 %v4994_v43, 16  ;;  %v4233_v43 = vld [vmem:[#allocation8 + $0x180] sm:$0xff]   ;;  %v5062_v1 = vld [vmem:[#allocation2 + $0x2c] ss:$0 sps:$4 sm:$0x11]  }
 0x1d5   : > { %1765 = vmatmul.mubr.bf16.gmra.mxu1 %v4930_v58  ;;  %v4191_v58 = vld [vmem:[#allocation8 + $0x48] sm:$0xff]   ;;  %3879 = vmatprep.subr.bf16.mxu0 %v4187_v54 }
 0x1d6   : > { %1772 = vmatprep.mubr.bf16.mxu1 %v1434_v33  ;;  %3636 = vmatpush3.bf16.msra.mxu1 %v4180_v35  ;;  %v4205_v33 = vld [vmem:[#allocation8 + $0x1f0] sm:$0xff]   ;;  %v1108_v35 = vshll.u32 %v4974_v19, 16 }
 0x1d7   : > { %3864 = vmatmul.mubr.bf16.gmra.mxu0 %v1508_v47  ;;  %3637 = vmatprep.subr.bf16.mxu1 %v4185_v48  ;;  %v4999_v47 = vld [vmem:[#allocation2 + $0x2c] ss:$0 sps:$4 sm:$0x11]  }
 0x1d8   : > { %3880 = vmatpush3.bf16.msra.mxu0 %v4187_v54  ;;  %3867 = vmatprep.mubr.bf16.mxu0 %v1511_v5  ;;  %v1110_v40 = vrot.slane %v1108_v35, 1  ;;  %v1218_v54 = vsel %vm1209_vm9, %v1216_v45, %v1217_v49  ;;  %v1139_v35 = vrot.slane %v1137_v20, 1  ;;  %v5050_v45 = vld [vmem:[#allocation2 + $0x18] sm:$0xff]   ;;  %v1146_v49 = vrot.slane %v1144_v41, 1 }
 0x1d9   : > { %3881 = vmatprep.subr.bf16.mxu0 %v4188_v60 }
 0x1da   : > { %3638 = vmatpush3.bf16.msra.mxu1 %v4186_v51  ;;  %v1219_v51 = vrot.slane %v4997_v46, 1  ;;  %v1111_v62 = vor.u32 %v1110_v40, %v1106_v34  ;;  %v4232_v40 = vld [vmem:[#allocation8 + $0x1c0] sm:$0xff]  }
 0x1db   : > { %3639 = vmatprep.subr.bf16.mxu1 %v4191_v58  ;;  %v4213_v58 = vld [vmem:[#allocation8 + $0x1a8] sm:$0xff]  }
 0x1dc   : > { %3882 = vmatpush3.bf16.msra.mxu0 %v4188_v60  ;;  %v1118_v60 = vshrl.u32 %v4977_v23, 16 }
 0x1dd   : > { %1773 = vmatmul.mubr.bf16.gmra.mxu1 %v4935_v15  ;;  %v4194_v15 = vld [vmem:[#allocation2 + $0x68] ss:$0 sps:$4 sm:$0x11]   ;;  %3883 = vmatprep.subr.bf16.mxu0 %v4195_v56 }
 0x1de   : > { %1780 = vmatprep.mubr.bf16.mxu1 %v1446_v52  ;;  %3640 = vmatpush3.bf16.msra.mxu1 %v4192_v2  ;;  %v1513_v0 = vrot.slane %v4194_v15, 1  ;;  %v1479_v17 = vshll.u32 %v4194_v15, 16  ;;  %v1220_v52 = vrot.slane %v4999_v47, 1  ;;  %v5011_v2 = vld [vmem:[#allocation2 + $0x30] sm:$0xff]   ;;  %v1116_v15 = vsel %vm1104_vm10, %v1111_v62, %v1115_v53 }
 0x1df   : > { %3641 = vmatprep.subr.bf16.mxu1 %v4197_v38  ;;  %v1222_v5 = vrot.slane %v5011_v2, 1  ;;  %v4223_v38 = vld [vmem:[#allocation8 + $0x1d0] sm:$0xff]   ;;  %v2348_v53 = vshll.u32 %v5050_v45, 16 }
 0x1e0   : > { %v1514_v12 = vsel %vm1209_vm9, %v1512_v10, %v1513_v0  ;;  %3884 = vmatpush3.bf16.msra.mxu0 %v4195_v56  ;;  %v1481_v30 = vrot.slane %v1479_v17, 1  ;;  %v1221_v57 = vsel %vm1209_vm9, %v1219_v51, %v1220_v52  ;;  %v4221_v10 = vld [vmem:[#allocation8 + $0x1d8] sm:$0xff]   ;;  %v1225_v0 = vrot.slane %v5017_v7, 1  ;;  %v4216_v17 = vld [vmem:[#allocation8 + $0x230] sm:$0xff]  }
 0x1e1   : > { %3868 = vmatmul.mubr.bf16.gmra.mxu0 %v1514_v12  ;;  %3885 = vmatprep.subr.bf16.mxu0 %v4196_v13  ;;  %v1224_v11 = vsel %vm1209_vm9, %v1222_v5, %v1223_v9  ;;  %v4222_v12 = vld [vmem:[#allocation8 + $0x198] sm:$0xff]   ;;  %v5053_v51 = vld [vmem:[#allocation2 + $0x20] ss:$0 sps:$4 sm:$0x11]   ;;  %v2346_v52 = vshrl.u32 %v5050_v45, 16  ;;  %v1154_v5 = vshrl.u32 %v5011_v2, 16 }
 0x1e2   : > { %3642 = vmatpush3.bf16.msra.mxu1 %v4198_v18  ;;  %v1482_v48 = vsel %vm1104_vm10, %v1477_v39, %v1481_v30  ;;  %v4231_v39 = vld [vmem:[#allocation8 + $0x188] sm:$0xff]   ;;  %v1161_v9 = vshll.u32 %v5013_v3, 16 }
 0x1e3   : > { %3903 = vmatprep.subr.bf16.mxu1 %v4989_v42 }
 0x1e4   : > { %3886 = vmatpush3.bf16.msra.mxu0 %v4196_v13  ;;  %v1123_v13 = vor.u32 %v1122_v63, %v1118_v60  ;;  %v1156_v60 = vshll.u32 %v5011_v2, 16 }
 0x1e5   : > { %1781 = vmatmul.mubr.bf16.gmra.mxu1 %v4944_v25  ;;  %v1211_v25 = vrot.slane %v4200_v21, 1  ;;  %3707 = vmatprep.subr.bf16.mxu0 %v4203_v26  ;;  %v4224_v21 = vld [vmem:[#allocation8 + $0x190] sm:$0xff]  }
 0x1e6   : > { %1788 = vmatprep.mubr.bf16.mxu1 %v1458_v8  ;;  %v5019_v8 = vld [vmem:[#allocation2 + $0x44] ss:$0 sps:$4 sm:$0x11]   ;;  %v1128_v24 = vsel %vm1104_vm10, %v1123_v13, %v1127_v4 }
 0x1e7   : > { %v1212_v31 = vsel %vm1209_vm9, %v1210_v22, %v1211_v25  ;;  %v1226_v56 = vrot.slane %v5019_v8, 1  ;;  %v5030_v22 = vld [vmem:[#allocation2 + $0x48] sm:$0xff]   ;;  %v5033_v25 = vld [vmem:[#allocation2 + $0x50] ss:$0 sps:$4 sm:$0x11]   ;;  %v1173_v41 = vshll.u32 %v5019_v8, 16 }
 0x1e8   : > { %3887 = vmatprep.mubr.bf16.mxu0 %v1212_v31  ;;  %v1228_v26 = vrot.slane %v5030_v22, 1  ;;  %v1229_v30 = vrot.slane %v5033_v25, 1  ;;  %v4230_v31 = vld [vmem:[#allocation8 + $0x1c8] sm:$0xff]   ;;  %v1180_v8 = vshll.u32 %v5030_v22, 16 }
 0x1e9   : > { %3888 = vmatmul.mubr.bf16.vlgmr.msra.gmra.mxu0 %v1215_v36  ;;  %v1227_v14 = vsel %vm1209_vm9, %v1225_v0, %v1226_v56  ;;  %v2365_v0 = vshll.u32 %v5062_v1, 16  ;;  %v5070_v56 = vld [vmem:[#allocation2 + $0x30] sm:$0xff]  }
 0x1ea   : > { %3708 = vmatpush3.bf16.msra.mxu0 %v4204_v32  ;;  %3891 = vmatprep.mubr.bf16.mxu0 %v1218_v54  ;;  %v1230_v36 = vsel %vm1209_vm9, %v1228_v26, %v1229_v30  ;;  %v2350_v54 = vrot.slane %v2348_v53, 1  ;;  %v2372_v3 = vshll.u32 %v5070_v56, 16  ;;  %v1163_v26 = vrot.slane %v1161_v9, 1 }
 0x1eb   : > { %3709 = vmatprep.subr.bf16.mxu0 %v4205_v33  ;;  %v1232_v33 = vrot.slane %v5038_v28, 1  ;;  %v1175_v53 = vrot.slane %v1173_v41, 1 }
 0x1ec   : > { %v2351_v62 = vor.u32 %v2350_v54, %v2346_v52 }
 0x1ed   : > { %1789 = vmatmul.mubr.bf16.gmra.mxu1 %v4951_v37  ;;  %v4206_v37 = vld [vmem:[#allocation8 + $0x1b0] sm:$0xff]  }
 0x1ee   : > { %1796 = vmatprep.mubr.bf16.mxu1 %v1470_v27  ;;  %3710 = vmatpush3.bf16.msra.mxu0 %v4206_v37  ;;  %v5036_v27 = vld [vmem:[#allocation2 + $0x54] sm:$0xff]   ;;  %v1149_v37 = vshll.u32 %v4999_v47, 16 }
 0x1ef   : > { %3711 = vmatprep.subr.bf16.mxu0 %v4212_v50  ;;  %v1231_v32 = vrot.slane %v5036_v27, 1  ;;  %v4234_v50 = vld [vmem:[#allocation8 + $0x220] sm:$0xff]  }
 0x1f0   : > { %v1151_v47 = vrot.slane %v1149_v37, 1  ;;  %v5094_v37 = vld [vmem:[#allocation2 + $0x48] sm:$0xff]  }
 0x1f1   : > { %3892 = vmatmul.mubr.bf16.gmra.mxu0 %v1221_v57  ;;  %v2353_v57 = vshll.u32 %v5053_v51, 16 }
 0x1f2   : > { %3712 = vmatpush3.bf16.msra.mxu0 %v4213_v58  ;;  %3895 = vmatprep.mubr.bf16.mxu0 %v1224_v11  ;;  %v5059_v58 = vld [vmem:[#allocation2 + $0x24] sm:$0xff]   ;;  %v1158_v11 = vrot.slane %v1156_v60, 1  ;;  %v5105_v60 = vld [vmem:[#allocation2 + $0x54] sm:$0xff]  }
 0x1f3   : > { %3713 = vmatprep.subr.bf16.mxu0 %v4214_v59  ;;  %v2355_v63 = vrot.slane %v2353_v57, 1  ;;  %v2408_v9 = vshll.u32 %v5105_v60, 16 }
 0x1f5   : > { %1797 = vmatmul.mubr.bf16.gmra.mxu1 %v4959_v55  ;;  %v4215_v55 = vld [vmem:[#allocation8 + $0x1a0] sm:$0xff]  }
 0x1f6   : > { %1804 = vmatprep.mubr.bf16.mxu1 %v1482_v48  ;;  %3714 = vmatpush3.bf16.msra.mxu0 %v4215_v55  ;;  %v2360_v55 = vshll.u32 %v5059_v58, 16 }
 0x1f7   : > { %3715 = vmatprep.subr.bf16.mxu0 %v4221_v10 }
 0x1f8   : > { %v2362_v10 = vrot.slane %v2360_v55, 1 }
 0x1f9   : > { %3896 = vmatmul.mubr.bf16.gmra.mxu0 %v1227_v14  ;;  %v2367_v14 = vrot.slane %v2365_v0, 1 }
 0x1fa   : > { %3716 = vmatpush3.bf16.msra.mxu0 %v4222_v12  ;;  %3899 = vmatprep.mubr.bf16.mxu0 %v1230_v36  ;;  %v4240_v12 = vld [vmem:[#allocation8 + $0x210] sm:$0xff]  }
 0x1fb   : > { %3717 = vmatprep.subr.bf16.mxu0 %v4223_v38  ;;  %v5074_v38 = vld [vmem:[#allocation2 + $0x38] ss:$0 sps:$4 sm:$0x11]  }
 0x1fc   : > { %v2377_v20 = vshll.u32 %v5074_v38, 16 }
 0x1fd   : > { %1805 = vmatmul.mubr.bf16.gmra.mxu1 %v4965_v6  ;;  %v1132_v6 = vshll.u32 %v4991_v44, 16 }
 0x1fe   : > { %2086 = vmatprep.mubr.bf16.mxu1 %v1116_v15  ;;  %3718 = vmatpush3.bf16.msra.mxu0 %v4224_v21  ;;  %v2356_v15 = vsel %vm1104_vm10, %v2351_v62, %v2355_v63  ;;  %v5082_v21 = vld [vmem:[#allocation2 + $0x3c] sm:$0xff]   ;;  %v1182_v62 = vrot.slane %v1180_v8, 1  ;;  %v1185_v63 = vshll.u32 %v5033_v25, 16  ;;  %v1197_v25 = vshll.u32 %v5038_v28, 16 }
 0x1ff   : > { %v1134_v18 = vrot.slane %v1132_v6, 1  ;;  %3719 = vmatprep.subr.bf16.mxu0 %v4230_v31  ;;  %v1168_v6 = vshll.u32 %v5017_v7, 16  ;;  %v2379_v31 = vrot.slane %v2377_v20, 1  ;;  %v4252_v28 = vld [vmem:[#allocation2 + $0x68] ss:$0 sps:$4 sm:$0x11]  }
 0x200   : > { %v1187_v0 = vrot.slane %v1185_v63, 1 }
 0x201   : > { %v1135_v34 = vor.u32 %v1134_v18, %v1130_v16  ;;  %v2370_v16 = vshrl.u32 %v5070_v56, 16  ;;  %v2374_v18 = vrot.slane %v2372_v3, 1 }
 0x202   : > { %3720 = vmatpush3.bf16.msra.mxu0 %v4231_v39 }
 0x203   : > { %v1140_v48 = vsel %vm1104_vm10, %v1135_v34, %v1139_v35  ;;  %3721 = vmatprep.subr.bf16.mxu0 %v4232_v40  ;;  %v2375_v30 = vor.u32 %v2374_v18, %v2370_v16  ;;  %v1170_v34 = vrot.slane %v1168_v6, 1  ;;  %v2382_v35 = vshrl.u32 %v5082_v21, 16 }
 0x205   : > { %2087 = vmatmul.mubr.bf16.vlgmr.msra.gmra.mxu1 %v4974_v19  ;;  %v1233_v19 = vsel %vm1209_vm9, %v1231_v32, %v1232_v33  ;;  %v5084_v32 = vld [vmem:[#allocation2 + $0x44] ss:$0 sps:$4 sm:$0x11]   ;;  %v1166_v33 = vshrl.u32 %v5017_v7, 16  ;;  %v2380_v36 = vsel %vm1104_vm10, %v2375_v30, %v2379_v31  ;;  %v2425_v31 = vshll.u32 %v4252_v28, 16 }
 0x206   : > { %3904 = vmatpush3.bf16.msra.mxu1 %v4989_v42  ;;  %2094 = vmatprep.mubr.bf16.mxu1 %v1128_v24  ;;  %v1142_v42 = vshrl.u32 %v4997_v46, 16  ;;  %v1159_v24 = vor.u32 %v1158_v11, %v1154_v5 }
 0x207   : > { %3905 = vmatprep.subr.bf16.mxu1 %v4216_v17  ;;  %3900 = vmatmul.mubr.bf16.gmra.mxu0 %v1233_v19  ;;  %v2389_v19 = vshll.u32 %v5084_v32, 16  ;;  %v1171_v52 = vor.u32 %v1170_v34, %v1166_v33  ;;  %v2427_v34 = vrot.slane %v2425_v31, 1  ;;  %v4262_v31 = vld [vmem:[#allocation9] sm:$0xff]  }
 0x208   : > { %v1147_v59 = vor.u32 %v1146_v49, %v1142_v42  ;;  %3722 = vmatpush3.bf16.msra.mxu0 %v4233_v43  ;;  %2706 = vmatprep.mubr.bf16.mxu0 %v2356_v15  ;;  %v1164_v40 = vsel %vm1104_vm10, %v1159_v24, %v1163_v26  ;;  %v4246_v42 = vld [vmem:[#allocation8 + $0x200] sm:$0xff]   ;;  %v5097_v49 = vld [vmem:[#allocation2 + $0x50] ss:$0 sps:$4 sm:$0x11]   ;;  %v1199_v24 = vrot.slane %v1197_v25, 1 }
 0x209   : > { %v2391_v43 = vrot.slane %v2389_v19, 1  ;;  %v5112_v15 = vld [vmem:[#allocation2 + $0x5c] ss:$0 sps:$4 sm:$0x11]   ;;  %v2450_v19 = vrot.slane %v5053_v51, 1  ;;  %v2455_v51 = vrot.slane %v5070_v56, 1 }
 0x20a   : > { %3906 = vmatpush3.bf16.msra.mxu1 %v4216_v17  ;;  %v1152_v4 = vsel %vm1104_vm10, %v1147_v59, %v1151_v47  ;;  %v1178_v47 = vshrl.u32 %v5030_v22, 16  ;;  %v2401_v59 = vshll.u32 %v5097_v49, 16  ;;  %v2413_v16 = vshll.u32 %v5112_v15, 16 }
 0x20b   : > { %3907 = vmatprep.subr.bf16.mxu1 %v4225_v29 }
 0x20c   : > { %v2403_v5 = vrot.slane %v2401_v59, 1  ;;  %v2465_v59 = vrot.slane %v5112_v15, 1 }
 0x20d   : > { %2095 = vmatmul.mubr.bf16.gmra.mxu1 %v4977_v23  ;;  %v2358_v23 = vshrl.u32 %v5059_v58, 16 }
 0x20e   : > { %2102 = vmatprep.mubr.bf16.mxu1 %v1140_v48  ;;  %3908 = vmatpush3.bf16.msra.mxu1 %v4225_v29  ;;  %v4243_v29 = vld [vmem:[#allocation8 + $0x208] sm:$0xff]  }
 0x20f   : > { %3909 = vmatprep.subr.bf16.mxu1 %v4234_v50  ;;  %2707 = vmatmul.mubr.bf16.vlgmr.msra.gmra.mxu0 %v5050_v45  ;;  %v2363_v13 = vor.u32 %v2362_v10, %v2358_v23  ;;  %v1192_v23 = vshll.u32 %v5036_v27, 16  ;;  %v1183_v10 = vor.u32 %v1182_v62, %v1178_v47 }
 0x211   : > { %v2368_v17 = vsel %vm1104_vm10, %v2363_v13, %v2367_v14  ;;  %v1194_v11 = vrot.slane %v1192_v23, 1  ;;  %v5118_v13 = vld [vmem:[#allocation2 + $0x60] sm:$0xff]   ;;  %v2410_v14 = vrot.slane %v2408_v9, 1  ;;  %v1188_v3 = vsel %vm1104_vm10, %v1183_v10, %v1187_v0  ;;  %v4255_v23 = vld [vmem:[#allocation9 + $0x38] sm:$0xff]  }
 0x212   : > { %3910 = vmatpush3.bf16.msra.mxu1 %v4234_v50  ;;  %2714 = vmatprep.mubr.bf16.mxu0 %v2368_v17  ;;  %v2396_v50 = vshll.u32 %v5094_v37, 16  ;;  %v2415_v17 = vrot.slane %v2413_v16, 1  ;;  %v2420_v18 = vshll.u32 %v5118_v13, 16  ;;  %v4259_v9 = vld [vmem:[#allocation9 + $0x18] sm:$0xff]  }
 0x213   : > { %3911 = vmatprep.subr.bf16.mxu1 %v4237_v61  ;;  %3935 = vmatprep.subr.bf16.mxu0 %v4255_v23 }
 0x214   : > { %v2398_v57 = vrot.slane %v2396_v50, 1  ;;  %v2422_v30 = vrot.slane %v2420_v18, 1  ;;  %v2453_v50 = vrot.slane %v5062_v1, 1  ;;  %v2461_v1 = vrot.slane %v5094_v37, 1  ;;  %3936 = vmatpush3.bf16.msra.mxu0 %v4255_v23 }
 0x215   : > { %2103 = vmatmul.mubr.bf16.gmra.mxu1 %v4991_v44  ;;  %v2384_v44 = vshll.u32 %v5082_v21, 16 }
 0x216   : > { %2110 = vmatprep.mubr.bf16.mxu1 %v1152_v4  ;;  %3912 = vmatpush3.bf16.msra.mxu1 %v4237_v61  ;;  %v1176_v61 = vsel %vm1104_vm10, %v1171_v52, %v1175_v53  ;;  %v1190_v4 = vshrl.u32 %v5036_v27, 16  ;;  %v2456_v53 = vrot.slane %v5074_v38, 1 }
 0x217   : > { %3913 = vmatprep.subr.bf16.mxu1 %v4240_v12  ;;  %v2386_v39 = vrot.slane %v2384_v44, 1  ;;  %2715 = vmatmul.mubr.bf16.gmra.mxu0 %v5059_v58  ;;  %v4253_v44 = vld [vmem:[#allocation2 + $0x6c] sm:$0xff]  }
 0x218   : > { %2722 = vmatprep.mubr.bf16.mxu0 %v2380_v36  ;;  %v1195_v20 = vor.u32 %v1194_v11, %v1190_v4  ;;  %v2432_v36 = vshll.u32 %v4253_v44, 16  ;;  %v2430_v41 = vshrl.u32 %v4253_v44, 16 }
 0x219   : > { %v2387_v48 = vor.u32 %v2386_v39, %v2382_v35  ;;  %v4254_v35 = vld [vmem:[#allocation2 + $0x74] ss:$0 sps:$4 sm:$0x11]   ;;  %v2449_v39 = vrot.slane %v5050_v45, 1 }
 0x21a   : > { %3914 = vmatpush3.bf16.msra.mxu1 %v4240_v12  ;;  %v2406_v12 = vshrl.u32 %v5105_v60, 16  ;;  %v1200_v33 = vsel %vm1104_vm10, %v1195_v20, %v1199_v24  ;;  %v2471_v62 = vrot.slane %v4254_v35, 1 }
 0x21b   : > { %3915 = vmatprep.subr.bf16.mxu1 %v4243_v29  ;;  %v2392_v54 = vsel %vm1104_vm10, %v2387_v48, %v2391_v43  ;;  %v2437_v43 = vshll.u32 %v4254_v35, 16  ;;  %v2451_v48 = vsel %vm1209_vm9, %v2449_v39, %v2450_v19 }
 0x21c   : > { %v2411_v6 = vor.u32 %v2410_v14, %v2406_v12  ;;  %v4260_v12 = vld [vmem:[#allocation9 + $0x10] sm:$0xff]  }
 0x21d   : > { %2111 = vmatmul.mubr.bf16.gmra.mxu1 %v4997_v46  ;;  %v2394_v46 = vshrl.u32 %v5094_v37, 16  ;;  %v2439_v52 = vrot.slane %v2437_v43, 1 }
 0x21e   : > { %2118 = vmatprep.mubr.bf16.mxu1 %v1164_v40  ;;  %3916 = vmatpush3.bf16.msra.mxu1 %v4243_v29  ;;  %v2416_v26 = vsel %vm1104_vm10, %v2411_v6, %v2415_v17  ;;  %v2418_v29 = vshrl.u32 %v5118_v13, 16  ;;  %v4261_v17 = vld [vmem:[#allocation9 + $0x8] sm:$0xff]  }
 0x21f   : > { %3917 = vmatprep.subr.bf16.mxu1 %v4246_v42  ;;  %2723 = vmatmul.mubr.bf16.gmra.mxu0 %v5070_v56  ;;  %v2399_v55 = vor.u32 %v2398_v57, %v2394_v46  ;;  %v2462_v56 = vrot.slane %v5097_v49, 1  ;;  %v2464_v57 = vrot.slane %v5105_v60, 1  ;;  %v2470_v49 = vrot.slane %v4253_v44, 1 }
 0x220   : > { %2730 = vmatprep.mubr.bf16.mxu0 %v2392_v54  ;;  %v2457_v54 = vsel %vm1209_vm9, %v2455_v51, %v2456_v53 }
 0x221   : > { %v2463_v46 = vsel %vm1209_vm9, %v2461_v1, %v2462_v56  ;;  %v2472_v63 = vsel %vm1209_vm9, %v2470_v49, %v2471_v62 }
 0x222   : > { %3918 = vmatpush3.bf16.msra.mxu1 %v4246_v42  ;;  %v2434_v42 = vrot.slane %v2432_v36, 1 }
 0x223   : > { %3967 = vmatprep.subr.bf16.mxu1 %v4255_v23 }
 0x224   : > { %v2435_v45 = vor.u32 %v2434_v42, %v2430_v41 }
 0x225   : > { %2119 = vmatmul.mubr.bf16.gmra.mxu1 %v5011_v2  ;;  %v2404_v2 = vsel %vm1104_vm10, %v2399_v55, %v2403_v5  ;;  %v4257_v55 = vld [vmem:[#allocation9 + $0x28] sm:$0xff]   ;;  %v4258_v5 = vld [vmem:[#allocation9 + $0x20] sm:$0xff]  }
 0x226   : > { %2126 = vmatprep.mubr.bf16.mxu1 %v1176_v61  ;;  %v2440_v47 = vsel %vm1104_vm10, %v2435_v45, %v2439_v52  ;;  %v2467_v61 = vrot.slane %v5118_v13, 1 }
 0x227   : > { %2731 = vmatmul.mubr.bf16.gmra.mxu0 %v5082_v21 }
 0x228   : > { %2738 = vmatprep.mubr.bf16.mxu0 %v2404_v2 }
 0x22d   : > { %2127 = vmatmul.mubr.bf16.gmra.mxu1 %v5017_v7  ;;  %v2423_v7 = vor.u32 %v2422_v30, %v2418_v29 }
 0x22e   : > { %2134 = vmatprep.mubr.bf16.mxu1 %v1188_v3 }
 0x22f   : > { %2739 = vmatmul.mubr.bf16.gmra.mxu0 %v5094_v37  ;;  %v2428_v40 = vsel %vm1104_vm10, %v2423_v7, %v2427_v34 }
 0x230   : > { %2746 = vmatprep.mubr.bf16.mxu0 %v2416_v26 }
 0x235   : > { %2135 = vmatmul.mubr.bf16.gmra.mxu1 %v5030_v22  ;;  %v2452_v22 = vrot.slane %v5059_v58, 1  ;;  %v2459_v58 = vrot.slane %v5084_v32, 1  ;;  %v2466_v32 = vsel %vm1209_vm9, %v2464_v57, %v2465_v59 }
 0x236   : > { %2142 = vmatprep.mubr.bf16.mxu1 %v1200_v33 }
 0x237   : > { %2747 = vmatmul.mubr.bf16.gmra.mxu0 %v5105_v60  ;;  %v2454_v8 = vsel %vm1209_vm9, %v2452_v22, %v2453_v50  ;;  %v4256_v60 = vld [vmem:[#allocation9 + $0x30] sm:$0xff]  }
 0x238   : > { %2754 = vmatprep.mubr.bf16.mxu0 %v2428_v40  ;;  %3937 = vmatprep.subr.bf16.mxu0 %v4256_v60 }
 0x239   : > { %3938 = vmatpush3.bf16.msra.mxu0 %v4256_v60 }
 0x23a   : > { %3939 = vmatprep.subr.bf16.mxu0 %v4257_v55 }
 0x23d   : > { %2143 = vmatmul.mubr.bf16.gmra.mxu1 %v5036_v27  ;;  %v2458_v27 = vrot.slane %v5082_v21, 1  ;;  %v2468_v21 = vrot.slane %v4252_v28, 1  ;;  %3940 = vmatpush3.bf16.msra.mxu0 %v4257_v55 }
 0x23e   : > { %3919 = vmatprep.mubr.bf16.mxu1 %v2451_v48  ;;  %3941 = vmatprep.subr.bf16.mxu0 %v4258_v5 }
 0x23f   : > { %2755 = vmatmul.mubr.bf16.gmra.mxu0 %v5118_v13  ;;  %v2460_v38 = vsel %vm1209_vm9, %v2458_v27, %v2459_v58  ;;  %v2469_v37 = vsel %vm1209_vm9, %v2467_v61, %v2468_v21 }
 0x240   : > { %2762 = vmatprep.mubr.bf16.mxu0 %v2440_v47 }
 0x241   : > { %3942 = vmatpush3.bf16.msra.mxu0 %v4258_v5 }
 0x242   : > { %3943 = vmatprep.subr.bf16.mxu0 %v4259_v9 }
 0x245   : > { %3920 = vmatmul.mubr.bf16.vlgmr.msra.gmra.mxu1 %v2454_v8  ;;  %3944 = vmatpush3.bf16.msra.mxu0 %v4259_v9 }
 0x246   : > { %3923 = vmatprep.mubr.bf16.mxu1 %v2457_v54  ;;  %3975 = vmatpush3.bf16.msra.mxu1 %v4255_v23 }
 0x247   : > { %2763 = vmatmul.mubr.bf16.gmra.mxu0 %v4253_v44  ;;  %3968 = vmatprep.subr.bf16.mxu1 %v4256_v60 }
 0x248   : > { %3945 = vmatprep.subr.bf16.mxu0 %v4260_v12 }
 0x249   : > { %3946 = vmatpush3.bf16.msra.mxu0 %v4260_v12 }
 0x24a   : > { %3976 = vmatpush3.bf16.msra.mxu1 %v4256_v60  ;;  %3947 = vmatprep.subr.bf16.mxu0 %v4261_v17 }
 0x24b   : > { %3969 = vmatprep.subr.bf16.mxu1 %v4257_v55 }
 0x24d   : > { %3924 = vmatmul.mubr.bf16.gmra.mxu1 %v2460_v38  ;;  %3948 = vmatpush3.bf16.msra.mxu0 %v4261_v17 }
 0x24e   : > { %3927 = vmatprep.mubr.bf16.mxu1 %v2463_v46  ;;  %3977 = vmatpush3.bf16.msra.mxu1 %v4257_v55 }
 0x24f   : > { %3970 = vmatprep.subr.bf16.mxu1 %v4258_v5  ;;  %3949 = vmatprep.subr.bf16.mxu0 %v4262_v31 }
 0x251   : > { %3950 = vmatpush3.bf16.msra.mxu0 %v4262_v31 }
 0x252   : > { %3978 = vmatpush3.bf16.msra.mxu1 %v4258_v5 }
 0x253   : > { %3971 = vmatprep.subr.bf16.mxu1 %v4259_v9 }
 0x255   : > { %3928 = vmatmul.mubr.bf16.gmra.mxu1 %v2466_v32 }
 0x256   : > { %3931 = vmatprep.mubr.bf16.mxu1 %v2469_v37  ;;  %3979 = vmatpush3.bf16.msra.mxu1 %v4259_v9 }
 0x257   : > { %3972 = vmatprep.subr.bf16.mxu1 %v4260_v12 }
 0x25a   : > { %3980 = vmatpush3.bf16.msra.mxu1 %v4260_v12 }
 0x25b   : > { %3973 = vmatprep.subr.bf16.mxu1 %v4261_v17 }
 0x25d   : > { %3932 = vmatmul.mubr.bf16.gmra.mxu1 %v2472_v63 }
 0x25e   : > { %3981 = vmatpush3.bf16.msra.mxu1 %v4261_v17 }
 0x25f   : > { %3974 = vmatprep.subr.bf16.mxu1 %v4262_v31 }
 0x262   : > { %3982 = vmatpush3.bf16.msra.mxu1 %v4262_v31 }
 0x285   : > { %v3563_v15 = vpop.f32.mrf.mxu1 }
 0x287   : > { %v3857_v10 = vpop.f32.mrf.mxu0  ;;  %v3564_v0 = vpop.f32.mrf.mxu1 }
 0x288   : > { %v3565_v4 = vadd.f32 %v3564_v0, %v3563_v15 }
 0x289   : > { %v1847_v11 = vpop.f32.mrf.mxu0  ;;  %v3566_v25 = vpop.f32.mrf.mxu1 }
 0x28a   : > { %v5157_v13 = vadd.f32 %v3565_v4, %v1847_v11 }
 0x28b   : > { %v3858_v2 = vpop.f32.mrf.mxu0  ;;  %v3567_v14 = vpop.f32.mrf.mxu1 }
 0x28c   : > { %v3568_v16 = vadd.f32 %v3567_v14, %v3566_v25 }
 0x28d   : > { %v1850_v3 = vpop.f32.mrf.mxu0  ;;  %v3569_v6 = vpop.f32.mrf.mxu1 }
 0x28e   : > { %v5159_v28 = vadd.f32 %v3568_v16, %v1850_v3 }
 0x28f   : > { %v3570_v18 = vpop.f32.mrf.mxu1  ;;  %v3861_v20 = vpop.f32.mrf.mxu0 }
 0x290   : > { %v3571_v24 = vadd.f32 %v3570_v18, %v3569_v6 }
 0x291   : > { %v3572_v26 = vpop.f32.mrf.mxu1  ;;  %v1863_v29 = vpop.f32.mrf.mxu0 }
 0x292   : > { %v5161_v30 = vadd.f32 %v3857_v10, %v3571_v24 }
 0x293   : > { %v3573_v44 = vpop.f32.mrf.mxu1  ;;  %v3862_v33 = vpop.f32.mrf.mxu0 }
 0x294   : > { %v3574_v7 = vadd.f32 %v3573_v44, %v3572_v26 }
 0x295   : > { %v3575_v34 = vpop.f32.mrf.mxu1  ;;  %v1866_v39 = vpop.f32.mrf.mxu0 }
 0x296   : > { %v5163_v35 = vadd.f32 %v3858_v2, %v3574_v7 }
 0x297   : > { %v3576_v36 = vpop.f32.mrf.mxu1  ;;  %v3865_v41 = vpop.f32.mrf.mxu0 }
 0x298   : > { %v3577_v19 = vadd.f32 %v3576_v36, %v3575_v34 }
 0x299   : > { %v3578_v40 = vpop.f32.mrf.mxu1  ;;  %v1879_v50 = vpop.f32.mrf.mxu0 }
 0x29a   : > { %v5165_v42 = vadd.f32 %v3577_v19, %v1863_v29 }
 0x29b   : > { %v3579_v43 = vpop.f32.mrf.mxu1  ;;  %v3866_v8 = vpop.f32.mrf.mxu0 }
 0x29c   : > { %v3580_v48 = vadd.f32 %v3579_v43, %v3578_v40 }
 0x29d   : > { %v3581_v22 = vpop.f32.mrf.mxu1  ;;  %v1882_v1 = vpop.f32.mrf.mxu0 }
 0x29e   : > { %v5167_v45 = vadd.f32 %v3580_v48, %v1866_v39 }
 0x29f   : > { %v3582_v52 = vpop.f32.mrf.mxu1 }
 0x2a0   : > { %v3583_v51 = vadd.f32 %v3582_v52, %v3581_v22 }
 0x2a1   : > { %v3584_v53 = vpop.f32.mrf.mxu1  ;;  %v3869_v46 = vpop.f32.mrf.mxu0 }
 0x2a2   : > { %v5169_v47 = vadd.f32 %v3861_v20, %v3583_v51 }
 0x2a3   : > { %v3585_v54 = vpop.f32.mrf.mxu1  ;;  %v1895_v61 = vpop.f32.mrf.mxu0 }
 0x2a4   : > { %v3586_v27 = vadd.f32 %v3585_v54, %v3584_v53 }
 0x2a5   : > { %v3587_v58 = vpop.f32.mrf.mxu1  ;;  %v3870_v37 = vpop.f32.mrf.mxu0 }
 0x2a6   : > { %v5171_v56 = vadd.f32 %v3862_v33, %v3586_v27 }
 0x2a7   : > { %v3588_v38 = vpop.f32.mrf.mxu1  ;;  %v1898_v63 = vpop.f32.mrf.mxu0 }
 0x2a8   : > { %v3589_v57 = vadd.f32 %v3588_v38, %v3587_v58 }
 0x2a9   : > { %v3590_v59 = vpop.f32.mrf.mxu1  ;;  %v3889_v15 = vpop.f32.mrf.mxu0 }
 0x2aa   : > { %v5173_v21 = vadd.f32 %v3589_v57, %v1879_v50 }
 0x2ab   : > { %v3591_v32 = vpop.f32.mrf.mxu1  ;;  %v2185_v0 = vpop.f32.mrf.mxu0 }
 0x2ac   : > { %v3592_v49 = vadd.f32 %v3591_v32, %v3590_v59 }
 0x2ad   : > { %v3593_v62 = vpop.f32.mrf.mxu1  ;;  %v3890_v25 = vpop.f32.mrf.mxu0 }
 0x2ae   : > { %v5175_v23 = vadd.f32 %v3592_v49, %v1882_v1 }
 0x2af   : > { %v3594_v60 = vpop.f32.mrf.mxu1  ;;  %v2188_v14 = vpop.f32.mrf.mxu0 }
 0x2b0   : > { %v3595_v55 = vadd.f32 %v3594_v60, %v3593_v62 }
 0x2b1   : > { %v3596_v5 = vpop.f32.mrf.mxu1  ;;  %v5181_v6 = vpop.f32.mrf.mxu0 }
 0x2b2   : > { %v5177_v9 = vadd.f32 %v3865_v41, %v3595_v55 }
 0x2b3   : > { %v3597_v10 = vpop.f32.mrf.mxu1  ;;  %v2201_v20 = vpop.f32.mrf.mxu0 }
 0x2b4   : > { %v3598_v4 = vadd.f32 %v3597_v10, %v3596_v5 }
 0x2b5   : > { %v3599_v11 = vpop.f32.mrf.mxu1  ;;  %v5185_v29 = vpop.f32.mrf.mxu0 }
 0x2b6   : > { %v5179_v12 = vadd.f32 %v3866_v8, %v3598_v4 }
 0x2b7   : > { %v3600_v2 = vpop.f32.mrf.mxu1  ;;  %v2204_v33 = vpop.f32.mrf.mxu0 }
 0x2b8   : > { %v3601_v16 = vadd.f32 %v3600_v2, %v3599_v11 }
 0x2b9   : > { %v3602_v3 = vpop.f32.mrf.mxu1  ;;  %v5189_v36 = vpop.f32.mrf.mxu0 }
 0x2ba   : > { %v5183_v17 = vadd.f32 %v3601_v16, %v1895_v61 }
 0x2bb   : > { %v3603_v18 = vpop.f32.mrf.mxu1  ;;  %v5193_v40 = vpop.f32.mrf.mxu0 }
 0x2bc   : > { %v3604_v24 = vadd.f32 %v3603_v18, %v3602_v3 }
 0x2bd   : > { %v3605_v26 = vpop.f32.mrf.mxu1  ;;  %v5195_v48 = vpop.f32.mrf.mxu0 }
 0x2be   : > { %v5187_v31 = vadd.f32 %v3604_v24, %v1898_v63 }
 0x2bf   : > { %v3606_v44 = vpop.f32.mrf.mxu1  ;;  %v5199_v52 = vpop.f32.mrf.mxu0 }
 0x2c0   : > { %v3607_v7 = vadd.f32 %v3606_v44, %v3605_v26 }
 0x2c1   : > { %v3608_v34 = vpop.f32.mrf.mxu1 }
 0x2c2   : > { %v5191_v39 = vadd.f32 %v3869_v46, %v3607_v7 }
 0x2c3   : > { %v3609_v19 = vpop.f32.mrf.mxu1 }
 0x2c4   : > { %v3610_v41 = vadd.f32 %v3609_v19, %v3608_v34 }
 0x2c5   : > { %v3643_v43 = vpop.f32.mrf.mxu1 }
 0x2c6   : > { %v5197_v22 = vadd.f32 %v3870_v37, %v3610_v41 }
 0x2c7   : > { %v3644_v50 = vpop.f32.mrf.mxu1  ;;  %v5201_v8 = vpop.f32.mrf.mxu0 }
 0x2c8   : > { %v3645_v51 = vadd.f32 %v3644_v50, %v3643_v43 }
 0x2c9   : > { %v3646_v53 = vpop.f32.mrf.mxu1  ;;  %v5204_v58 = vpop.f32.mrf.mxu0 }
 0x2ca   : > { %v2089_v54 = vadd.f32 %v3645_v51, %v5157_v13 }
 0x2cb   : > { %v3647_v27 = vpop.f32.mrf.mxu1  ;;  %v5208_v57 = vpop.f32.mrf.mxu0 }
 0x2cc   : > { %v3648_v1 = vadd.f32 %v3647_v27, %v3646_v53  ;;  %v5206_v38 = vadd.f32 %v2185_v0, %v2089_v54 }
 0x2cd   : > { %v3649_v46 = vpop.f32.mrf.mxu1  ;;  %v5211_v37 = vpop.f32.mrf.mxu0 }
 0x2ce   : > { %v2092_v59 = vadd.f32 %v3648_v1, %v5159_v28 }
 0x2cf   : > { %v3650_v61 = vpop.f32.mrf.mxu1  ;;  %v5216_v55 = vpop.f32.mrf.mxu0 }
 0x2d0   : > { %v3651_v32 = vadd.f32 %v3650_v61, %v3649_v46  ;;  %v5213_v49 = vadd.f32 %v2188_v14, %v2092_v59 }
 0x2d1   : > { %v3652_v62 = vpop.f32.mrf.mxu1  ;;  %v5221_v4 = vpop.f32.mrf.mxu0 }
 0x2d2   : > { %v2097_v13 = vadd.f32 %v3651_v32, %v5161_v30 }
 0x2d3   : > { %v3653_v63 = vpop.f32.mrf.mxu1  ;;  %v5223_v2 = vpop.f32.mrf.mxu0 }
 0x2d4   : > { %v3654_v60 = vadd.f32 %v3653_v63, %v3652_v62  ;;  %v5218_v5 = vadd.f32 %v3889_v15, %v2097_v13 }
 0x2d5   : > { %v3655_v10 = vpop.f32.mrf.mxu1  ;;  %v5228_v3 = vpop.f32.mrf.mxu0 }
 0x2d6   : > { %v2100_v0 = vadd.f32 %v3654_v60, %v5163_v35 }
 0x2d7   : > { %v3656_v28 = vpop.f32.mrf.mxu1  ;;  %v5230_v15 = vpop.f32.mrf.mxu0 }
 0x2d8   : > { %v3657_v11 = vadd.f32 %v3656_v28, %v3655_v10  ;;  %v5225_v14 = vadd.f32 %v3890_v25, %v2100_v0 }
 0x2d9   : > { %v3658_v16 = vpop.f32.mrf.mxu1  ;;  %v5235_v7 = vpop.f32.mrf.mxu0 }
 0x2da   : > { %v2105_v30 = vadd.f32 %v3657_v11, %v5165_v42 }
 0x2db   : > { %v3659_v18 = vpop.f32.mrf.mxu1  ;;  %v5237_v25 = vpop.f32.mrf.mxu0 }
 0x2dc   : > { %v3660_v24 = vadd.f32 %v3659_v18, %v3658_v16  ;;  %v5232_v26 = vadd.f32 %v2201_v20, %v2105_v30 }
 0x2dd   : > { %v3661_v35 = vpop.f32.mrf.mxu1  ;;  %v5242_v50 = vpop.f32.mrf.mxu0 }
 0x2de   : > { %v2108_v44 = vadd.f32 %v3660_v24, %v5167_v45 }
 0x2df   : > { %v3662_v34 = vpop.f32.mrf.mxu1  ;;  %v5244_v20 = vpop.f32.mrf.mxu0 }
 0x2e0   : > { %v3663_v19 = vadd.f32 %v3662_v34, %v3661_v35  ;;  %v5239_v41 = vadd.f32 %v2204_v33, %v2108_v44 }
 0x2e1   : > { %v3664_v42 = vpop.f32.mrf.mxu1  ;;  %v5250_v1 = vpop.f32.mrf.mxu0 }
 0x2e2   : > { %v2113_v43 = vadd.f32 %v3663_v19, %v5169_v47 }
 0x2e3   : > { %v3665_v51 = vpop.f32.mrf.mxu1  ;;  %v5252_v59 = vpop.f32.mrf.mxu0 }
 0x2e4   : > { %v3666_v53 = vadd.f32 %v3665_v51, %v3664_v42  ;;  %v5247_v54 = vadd.f32 %v5181_v6, %v2113_v43 }
 0x2e5   : > { %v3667_v45 = vpop.f32.mrf.mxu1  ;;  %v5258_v62 = vpop.f32.mrf.mxu0 }
 0x2e6   : > { %v2116_v27 = vadd.f32 %v3666_v53, %v5171_v56 }
 0x2e7   : > { %v3668_v46 = vpop.f32.mrf.mxu1  ;;  %v3741_v63 = vpop.f32.mrf.mxu0 }
 0x2e8   : > { %v3669_v33 = vadd.f32 %v3668_v46, %v3667_v45  ;;  %v5255_v47 = vadd.f32 %v5185_v29, %v2116_v27 }
 0x2e9   : > { %v3670_v61 = vpop.f32.mrf.mxu1  ;;  %v3742_v0 = vpop.f32.mrf.mxu0 }
 0x2ea   : > { %v2121_v32 = vadd.f32 %v3669_v33, %v5173_v21 }
 0x2eb   : > { %v3671_v13 = vpop.f32.mrf.mxu1  ;;  %v5264_v16 = vpop.f32.mrf.mxu0 }
 0x2ec   : > { %v3672_v6 = vadd.f32 %v3671_v13, %v3670_v61  ;;  %v5261_v60 = vadd.f32 %v5193_v40, %v2121_v32 }
 0x2ed   : > { %v3673_v56 = vpop.f32.mrf.mxu1  ;;  %v5270_v18 = vpop.f32.mrf.mxu0 }
 0x2ee   : > { %v2124_v10 = vadd.f32 %v3672_v6, %v5175_v23 }
 0x2ef   : > { %v3674_v28 = vpop.f32.mrf.mxu1  ;;  %v5272_v40 = vpop.f32.mrf.mxu0 }
 0x2f0   : > { %v3675_v11 = vadd.f32 %v3674_v28, %v3673_v56  ;;  %v5267_v29 = vadd.f32 %v5199_v52, %v2124_v10 }
 0x2f1   : > { %v3676_v21 = vpop.f32.mrf.mxu1  ;;  %v5278_v19 = vpop.f32.mrf.mxu0 }
 0x2f2   : > { %v2129_v30 = vadd.f32 %v3675_v11, %v5177_v9 }
 0x2f3   : > { %v3677_v24 = vpop.f32.mrf.mxu1  ;;  %v5280_v43 = vpop.f32.mrf.mxu0 }
 0x2f4   : > { %v3678_v35 = vadd.f32 %v3677_v24, %v3676_v21  ;;  %v5275_v44 = vadd.f32 %v5189_v36, %v2129_v30 }
 0x2f5   : > { %v3679_v23 = vpop.f32.mrf.mxu1  ;;  %v5286_v45 = vpop.f32.mrf.mxu0 }
 0x2f6   : > { %v2132_v34 = vadd.f32 %v3678_v35, %v5179_v12 }
 0x2f7   : > { %v3680_v42 = vpop.f32.mrf.mxu1  ;;  %v3753_v46 = vpop.f32.mrf.mxu0 }
 0x2f8   : > { %v3681_v52 = vadd.f32 %v3680_v42, %v3679_v23  ;;  %v5283_v9 = vadd.f32 %v5195_v48, %v2132_v34  ;;  %v3734_v42 = vadd.f32 %v5242_v50, %v5237_v25 }
 0x2f9   : > { %v3682_v51 = vpop.f32.mrf.mxu1  ;;  %v3754_v32 = vpop.f32.mrf.mxu0 }
 0x2fa   : > { %v2137_v53 = vadd.f32 %v3681_v52, %v5183_v17 }
 0x2fb   : > { %v3683_v27 = vpop.f32.mrf.mxu1  ;;  %v5292_v56 = vpop.f32.mrf.mxu0 }
 0x2fc   : > { %v3684_v36 = vadd.f32 %v3683_v27, %v3682_v51  ;;  %v5289_v33 = vadd.f32 %v5204_v58, %v2137_v53  ;;  %v3731_v58 = vadd.f32 %v5235_v7, %v5230_v15 }
 0x2fd   : > { %v3685_v12 = vpop.f32.mrf.mxu1  ;;  %v5298_v28 = vpop.f32.mrf.mxu0 }
 0x2fe   : > { %v2140_v61 = vadd.f32 %v3684_v36, %v5187_v31 }
 0x2ff   : > { %v3686_v13 = vpop.f32.mrf.mxu1  ;;  %v5302_v30 = vpop.f32.mrf.mxu0 }
 0x300   : > { %v3687_v6 = vadd.f32 %v3686_v13, %v3685_v12  ;;  %v5295_v48 = vadd.f32 %v5211_v37, %v2140_v61  ;;  %v3725_v37 = vadd.f32 %v5221_v4, %v5216_v55  ;;  %v5323_v55 = vld [vmem:[%s5505_s4] ss:$0 sm:$0xff]  ;;  %v3728_v4 = vadd.f32 %v5228_v3, %v5223_v2 }
 0x301   : > { %v3688_v17 = vpop.f32.mrf.mxu1  ;;  %v3737_v12 = vadd.f32 %v5250_v1, %v5244_v20 }
 0x302   : > { %v2145_v10 = vadd.f32 %v3687_v6, %v5191_v39  ;;  %v5310_v39 = vpop.f32.mrf.mxu0 }
 0x303   : > { %v3689_v11 = vpop.f32.mrf.mxu1 }
 0x304   : > { %v3690_v21 = vadd.f32 %v3689_v11, %v3688_v17  ;;  %v5305_v31 = vadd.f32 %v5201_v8, %v2145_v10  ;;  %v5315_v52 = vpop.f32.mrf.mxu0  ;;  %v3746_v11 = vadd.f32 %v5270_v18, %v5264_v16  ;;  %v3749_v18 = vadd.f32 %v5278_v19, %v5272_v40 }
 0x305   : > { %v3921_v24 = vpop.f32.mrf.mxu1  ;;  %v3752_v19 = vadd.f32 %v5286_v45, %v5280_v43 }
 0x306   : > { %v2148_v35 = vadd.f32 %v3690_v21, %v5197_v22  ;;  %v2814_v23 = vadd.f32 %v3921_v24, %v3731_v58  ;;  %v5330_v36 = vpop.f32.mrf.mxu0  ;;  %v3740_v58 = vadd.f32 %v5258_v62, %v5252_v59 }
 0x307   : > { %v2805_v34 = vpop.f32.mrf.mxu1 }
 0x308   : > { %v2870_v15 = vadd.f32 %v2814_v23, %v5218_v5  ;;  %v2806_v7 = vadd.f32 %v3725_v37, %v2805_v34  ;;  %v5318_v8 = vadd.f32 %v5208_v57, %v2148_v35  ;;  %v3743_v5 = vadd.f32 %v3742_v0, %v3741_v63  ;;  %v3765_v10 = vpop.f32.mrf.mxu0 }
 0x309   : > { %v3922_v22 = vpop.f32.mrf.mxu1  ;;  %v3755_v34 = vadd.f32 %v3754_v32, %v3753_v46  ;;  %v3758_v32 = vadd.f32 %v5298_v28, %v5292_v56 }
 0x30a   : > { %v2868_v51 = vadd.f32 %v2806_v7, %v5206_v38  ;;  %v2817_v25 = vadd.f32 %v3922_v22, %v3734_v42  ;;  %v2893_v53 = vadd.f32 %v5323_v55, %v2870_v15  ;;  %v3766_v7 = vpop.f32.mrf.mxu0 }
 0x30b   : > { %v2808_v50 = vpop.f32.mrf.mxu1 }
 0x30c   : > { %v2871_v27 = vadd.f32 %v2817_v25, %v5225_v14  ;;  %v2809_v57 = vadd.f32 %v3728_v4, %v2808_v50  ;;  %v2891_v13 = vadd.f32 %v5323_v55, %v2868_v51  ;;  %v2909_v63 = vmax.f32 %v2893_v53, 0.0  ;;  %v3768_v25 = vpop.f32.mrf.mxu0 }
 0x30d   : > { %v3925_v61 = vpop.f32.mrf.mxu1 }
 0x30e   : > { %v2894_v2 = vadd.f32 %v5323_v55, %v2871_v27  ;;  %v2869_v38 = vadd.f32 %v2809_v57, %v5213_v49  ;;  %v2830_v3 = vadd.f32 %v3925_v61, %v3743_v5  ;;  %v2907_v21 = vmax.f32 %v2891_v13, 0.0 }
 0x30f   : > { %v2821_v6 = vpop.f32.mrf.mxu1  ;;  %v3767_v27 = vadd.f32 %v3766_v7, %v3765_v10 }
 0x310   : > { %v2910_v0 = vmax.f32 %v2894_v2, 0.0  ;;  %v2892_v17 = vadd.f32 %v5323_v55, %v2869_v38  ;;  %v2822_v14 = vadd.f32 %v3737_v12, %v2821_v6  ;;  %v2874_v20 = vadd.f32 %v2830_v3, %v5247_v54  ;;  %v3769_v38 = vpop.f32.mrf.mxu0 }
 0x311   : > { %v3926_v1 = vpop.f32.mrf.mxu1 }
 0x312   : > { %v2924_v24 = vpack.c.bf16 %v2910_v0, %v2909_v63  ;;  %v2908_v49 = vmax.f32 %v2892_v17, 0.0  ;;  %v2872_v37 = vadd.f32 %v2822_v14, %v5232_v26  ;;  %v2833_v35 = vadd.f32 %v3926_v1, %v3746_v11 }
 0x313   : > { %v2824_v23 = vpop.f32.mrf.mxu1  ;;  %v2897_v22 = vadd.f32 %v5323_v55, %v2874_v20  ;;  %v3761_v63 = vadd.f32 %v5310_v39, %v5302_v30  ;;  %v3764_v30 = vadd.f32 %v5330_v36, %v5315_v52 }
 0x314   : > { %v2825_v42 = vadd.f32 %v3740_v58, %v2824_v23  ;;  %v2923_v15 = vpack.c.bf16 %v2908_v49, %v2907_v21  ;;  %v2875_v16 = vadd.f32 %v2833_v35, %v5255_v47  ;;  %v2895_v26 = vadd.f32 %v5323_v55, %v2872_v37 }
 0x315   : > { %v3929_v54 = vpop.f32.mrf.mxu1  ;;  %v2913_v50 = vmax.f32 %v2897_v22, 0.0 }
 0x316   : > { %v2873_v59 = vadd.f32 %v2825_v42, %v5239_v41  ;;  %v2846_v62 = vadd.f32 %v3929_v54, %v3755_v34  ;;  %3951 = vmatprep.mubr.bf16.mxu0 %v2923_v15  ;;  %v2898_v4 = vadd.f32 %v5323_v55, %v2875_v16  ;;  %v2911_v12 = vmax.f32 %v2895_v26, 0.0 }
 0x317   : > { %v2837_v46 = vpop.f32.mrf.mxu1  ;;  %3952 = vmatmul.mubr.bf16.vlgmr.msra.gmra.mxu0 %v2924_v24 }
 0x318   : > { %v2896_v51 = vadd.f32 %v5323_v55, %v2873_v59  ;;  %v2838_v47 = vadd.f32 %v3749_v18, %v2837_v46  ;;  %v2914_v5 = vmax.f32 %v2898_v4, 0.0  ;;  %v2878_v40 = vadd.f32 %v2846_v62, %v5275_v44  ;;  %v3476_v18 = vld [vmem:[%s4737_s19 + $0x20] sm:$0xff] }
 0x319   : > { %v3930_v41 = vpop.f32.mrf.mxu1 }
 0x31a   : > { %v2912_v53 = vmax.f32 %v2896_v51, 0.0  ;;  %v2849_v57 = vadd.f32 %v3930_v41, %v3758_v32  ;;  %v2926_v61 = vpack.c.bf16 %v2914_v5, %v2913_v50  ;;  %v2876_v13 = vadd.f32 %v2838_v47, %v5261_v60  ;;  %v3477_v32 = vld [vmem:[%s4737_s19 + $0x28] sm:$0xff]  ;;  %v3475_v5 = vld [vmem:[%s4737_s19 + $0x18] sm:$0xff] }
 0x31b   : > { %v2840_v56 = vpop.f32.mrf.mxu1  ;;  %v2901_v3 = vadd.f32 %v5323_v55, %v2878_v40  ;;  %v3770_v60 = vadd.f32 %v3769_v38, %v3768_v25 }
 0x31c   : > { %v2879_v28 = vadd.f32 %v2849_v57, %v5283_v9  ;;  %v2841_v2 = vadd.f32 %v3752_v19, %v2840_v56  ;;  %v2925_v44 = vpack.c.bf16 %v2912_v53, %v2911_v12  ;;  %v2899_v17 = vadd.f32 %v5323_v55, %v2876_v13  ;;  %v3480_v12 = vld [vmem:[%s4737_s19 + $0x40] sm:$0xff] }
 0x31d   : > { %v3933_v6 = vpop.f32.mrf.mxu1  ;;  %v2917_v1 = vmax.f32 %v2901_v3, 0.0 }
 0x31e   : > { %v2902_v43 = vadd.f32 %v5323_v55, %v2879_v28  ;;  %v2877_v45 = vadd.f32 %v2841_v2, %v5267_v29  ;;  %v2862_v0 = vadd.f32 %v3933_v6, %v3767_v27  ;;  %3955 = vmatprep.mubr.bf16.mxu1 %v2925_v44  ;;  %v2915_v24 = vmax.f32 %v2899_v17, 0.0  ;;  %v3478_v28 = vld [vmem:[%s4737_s19 + $0x30] sm:$0xff]  ;;  %v3481_v6 = vld [vmem:[%s4737_s19 + $0x48] sm:$0xff] }
 0x31f   : > { %v2853_v14 = vpop.f32.mrf.mxu1  ;;  %3956 = vmatmul.mubr.bf16.vlgmr.msra.gmra.mxu1 %v2926_v61 }
 0x320   : > { %v2918_v9 = vmax.f32 %v2902_v43, 0.0  ;;  %v2900_v10 = vadd.f32 %v5323_v55, %v2877_v45  ;;  %v2882_v11 = vadd.f32 %v2862_v0, %v5305_v31  ;;  %v2854_v20 = vadd.f32 %v3761_v63, %v2853_v14  ;;  %v3479_v0 = vld [vmem:[%s4737_s19 + $0x38] sm:$0xff] }
 0x321   : > { %v3934_v58 = vpop.f32.mrf.mxu1 }
 0x322   : > { %v2916_v39 = vmax.f32 %v2900_v10, 0.0  ;;  %v2880_v29 = vadd.f32 %v2854_v20, %v5289_v33  ;;  %v2865_v21 = vadd.f32 %v3934_v58, %v3770_v60  ;;  %v2928_v37 = vpack.c.bf16 %v2918_v9, %v2917_v1  ;;  %v3484_v10 = vld [vmem:[%s4737_s19 + $0x60] sm:$0xff] }
 0x323   : > { %v2856_v49 = vpop.f32.mrf.mxu1  ;;  %v2905_v35 = vadd.f32 %v5323_v55, %v2882_v11 }
 0x324   : > { %v2883_v23 = vadd.f32 %v2865_v21, %v5318_v8  ;;  %v2857_v34 = vadd.f32 %v3764_v30, %v2856_v49  ;;  %v2927_v31 = vpack.c.bf16 %v2916_v39, %v2915_v24  ;;  %v2903_v42 = vadd.f32 %v5323_v55, %v2880_v29  ;;  %v3482_v30 = vld [vmem:[%s4737_s19 + $0x50] sm:$0xff]  ;;  %v3485_v49 = vld [vmem:[%s4737_s19 + $0x68] sm:$0xff] }
 0x325   : > { %v2921_v33 = vmax.f32 %v2905_v35, 0.0 }
 0x326   : > { %v2906_v15 = vadd.f32 %v5323_v55, %v2883_v23  ;;  %v2881_v52 = vadd.f32 %v2857_v34, %v5295_v48  ;;  %3959 = vmatprep.mubr.bf16.mxu1 %v2927_v31  ;;  %v2919_v22 = vmax.f32 %v2903_v42, 0.0  ;;  %v5379_v48 = vld [vmem:[%s5507_s6] ss:$0 sm:$0xff]  ;;  %v3483_v31 = vld [vmem:[%s4737_s19 + $0x58] sm:$0xff] }
 0x327   : > { %3960 = vmatmul.mubr.bf16.gmra.mxu1 %v2928_v37 }
 0x328   : > { %v2922_v36 = vmax.f32 %v2906_v15, 0.0  ;;  %v2904_v7 = vadd.f32 %v5323_v55, %v2881_v52  ;;  %v3474_v55 = vld [vmem:[%s4737_s19 + $0x10] sm:$0xff] }
 0x32a   : > { %v2920_v16 = vmax.f32 %v2904_v7, 0.0  ;;  %v2930_v8 = vpack.c.bf16 %v2922_v36, %v2921_v33  ;;  %v3488_v36 = vld [vmem:[%s4737_s19 + $0x80] sm:$0xff] }
 0x32c   : > { %v2929_v54 = vpack.c.bf16 %v2920_v16, %v2919_v22 }
 0x32e   : > { %3963 = vmatprep.mubr.bf16.mxu1 %v2929_v54  ;;  %v3486_v54 = vld [vmem:[%s4737_s19 + $0x70] sm:$0xff] }
 0x32f   : > { %3964 = vmatmul.mubr.bf16.gmra.mxu1 %v2930_v8 }
 0x3d7   : > { %v3953_v59 = vpop.f32.mrf.mxu0 }
 0x3d8   : > { %v3064_v62 = vadd.f32 %v3953_v59, %v5379_v48 }
 0x3d9   : > { %v3055_v26 = vpop.f32.mrf.mxu0 }
 0x3da   : > { %v3120_v4 = vadd.f32 %v3476_v18, %v3064_v62  ;;  %v3056_v46 = vadd.f32 %v5379_v48, %v3055_v26  ;;  %v3489_v26 = vld [vmem:[%s4737_s19 + $0x88] sm:$0xff] }
 0x3db   : > { %v3954_v51 = vpop.f32.mrf.mxu0 }
 0x3dc   : > { %v3136_v47 = vmax.f32 %v3120_v4, 0.0  ;;  %v3118_v25 = vadd.f32 %v3474_v55, %v3056_v46  ;;  %v3067_v50 = vadd.f32 %v3954_v51, %v5379_v48 }
 0x3dd   : > { %v3058_v40 = vpop.f32.mrf.mxu0 }
 0x3de   : > { %3152 = vst [vmem:[%s4923_s24 + $0x10] sm:$0xff] %v3136_v47  ;;  %v3134_v41 = vmax.f32 %v3118_v25, 0.0  ;;  %v3121_v19 = vadd.f32 %v3477_v32, %v3067_v50  ;;  %v3059_v53 = vadd.f32 %v5379_v48, %v3058_v40  ;;  %v3487_v47 = vld [vmem:[%s4737_s19 + $0x78] sm:$0xff]  ;;  %s5441_s19 = scalar_lea.sflag [#allocation5], %s352_s8 }
 0x3df   : > { %v3957_v61 = vpop.f32.mrf.mxu1 }
 0x3e0   : > { %3150 = vst [vmem:[%s4923_s24] sm:$0xff] %v3134_v41  ;;  %v3137_v27 = vmax.f32 %v3121_v19, 0.0  ;;  %v3119_v57 = vadd.f32 %v3475_v5, %v3059_v53  ;;  %v3080_v13 = vadd.f32 %v3957_v61, %v5379_v48 }
 0x3e1   : > { %v3071_v2 = vpop.f32.mrf.mxu1 }
 0x3e2   : > { %3153 = vst [vmem:[%s4923_s24 + $0x18] sm:$0xff] %v3137_v27  ;;  %v3135_v56 = vmax.f32 %v3119_v57, 0.0  ;;  %v3124_v38 = vadd.f32 %v3480_v12, %v3080_v13  ;;  %v3072_v3 = vadd.f32 %v5379_v48, %v3071_v2 }
 0x3e3   : > { %v3958_v44 = vpop.f32.mrf.mxu1 }
 0x3e4   : > { %3151 = vst [vmem:[%s4923_s24 + $0x8] sm:$0xff] %v3135_v56  ;;  %v3140_v63 = vmax.f32 %v3124_v38, 0.0  ;;  %v3122_v43 = vadd.f32 %v3478_v28, %v3072_v3  ;;  %v3083_v45 = vadd.f32 %v3958_v44, %v5379_v48 }
 0x3e5   : > { %v3074_v17 = vpop.f32.mrf.mxu1 }
 0x3e6   : > { %3156 = vst [vmem:[%s4923_s24 + $0x30] sm:$0xff] %v3140_v63  ;;  %v3138_v60 = vmax.f32 %v3122_v43, 0.0  ;;  %v3125_v14 = vadd.f32 %v3481_v6, %v3083_v45  ;;  %v3075_v9 = vadd.f32 %v5379_v48, %v3074_v17 }
 0x3e7   : > { %v3961_v11 = vpop.f32.mrf.mxu1 }
 0x3e8   : > { %3154 = vst [vmem:[%s4923_s24 + $0x20] sm:$0xff] %v3138_v60  ;;  %v3141_v20 = vmax.f32 %v3125_v14, 0.0  ;;  %v3123_v1 = vadd.f32 %v3479_v0, %v3075_v9  ;;  %v3096_v58 = vadd.f32 %v3961_v11, %v5379_v48 }
 0x3e9   : > { %v3087_v39 = vpop.f32.mrf.mxu1 }
 0x3ea   : > { %3157 = vst [vmem:[%s4923_s24 + $0x38] sm:$0xff] %v3141_v20  ;;  %v3139_v29 = vmax.f32 %v3123_v1, 0.0  ;;  %v3128_v21 = vadd.f32 %v3484_v10, %v3096_v58  ;;  %v3088_v24 = vadd.f32 %v5379_v48, %v3087_v39 }
 0x3eb   : > { %v3962_v37 = vpop.f32.mrf.mxu1 }
 0x3ec   : > { %3155 = vst [vmem:[%s4923_s24 + $0x28] sm:$0xff] %v3139_v29  ;;  %v3144_v35 = vmax.f32 %v3128_v21, 0.0  ;;  %v3126_v23 = vadd.f32 %v3482_v30, %v3088_v24  ;;  %v3099_v34 = vadd.f32 %v3962_v37, %v5379_v48 }
 0x3ed   : > { %v3090_v42 = vpop.f32.mrf.mxu1 }
 0x3ee   : > { %3160 = vst [vmem:[%s4923_s24 + $0x50] sm:$0xff] %v3144_v35  ;;  %v3142_v15 = vmax.f32 %v3126_v23, 0.0  ;;  %v3129_v52 = vadd.f32 %v3485_v49, %v3099_v34  ;;  %v3091_v33 = vadd.f32 %v5379_v48, %v3090_v42 }
 0x3ef   : > { %v3965_v7 = vpop.f32.mrf.mxu1 }
 0x3f0   : > { %3158 = vst [vmem:[%s4923_s24 + $0x40] sm:$0xff] %v3142_v15  ;;  %v3145_v22 = vmax.f32 %v3129_v52, 0.0  ;;  %v3127_v16 = vadd.f32 %v3483_v31, %v3091_v33  ;;  %v3112_v8 = vadd.f32 %v3965_v7, %v5379_v48 }
 0x3f1   : > { %v3103_v18 = vpop.f32.mrf.mxu1 }
 0x3f2   : > { %3161 = vst [vmem:[%s4923_s24 + $0x58] sm:$0xff] %v3145_v22  ;;  %v3143_v59 = vmax.f32 %v3127_v16, 0.0  ;;  %v3132_v62 = vadd.f32 %v3488_v36, %v3112_v8  ;;  %v3104_v55 = vadd.f32 %v5379_v48, %v3103_v18 }
 0x3f3   : > { %v3966_v4 = vpop.f32.mrf.mxu1 }
 0x3f4   : > { %3159 = vst [vmem:[%s4923_s24 + $0x48] sm:$0xff] %v3143_v59  ;;  %v3148_v46 = vmax.f32 %v3132_v62, 0.0  ;;  %v3130_v32 = vadd.f32 %v3486_v54, %v3104_v55  ;;  %v3115_v51 = vadd.f32 %v3966_v4, %v5379_v48 }
 0x3f5   : > { %v3106_v25 = vpop.f32.mrf.mxu1 }
 0x3f6   : > { %3164 = vst [vmem:[%s4923_s24 + $0x70] sm:$0xff] %v3148_v46  ;;  %v3146_v50 = vmax.f32 %v3130_v32, 0.0  ;;  %v3133_v5 = vadd.f32 %v3489_v26, %v3115_v51  ;;  %v3107_v40 = vadd.f32 %v5379_v48, %v3106_v25 }
 0x3f8   : > { %3162 = vst [vmem:[%s4923_s24 + $0x60] sm:$0xff] %v3146_v50  ;;  %v3149_v41 = vmax.f32 %v3133_v5, 0.0  ;;  %v3131_v19 = vadd.f32 %v3487_v47, %v3107_v40 }
 0x3fa   : > { %3165 = vst [vmem:[%s4923_s24 + $0x78] sm:$0xff] %v3149_v41  ;;  %v3147_v53 = vmax.f32 %v3131_v19, 0.0 }
 0x3fc   : > { %3163 = vst [vmem:[%s4923_s24 + $0x68] sm:$0xff] %v3147_v53 }
 0x3fd   : > { %4382 = shalt.err (!%p4379_p7)
}
 0x3fe   : > { %s4383_s8 = scalar_lea.hbm %s5433_s14, 2048  ;;  %s4387_s7 = scalar_lea.hbm %s5556_s16, 8192 }
 0x3ff   : > { %p4384_p0 = scmp.ne.s32.totalorder %s5433_s14, %s4383_s8  ;;  %p4388_p13 = scmp.lt.s32.totalorder %s5433_s14, %s5556_s16 }
 0x400   : > { %p4389_p11 = scmp.lt.s32.totalorder %s4387_s7, %s4383_s8 }
 0x401   : > { %p4385_p4 = pnand %p4384_p0, %p5557_p10 }
 0x402   : > { %p4390_p5 = por %p4389_p11, %p4388_p13 }
 0x403   : > { %p4386_p6 = pneg %p4385_p4 }
 0x405   : > { %p4391_p8 = pnand %p4390_p5, %p4386_p6 }
 0x407   : > { %4394 = shalt.err (!%p4391_p8)
}
 0x408   : > { %s4510_s20 = smov 128   ;;  %s4511_s23 = smov 8  }
 0x409   : > { %4000 = dma.vmem_to_hbm [thread:$0]  (%p5557_p10), %s5435_s15, 2048, %s5433_s14, %s5441_s19, %s4510_s20, %s4510_s20, %s4511_s23  }
 0x40a PF: > { %s5558_s18 = sld [smem:[#allocation16_spill]]  ;;  %p4027_p9 = scmp.ge.s32.totalorder %s4497_s11, 2 }
 0x40b   : > { %s5559_s9 = sld [smem:[#allocation20_spill]] }
 0x410   : > { %s3198_s27 = sand.u32 1, %s5558_s18  }
 0x411   : > { %p5560_p12 = scmp.ne.s32.totalorder %s5559_s9, 0  ;;  %s3199_s12 = scalar_lea.sflag [#allocation5], %s3198_s27 }
 0x413   : > { %p4017_p2 = pnand %p4027_p9, %p5560_p12 }
 0x415   : > { %p4018_p1 = pneg %p4017_p2 }
 0x417   : > { %4452 = dma.done.wait (%p4018_p1), %s3199_s12, 2048  }
 0x418   : > { %4454 = vsyncadd (%p4018_p1), %s3199_s12, 4294965248  ;;  %s25_s11 = sadd.s32 1, %s4497_s11   ;;  %s5561_s30 = sld [smem:[#allocation18_spill]] }
 0x419   : > { %p22_p3 = scmp.ge.s32.totalorder %s25_s11, 6   ;;  %s5562_s9 = sld [smem:[#allocation21_spill]] }
 0x41a   : > { %s5563_s15 = sld [smem:[#allocation22_spill]]  ;;  %s5564_s24 = smov %s4461_s25 }
 0x41b   : > { %s5565_s25 = smov %s4465_s26  ;;  %s5566_s26 = smov %s4699_s3 }
 0x41c   : > { %s5567_s27 = smov %s4473_s28  ;;  %s5568_s28 = smov %s4477_s29 }
 0x41d   : > { %s5569_s29 = smov %s4694_s21  ;;  %s5570_s8 = smov %s4493_s10 }
 0x41e   :  { %24 = sbr.rel (!%p22_p3) target bundleno = 16 (0x10), region = 120 }
 0x420   : > { %s5571_s10 = smov %s5563_s15 }
 0x423   :  { %3204 = vsyncpa [#allocation4], 1 }
 0x424   :  { %3206 = vsyncpa [#allocation4 + $0x1], 1 }
 0x425   :  { %3207 = vsyncpa [#allocation7], 1 }
 0x426   :  { %3208 = vsyncpa [#allocation10], 1 }
 0x427   :  { %3209 = vsyncpa [#allocation5], 1 }
 0x428   :  { %3211 = vsyncpa [#allocation5 + $0x1], 1 }

// kernel: tpu_custom_call.1
= control target key start
LH: loop header
LB: loop body
LE: loop exit
PB: predicated region body
PF: predicated region fallthrough
CT: control target
= control target key end

     0   :  { %s5501_s0 = inlined_call_operand.hbm [shape: f32[2,18,16,128], index: 0, kind: input, shape index: {}]   ;;  %s5502_s1 = inlined_call_operand.hbm [shape: bf16[128,128], index: 1, kind: input, shape index: {}]   ;;  %s5503_s2 = inlined_call_operand.vmem [shape: f32[1,128], index: 2, kind: input, shape index: {}]   ;;  %s5504_s3 = inlined_call_operand.hbm [shape: bf16[3,384,128], index: 3, kind: input, shape index: {}]   ;;  %s5505_s4 = inlined_call_operand.vmem [shape: f32[1,128], index: 4, kind: input, shape index: {}]   ;;  %s5506_s5 = inlined_call_operand.hbm [shape: bf16[128,128], index: 5, kind: input, shape index: {}]   ;;  %s5507_s6 = inlined_call_operand.vmem [shape: f32[1,128], index: 6, kind: input, shape index: {}]   ;;  %s5508_s7 = inlined_call_operand.hbm [shape: f32[2,16,16,128], index: 7, kind: output, shape index: {}]  }
   0x1   :  { %5521 = sst [smem:[#allocation23_spill]] %s5502_s1 }
   0x2   :  { %5522 = sst [smem:[#allocation24_spill]] %s5504_s3 }
   0x3   :  { %5523 = sst [smem:[#allocation25_spill]] %s5506_s5 }
   0x4   :  { %5524 = sst [smem:[#allocation26_spill]] %s5508_s7 }
   0x5   :  { %12 = vsyncpa [#allocation4], 0 }
   0x6   :  { %14 = vsyncpa [#allocation4 + $0x1], 0 }
   0x7   :  { %15 = vsyncpa [#allocation7], 0 }
   0x8   :  { %16 = vsyncpa [#allocation10], 0 }
   0x9   :  { %17 = vsyncpa [#allocation5], 0 }
   0xa   :  { %19 = vsyncpa [#allocation5 + $0x1], 0  ;;  %s4552_s24 = smov 0   ;;  %s4554_s25 = smov 0  }
   0xb   :  { %s4556_s26 = smov 0   ;;  %s4558_s27 = smov 0  }
   0xc   :  { %s4560_s28 = smov 0   ;;  %s4562_s29 = smov 0  }
   0xd   :  { %s4564_s30 = smov 0   ;;  %s4566_s8 = smov 0  }
   0xe   :  { %s4568_s9 = smov 0   ;;  %s4570_s10 = smov 0  }
   0xf   :  { %s4572_s11 = smov 0  }
  0x10 LB: > { %5525 = sst [smem:[#allocation16_spill]] %s4457_s24  ;;  %s3305_s12 = sadd.s32 4294967295, %s4497_s11   ;;  %s4497_s11 = sphi %s4572_s11, %s25_s11   ;;  %s4493_s10 = sphi %s4570_s10, %s5571_s10   ;;  %s4489_s9 = sphi %s4568_s9, %s5562_s9   ;;  %s4485_s8 = sphi %s4566_s8, %s5570_s8   ;;  %s4481_s30 = sphi %s4564_s30, %s5561_s30   ;;  %s4477_s29 = sphi %s4562_s29, %s5569_s29   ;;  %s4473_s28 = sphi %s4560_s28, %s5568_s28   ;;  %s4469_s27 = sphi %s4558_s27, %s5567_s27   ;;  %s4465_s26 = sphi %s4556_s26, %s5566_s26   ;;  %s4461_s25 = sphi %s4554_s25, %s5565_s25   ;;  %s4457_s24 = sphi %s4552_s24, %s5564_s24  }
  0x11   : > { %5526 = sst [smem:[#allocation17_spill]] %s4485_s8  ;;  %s3306_s13 = sadd.s32 4294967294, %s4497_s11  }
  0x12   : > { %5527 = sst [smem:[#allocation18_spill]] %s4489_s9  ;;  %p57_p0 = scmp.ne.s32.totalorder %s4473_s28, %s4469_s27 }
  0x13   : > { %p4608_p1 = scmp.eq.s32.totalorder %s3305_s12, 0  ;;  %p208_p2 = scmp.ne.s32.totalorder %s4465_s26, %s4461_s25 }
  0x14   : > { %p209_p4 = scmp.eq.s32.totalorder %s3305_s12, 3  ;;  %p214_p5 = scmp.ne.s32.totalorder %s4461_s25, %s4457_s24 }
  0x15   : > { %s5528_s14 = scalar_select %p4608_p1, 1, 0 }
  0x16   : > { %p4617_p3 = por %p4608_p1, %p57_p0  ;;  %p215_p6 = scmp.eq.s32.totalorder %s3306_s13, 3 }
  0x17   : > { %p4623_p7 = por %p209_p4, %p208_p2  ;;  %p3307_p8 = scmp.ge.s32.totalorder %s4497_s11, 1 }
  0x18   : > { %s5529_s16 = scalar_select %p4617_p3, 1, 0 }
  0x19   : > { %s5530_s17 = scalar_select %p4623_p7, 1, 0 }
  0x1a   : > { %p4628_p9 = por %p215_p6, %p214_p5  ;;  %p222_p10 = scmp.lt.s32.totalorder %s4497_s11, 5 }
  0x1b   : > { %5531 = sst [smem:[#allocation19_spill]] %s5530_s17  ;;  %s4499_s20 = smov [#allocation6]  }
  0x1c   : > { %s5532_s18 = scalar_select %p4628_p9, 1, 0 }
  0x1d   : > { %p4633_p11 = pnand %p3307_p8, %p222_p10  ;;  %s234_s21 = sshll.u32 %s4499_s20, 4  ;;  %s235_s21 = int_to_ptr.vmem [resolvable:$true] %s234_s21 }
  0x1e   : > { %5533 = sst [smem:[#allocation20_spill]] %s5532_s18  ;;  %s4500_s23 = smov [#allocation8]  }
  0x1f   : > { %p4002_p12 = pneg %p4633_p11  ;;  %s250_s27 = sshll.u32 %s4500_s23, 4  ;;  %s251_s27 = int_to_ptr.vmem [resolvable:$true] %s250_s27 }
  0x20   : > { %s4501_s12 = smov [#allocation9]   ;;  %s4274_s15 = scalar_lea.vmem %s235_s21, 1024 }
  0x21   : > { %p4641_p13 = pnand %p4002_p12, %p4608_p1  ;;  %s266_s13 = sshll.u32 %s4501_s12, 4  ;;  %s267_s13 = int_to_ptr.vmem [resolvable:$true] %s266_s13 }
  0x22   : > { %p4275_p2 = scmp.ne.s32.totalorder %s235_s21, %s4274_s15  ;;  %p4282_p6 = scmp.lt.s32.totalorder %s235_s21, %s235_s21 }
  0x23   : > { %p4265_p0 = pneg %p4641_p13  ;;  %p4283_p8 = scmp.lt.s32.totalorder %s4274_s15, %s4274_s15 }
  0x25   : > { %p4277_p4 = pnand %p4275_p2, %p4265_p0  ;;  %p4284_p10 = por %p4283_p8, %p4282_p6 }
  0x27   : > { %p4278_p5 = pneg %p4277_p4 }
  0x29   : > { %p4285_p12 = pnand %p4284_p10, %p4278_p5 }
  0x2b   : > { %4288 = shalt.err (!%p4285_p12)
}
  0x2c   : > { %s4502_s20 = smov 64   ;;  %s4503_s23 = smov 4  }
  0x2d   : > { %s5536_s1 = sld [smem:[#allocation23_spill]]  ;;  %s4300_s24 = scalar_lea.vmem %s251_s27, 9216 }
  0x2e   : > { %p4301_p9 = scmp.ne.s32.totalorder %s251_s27, %s4300_s24  ;;  %p4308_p7 = scmp.lt.s32.totalorder %s251_s27, %s251_s27 }
  0x2f   : > { %p4309_p1 = scmp.lt.s32.totalorder %s4300_s24, %s4300_s24 }
  0x30   : > { %p4303_p2 = pnand %p4301_p9, %p4265_p0 }
  0x31   : > { %p4310_p6 = por %p4309_p1, %p4308_p7 }
  0x32   : > { %p4304_p4 = pneg %p4303_p2 }
  0x33   : > { %4005 = dma.hbm_to_vmem [thread:$0]  (!%p4641_p13), %s5536_s1, 1024, %s235_s21, [#allocation7], %s4502_s20, %s4502_s20, %s4503_s23  }
  0x34   : > { %p4311_p5 = pnand %p4310_p6, %p4304_p4 }
  0x36   : > { %4314 = shalt.err (!%p4311_p5)
}
  0x37   : > { %s5537_s3 = sld [smem:[#allocation24_spill]]  ;;  %s4326_s18 = scalar_lea.vmem %s267_s13, 1024 }
  0x38   : > { %p4327_p8 = scmp.ne.s32.totalorder %s267_s13, %s4326_s18  ;;  %p4334_p12 = scmp.lt.s32.totalorder %s267_s13, %s267_s13 }
  0x39   : > { %p4335_p2 = scmp.lt.s32.totalorder %s4326_s18, %s4326_s18 }
  0x3a   : > { %p4329_p10 = pnand %p4327_p8, %p4265_p0 }
  0x3b   : > { %p4336_p3 = por %p4335_p2, %p4334_p12 }
  0x3c   : > { %p4330_p9 = pneg %p4329_p10 }
  0x3d   : > { %4008 = dma.hbm_to_vmem [thread:$0]  (!%p4641_p13), %s5537_s3, 9216, %s251_s27, [#allocation7], %s4502_s20, %s4502_s20, %s4503_s23  }
  0x3e   : > { %p4337_p1 = pnand %p4336_p3, %p4330_p9 }
  0x40   : > { %4340 = shalt.err (!%p4337_p1)
}
  0x41   : > { %s5538_s5 = sld [smem:[#allocation25_spill]]  ;;  %s34_s7 = sadd.s32 1, %s4489_s9 }
  0x42   : > { %p35_p3 = scmp.ge.s32.totalorder %s34_s7, 2  ;;  %s37_s27 = sadd.s32 1, %s4493_s10 }
  0x43   : > { %s44_s22 = sadd.s32 1, %s4477_s29  ;;  %p51_p7 = scmp.ne.s32.totalorder %s4477_s29, %s4473_s28 }
  0x44   : > { %s5573_s7 = smov (%p35_p3, %s34_s7), 0  ;;  %s5575_s27 = smov (!%p35_p3, %s37_s27), %s4493_s10 }
  0x45   : > { %5539 = sst [smem:[#allocation21_spill]] %s5573_s7  ;;  %p52_p0 = scmp.eq.s32.totalorder %s4497_s11, 0 }
  0x46   : > { %s194_s12 = ssub.s32 %s4489_s9, %s5573_s7  ;;  %p39_p4 = scmp.ge.s32.totalorder %s5575_s27, 2 }
  0x47   : > { %4011 = dma.hbm_to_vmem [thread:$0]  (!%p4641_p13), %s5538_s5, 1024, %s267_s13, [#allocation10], %s4502_s20, %s4502_s20, %s4503_s23  }
  0x48   : > { %p4023_p6 = scmp.lt.s32.totalorder %s4497_s11, 4  ;;  %p4683_p13 = por %p52_p0, %p51_p7 }
  0x49   : > { %s283_s20 = sand.u32 1, %s4477_s29   ;;  %s5577_s27 = smov (%p39_p4, %s5575_s27), 0 }
  0x4a   : > { %5541 = sst [smem:[#allocation22_spill]] %s5577_s27  ;;  %s3983_s23 = smul.u32 288, %s283_s20 }
  0x4b   : > { %s41_s15 = ssub.s32 %s4493_s10, %s5577_s27  ;;  %s3984_s18 = smul.u32 4608, %s4493_s10 }
  0x4c   : > { %p42_p5 = scmp.eq.s32.totalorder %s41_s15, 0  ;;  %s195_s24 = sor.u32 %s194_s12, %s41_s15 }
  0x4d   : > { %p196_p8 = scmp.eq.s32.totalorder %s195_s24, 0  ;;  %s5542_s1 = sadd.s32 1, %s4465_s26 }
  0x4e   : > { %s4694_s21 = scalar_select %p42_p5, %s4477_s29, %s44_s22  }
  0x4f   : > { %s4699_s3 = scalar_select %p196_p8, %s4465_s26, %s5542_s1  }
  0x50   : > { %s293_s9 = scalar_lea.hbm %s5501_s0, %s3984_s18  ;;  %s287_s17 = scalar_lea.vmem [#allocation3], %s3983_s23 }
  0x51   : > { %s294_s8 = sshll.u32 %s287_s17, 4  ;;  %p4708_p10 = pnand %p4023_p6, %p4683_p13  ;;  %s295_s8 = int_to_ptr.vmem [resolvable:$true] %s294_s8 }
  0x52   : > { %s284_s12 = scalar_lea.sflag [#allocation4], %s283_s20  ;;  %s4354_s22 = scalar_lea.vmem %s295_s8, 4608 }
  0x53   : > { %p4343_p9 = pneg %p4708_p10  ;;  %p4355_p12 = scmp.ne.s32.totalorder %s295_s8, %s4354_s22 }
  0x54   : > { %s4504_s1 = smov [#allocation3]  }
  0x55   : > { %p4357_p2 = pnand %p4355_p12, %p4343_p9  ;;  %s4359_s5 = sshll.u32 %s4504_s1, 4  ;;  %s4360_s5 = int_to_ptr.vmem [resolvable:$false] %s4359_s5 }
  0x56   : > { %s4361_s7 = scalar_lea.vmem %s4360_s5, 9216  ;;  %p4362_p3 = scmp.lt.s32.totalorder %s295_s8, %s4360_s5 }
  0x57   : > { %p4358_p1 = pneg %p4357_p2  ;;  %p4363_p7 = scmp.lt.s32.totalorder %s4361_s7, %s4354_s22 }
  0x59   : > { %p4364_p0 = por %p4363_p7, %p4362_p3 }
  0x5b   : > { %p4365_p4 = pnand %p4364_p0, %p4358_p1 }
  0x5d   : > { %4368 = shalt.err (!%p4365_p4)
}
  0x5e   : > { %s4505_s17 = smov 128   ;;  %s4506_s13 = smov 8  }
  0x5f   : > { %4015 = dma.hbm_to_vmem [thread:$0]  (!%p4708_p10), %s293_s9, 4608, %s295_s8, %s284_s12, %s4505_s17, %s4505_s17, %s4506_s13  }
  0x60   : > { %306 = sbr.rel (%p4633_p11) target bundleno = 1034 (0x40a), region = 48  ;;  %s308_s20 = sand.u32 (!%p4633_p11), 1, %s4473_s28  }
  0x61   : > { %s3985_s23 = smul.u32 (!%p4633_p11), 288, %s308_s20  ;;  %s309_s15 = scalar_lea.sflag (!%p4633_p11), [#allocation4], %s308_s20 }
  0x62   : > { %p5544_p6 = scmp.ne.s32.totalorder (!%p4633_p11), %s5529_s16, 0 }
  0x63   : > { %s312_s18 = scalar_lea.vmem (!%p4633_p11), [#allocation3], %s3985_s23 }
  0x65   : > { %4440 = dma.done.wait (%p5544_p6), %s309_s15, 4608  }
  0x66   : > { %4442 = vsyncadd (%p5544_p6), %s309_s15, 4294962688  ;;  %p5545_p13 = scmp.ne.s32.totalorder %s5528_s14, 0 }
  0x68   : > { %4444 = dma.done.wait (%p5545_p13), [#allocation7], 10240  }
  0x69   : > { %4446 = vsyncadd (%p5545_p13), [#allocation7], 4294957056 }
  0x6a   : > { %4448 = dma.done.wait (%p5545_p13), [#allocation10], 1024  }
  0x6b   : > { %4450 = vsyncadd (%p5545_p13), [#allocation10], 4294966272  ;;  %s352_s8 = sand.u32 1, %s4461_s25   ;;  %v4127_v0 = vld [vmem:[#allocation6 + $0x38] sm:$0xff]   ;;  %v4128_v1 = vld [vmem:[#allocation6 + $0x30] sm:$0xff]   ;;  %s3506_s16 = sshll.u32 %s4481_s30, 7 }
  0x6c   : > { %s4734_s9 = sshll.u32 %s352_s8, 7  ;;  %3803 = vmatprep.subr.bf16.mxu0 %v4127_v0  ;;  %v4129_v2 = vld [vmem:[#allocation6 + $0x28] sm:$0xff]   ;;  %s4737_s19 = scalar_lea.vmem %s312_s18, %s3506_s16 [#allocation3]  ;;  %v4130_v3 = vld [vmem:[#allocation6 + $0x20] sm:$0xff]   ;;  %v4131_v7 = vld [vmem:[#allocation6 + $0x18] sm:$0xff]   ;;  %vm857_vm0 = vcmask 1043456   ;;  %vm864_vm3 = vcmask 1040384  }
  0x6d   : > { %3804 = vmatpush3.bf16.msra.mxu0 %v4127_v0  ;;  %v360_v4 = vld [vmem:[%s4737_s19] sm:$0xff]  ;;  %v361_v5 = vld [vmem:[%s4737_s19 + $0x8] sm:$0xff]  ;;  %v4134_v10 = vld [vmem:[#allocation6] sm:$0xff]   ;;  %vm858_vm1 = vsmask.f32 7938  ;;  %s4923_s24 = scalar_lea.vmem [#allocation11], %s4734_s9 }
  0x6e   : > { %3805 = vmatprep.subr.bf16.mxu0 %v4128_v1  ;;  %v380_v6 = vpack.c.bf16 %v361_v5, %v360_v4  ;;  %v4132_v8 = vld [vmem:[#allocation6 + $0x10] sm:$0xff]   ;;  %v4133_v9 = vld [vmem:[#allocation6 + $0x8] sm:$0xff]   ;;  %v362_v11 = vld [vmem:[%s4737_s19 + $0x10] sm:$0xff]  ;;  %vm654_vm2 = vsmask.f32 256  ;;  %p3349_p11 = scmp.ne.s32.totalorder %s4481_s30, 0 }
  0x6f   : > { %v363_v12 = vld [vmem:[%s4737_s19 + $0x18] sm:$0xff]  ;;  %v364_v13 = vld [vmem:[%s4737_s19 + $0x20] sm:$0xff]  ;;  %v365_v14 = vld [vmem:[%s4737_s19 + $0x28] sm:$0xff]  ;;  %vm655_vm5 = vsmask.f32 4368 }
  0x70   : > { %3819 = vmatprep.mubr.bf16.mxu0 %v380_v6  ;;  %v381_v15 = vpack.c.bf16 %v363_v12, %v362_v11  ;;  %v382_v16 = vpack.c.bf16 %v365_v14, %v364_v13  ;;  %v366_v17 = vld [vmem:[%s4737_s19 + $0x30] sm:$0xff]  ;;  %v367_v18 = vld [vmem:[%s4737_s19 + $0x38] sm:$0xff]  ;;  %v368_v19 = vld [vmem:[%s4737_s19 + $0x40] sm:$0xff] }
  0x71   : > { %3806 = vmatpush3.bf16.msra.mxu0 %v4128_v1  ;;  %v369_v20 = vld [vmem:[%s4737_s19 + $0x48] sm:$0xff]  ;;  %v383_v21 = vpack.c.bf16 %v367_v18, %v366_v17  ;;  %v370_v23 = vld [vmem:[%s4737_s19 + $0x50] sm:$0xff]  ;;  %v371_v24 = vld [vmem:[%s4737_s19 + $0x58] sm:$0xff] }
  0x72   : > { %3807 = vmatprep.subr.bf16.mxu0 %v4129_v2  ;;  %v384_v22 = vpack.c.bf16 %v369_v20, %v368_v19  ;;  %v372_v25 = vld [vmem:[%s4737_s19 + $0x60] sm:$0xff]  ;;  %v373_v26 = vld [vmem:[%s4737_s19 + $0x68] sm:$0xff]  ;;  %v385_v27 = vpack.c.bf16 %v371_v24, %v370_v23  ;;  %v374_v29 = vld [vmem:[%s4737_s19 + $0x70] sm:$0xff] }
  0x73   : > { %v386_v28 = vpack.c.bf16 %v373_v26, %v372_v25  ;;  %v375_v30 = vld [vmem:[%s4737_s19 + $0x78] sm:$0xff]  ;;  %v376_v31 = vld [vmem:[%s4737_s19 + $0x80] sm:$0xff]  ;;  %v377_v32 = vld [vmem:[%s4737_s19 + $0x88] sm:$0xff] }
  0x74   : > { %v387_v33 = vpack.c.bf16 %v375_v30, %v374_v29  ;;  %v388_v34 = vpack.c.bf16 %v377_v32, %v376_v31  ;;  %v378_v35 = vld [vmem:[%s4737_s19 + $0x90] sm:$0xff]  ;;  %v379_v36 = vld [vmem:[%s4737_s19 + $0x98] sm:$0xff]  ;;  %v4762_v38 = vld [vmem:[%s5503_s2] ss:$0 sm:$0xff] }
  0x75   : > { %3808 = vmatpush3.bf16.msra.mxu0 %v4129_v2  ;;  %v389_v37 = vpack.c.bf16 %v379_v36, %v378_v35  ;;  %vm4769_vm4 = vmand %vm857_vm0, %vm858_vm1  ;;  %v869_v59 = vld [vmem:[#allocation2 + $0xc] sm:$0xf]  ;;  %v860_v4 = vld [vmem:[#allocation2] sm:$0xf] }
  0x76   : > { %3809 = vmatprep.subr.bf16.mxu0 %v4130_v3  ;;  %vm4777_vm6 = vmand %vm864_vm3, %vm654_vm2 }
  0x77   : > { %vm4785_vm7 = vmor %vm654_vm2, %vm655_vm5 }
  0x78   : > { %vm4809_vm8 = vmand %vm864_vm3, %vm858_vm1 }
  0x79   : > { %3810 = vmatpush3.bf16.msra.mxu0 %v4130_v3 }
  0x7a   : > { %3811 = vmatprep.subr.bf16.mxu0 %v4131_v7 }
  0x7d   : > { %3812 = vmatpush3.bf16.msra.mxu0 %v4131_v7 }
  0x7e   : > { %3813 = vmatprep.subr.bf16.mxu0 %v4132_v8 }
  0x81   : > { %3814 = vmatpush3.bf16.msra.mxu0 %v4132_v8 }
  0x82   : > { %3815 = vmatprep.subr.bf16.mxu0 %v4133_v9 }
  0x85   : > { %3816 = vmatpush3.bf16.msra.mxu0 %v4133_v9 }
  0x86   : > { %3817 = vmatprep.subr.bf16.mxu0 %v4134_v10 }
  0x89   : > { %3818 = vmatpush3.bf16.msra.mxu0 %v4134_v10 }
  0x8c   : > { %3820 = vmatmul.mubr.bf16.vlgmr.msra.gmra.mxu0 %v381_v15 }
  0x8d   : > { %3823 = vmatprep.mubr.bf16.mxu0 %v382_v16  ;;  %v873_v16 = vld [vmem:[#allocation2 + $0x14] sm:$0x1] }
  0x94   : > { %3824 = vmatmul.mubr.bf16.gmra.mxu0 %v383_v21 }
  0x95   : > { %3827 = vmatprep.mubr.bf16.mxu0 %v384_v22 }
  0x9c   : > { %3828 = vmatmul.mubr.bf16.gmra.mxu0 %v385_v27 }
  0x9d   : > { %3831 = vmatprep.mubr.bf16.mxu0 %v386_v28 }
  0xa4   : > { %3832 = vmatmul.mubr.bf16.gmra.mxu0 %v387_v33  ;;  %v866_v33 = vld [vmem:[#allocation2 + $0x8] sm:$0x1] }
  0xa5   : > { %3835 = vmatprep.mubr.bf16.mxu0 %v388_v34 }
  0xac   : > { %3836 = vmatmul.mubr.bf16.gmra.mxu0 %v389_v37 }
 0x14c   : > { %v3821_v39 = vpop.f32.mrf.mxu0 }
 0x14d   : > { %v504_v40 = vadd.f32 %v3821_v39, %v4762_v38 }
 0x14e   : > { %v495_v41 = vpop.f32.mrf.mxu0 }
 0x14f   : > { %v576_v42 = vmax.f32 %v504_v40, 0.0  ;;  %v496_v43 = vadd.f32 %v4762_v38, %v495_v41 }
 0x150   : > { %v3822_v44 = vpop.f32.mrf.mxu0 }
 0x151   : > { %v3509_v45 = vpack.c.bf16 %v576_v42, %v576_v42  ;;  %v574_v46 = vmax.f32 %v496_v43, 0.0  ;;  %v507_v47 = vadd.f32 %v3822_v44, %v4762_v38  ;;  %v883_v42 = vld [vmem:[#allocation2 + $0x24] sm:$0xf] }
 0x152   : > { %v498_v48 = vpop.f32.mrf.mxu0 }
 0x153   : > { %v675_v49 = vshrl.u32 %v3509_v45, 16  ;;  %v3507_v50 = vpack.c.bf16 %v574_v46, %v574_v46  ;;  %v577_v51 = vmax.f32 %v507_v47, 0.0  ;;  %v499_v52 = vadd.f32 %v4762_v38, %v498_v48 }
 0x154   : > { %v3825_v53 = vpop.f32.mrf.mxu0  ;;  %v678_v55 = vshll.u32 %v3509_v45, 16 }
 0x155   : > { %v677_v54 = vrot.slane %v675_v49, 7  ;;  %v658_v56 = vshrl.u32 %v3507_v50, 16  ;;  %v3510_v57 = vpack.c.bf16 %v577_v51, %v577_v51  ;;  %v661_v60 = vshll.u32 %v3507_v50, 16 }
 0x156   : > { %v575_v61 = vmax.f32 %v499_v52, 0.0  ;;  %v520_v62 = vadd.f32 %v3825_v53, %v4762_v38  ;;  %v511_v63 = vpop.f32.mrf.mxu0 }
 0x157   : > { %v680_v0 = vor.u32 %v678_v55, %v677_v54  ;;  %v681_v1 = vrot.slane %v677_v54, 4  ;;  %v660_v2 = vrot.slane %v658_v56, 7  ;;  %v683_v3 = vshrl.u32 %v3510_v57, 16 }
 0x158   : > { %v686_v5 = vshll.u32 %v3510_v57, 16  ;;  %v3508_v6 = vpack.c.bf16 %v575_v61, %v575_v61  ;;  %v580_v7 = vmax.f32 %v520_v62, 0.0  ;;  %v512_v8 = vadd.f32 %v4762_v38, %v511_v63  ;;  %v3826_v9 = vpop.f32.mrf.mxu0 }
 0x159   : > { %v870_v11 = vsel %vm4769_vm4, %v680_v0, %v869_v59  ;;  %v663_v12 = vor.u32 %v661_v60, %v660_v2  ;;  %v664_v13 = vrot.slane %v660_v2, 4  ;;  %v685_v14 = vrot.slane %v683_v3, 7  ;;  %v876_v60 = vld [vmem:[#allocation2 + $0x18] sm:$0xf] }
 0x15a   : > { %871 = vst [vmem:[#allocation2 + $0xc] sm:$0xf] %v870_v11  ;;  %v666_v17 = vshrl.u32 %v3508_v6, 16  ;;  %v669_v18 = vshll.u32 %v3508_v6, 16  ;;  %v3513_v19 = vpack.c.bf16 %v580_v7, %v580_v7  ;;  %v578_v20 = vmax.f32 %v512_v8, 0.0  ;;  %v514_v21 = vpop.f32.mrf.mxu0 }
 0x15b   : > { %v861_v22 = vsel %vm4769_vm4, %v663_v12, %v860_v4  ;;  %v688_v23 = vor.u32 %v686_v5, %v685_v14  ;;  %v690_v24 = vrot.slane %v685_v14, 4  ;;  %v523_v25 = vadd.f32 %v3826_v9, %v4762_v38  ;;  %v887_v7 = vld [vmem:[#allocation2 + $0x2c] sm:$0x1] }
 0x15c   : > { %862 = vst [vmem:[#allocation2] sm:$0xf] %v861_v22  ;;  %v668_v26 = vrot.slane %v666_v17, 7  ;;  %v709_v27 = vshrl.u32 %v3513_v19, 16  ;;  %v712_v28 = vshll.u32 %v3513_v19, 16  ;;  %v3511_v29 = vpack.c.bf16 %v578_v20, %v578_v20  ;;  %v3829_v30 = vpop.f32.mrf.mxu0 }
 0x15d   : > { %v689_v31 = vsel %vm4785_vm7, %v681_v1, %v688_v23  ;;  %v874_v32 = vsel %vm4777_vm6, %v690_v24, %v873_v16  ;;  %v581_v34 = vmax.f32 %v523_v25, 0.0  ;;  %v515_v35 = vadd.f32 %v4762_v38, %v514_v21  ;;  %v880_v20 = vld [vmem:[#allocation2 + $0x20] sm:$0x1] }
 0x15e   : > { %872 = vst [vmem:[#allocation2 + $0x10] sm:$0xf] %v689_v31  ;;  %875 = vst [vmem:[#allocation2 + $0x14] sm:$0x1] %v874_v32  ;;  %v671_v36 = vor.u32 %v669_v18, %v668_v26  ;;  %v673_v37 = vrot.slane %v668_v26, 4  ;;  %v711_v39 = vrot.slane %v709_v27, 7  ;;  %v527_v41 = vpop.f32.mrf.mxu0  ;;  %v536_v46 = vadd.f32 %v3829_v30, %v4762_v38 }
 0x15f   : > { %v692_v40 = vshrl.u32 %v3511_v29, 16  ;;  %v695_v43 = vshll.u32 %v3511_v29, 16  ;;  %v3514_v44 = vpack.c.bf16 %v581_v34, %v581_v34  ;;  %v579_v45 = vmax.f32 %v515_v35, 0.0 }
 0x160   : > { %v672_v47 = vsel %vm4785_vm7, %v664_v13, %v671_v36  ;;  %v867_v48 = vsel %vm4777_vm6, %v673_v37, %v866_v33  ;;  %v714_v49 = vor.u32 %v712_v28, %v711_v39  ;;  %v715_v50 = vrot.slane %v711_v39, 4  ;;  %v3830_v51 = vpop.f32.mrf.mxu0  ;;  %v897_v39 = vld [vmem:[#allocation2 + $0x3c] sm:$0xf] }
 0x161   : > { %v935_v52 = vld [vmem:[#allocation2 + $0xc] sm:$0x1]  ;;  %863 = vst [vmem:[#allocation2 + $0x4] sm:$0xf] %v672_v47  ;;  %868 = vst [vmem:[#allocation2 + $0x8] sm:$0x1] %v867_v48  ;;  %v3512_v56 = vpack.c.bf16 %v579_v45, %v579_v45  ;;  %v528_v62 = vadd.f32 %v4762_v38, %v527_v41  ;;  %v539_v33 = vadd.f32 %v3830_v51, %v4762_v38 }
 0x162   : > { %v694_v53 = vrot.slane %v692_v40, 7  ;;  %v717_v54 = vshrl.u32 %v3514_v44, 16  ;;  %v720_v55 = vshll.u32 %v3514_v44, 16  ;;  %v936_v57 = vsel %vm4777_vm6, 0, %v935_v52  ;;  %v530_v63 = vpop.f32.mrf.mxu0  ;;  %v890_v48 = vld [vmem:[#allocation2 + $0x30] sm:$0xf] }
 0x163   : > { %v884_v59 = vsel %vm4769_vm4, %v714_v49, %v883_v42  ;;  %v584_v61 = vmax.f32 %v536_v46, 0.0  ;;  %937 = vst [vmem:[#allocation2 + $0xc] sm:$0x1] %v936_v57  ;;  %v932_v1 = vld [vmem:[#allocation2] sm:$0x1]  ;;  %v700_v5 = vshrl.u32 %v3512_v56, 16  ;;  %v531_v40 = vadd.f32 %v4762_v38, %v530_v63 }
 0x164   : > { %885 = vst [vmem:[#allocation2 + $0x24] sm:$0xf] %v884_v59  ;;  %v697_v2 = vor.u32 %v695_v43, %v694_v53  ;;  %v698_v3 = vrot.slane %v694_v53, 4  ;;  %v719_v4 = vrot.slane %v717_v54, 7  ;;  %v933_v6 = vsel %vm4777_vm6, 0, %v932_v1  ;;  %v3833_v12 = vpop.f32.mrf.mxu0 }
 0x165   : > { %v703_v8 = vshll.u32 %v3512_v56, 16  ;;  %v3517_v9 = vpack.c.bf16 %v584_v61, %v584_v61  ;;  %v582_v11 = vmax.f32 %v528_v62, 0.0  ;;  %934 = vst [vmem:[#allocation2] sm:$0x1] %v933_v6  ;;  %v966_v13 = vld [vmem:[#allocation2 + $0x14] sm:$0x1] }
 0x166   : > { %v877_v14 = vsel %vm4769_vm4, %v697_v2, %v876_v60  ;;  %v722_v16 = vor.u32 %v720_v55, %v719_v4  ;;  %v724_v17 = vrot.slane %v719_v4, 4  ;;  %v702_v18 = vrot.slane %v700_v5, 7  ;;  %v543_v24 = vpop.f32.mrf.mxu0 }
 0x167   : > { %v967_v19 = vsel %vm4809_vm8, 0, %v966_v13  ;;  %878 = vst [vmem:[#allocation2 + $0x18] sm:$0xf] %v877_v14  ;;  %v743_v21 = vshrl.u32 %v3517_v9, 16  ;;  %v746_v22 = vshll.u32 %v3517_v9, 16  ;;  %v3515_v23 = vpack.c.bf16 %v582_v11, %v582_v11 }
 0x168   : > { %968 = vst [vmem:[#allocation2 + $0x14] sm:$0x1] %v967_v19  ;;  %v723_v25 = vsel %vm4785_vm7, %v715_v50, %v722_v16  ;;  %v888_v26 = vsel %vm4777_vm6, %v724_v17, %v887_v7  ;;  %v705_v27 = vor.u32 %v703_v8, %v702_v18  ;;  %v707_v28 = vrot.slane %v702_v18, 4  ;;  %v963_v29 = vld [vmem:[#allocation2 + $0x8] sm:$0x1]  ;;  %v3834_v34 = vpop.f32.mrf.mxu0 }
 0x169   : > { %886 = vst [vmem:[#allocation2 + $0x28] sm:$0xf] %v723_v25  ;;  %889 = vst [vmem:[#allocation2 + $0x2c] sm:$0x1] %v888_v26  ;;  %v4823_v30 = vrot.slane %v743_v21, 7  ;;  %v726_v31 = vshrl.u32 %v3515_v23, 16  ;;  %v552_v50 = vadd.f32 %v3833_v12, %v4762_v38  ;;  %v544_v51 = vadd.f32 %v4762_v38, %v543_v24 }
 0x16a   : > { %v729_v32 = vshll.u32 %v3515_v23, 16  ;;  %v964_v35 = vsel %vm4809_vm8, 0, %v963_v29  ;;  %v706_v36 = vsel %vm4785_vm7, %v698_v3, %v705_v27  ;;  %v881_v37 = vsel %vm4777_vm6, %v707_v28, %v880_v20  ;;  %v546_v46 = vpop.f32.mrf.mxu0  ;;  %v901_v13 = vld [vmem:[#allocation2 + $0x44] sm:$0x1]  ;;  %v894_v25 = vld [vmem:[#allocation2 + $0x38] sm:$0x1] }
 0x16b   : > { %965 = vst [vmem:[#allocation2 + $0x8] sm:$0x1] %v964_v35  ;;  %v941_v41 = vld [vmem:[#allocation2 + $0x24] sm:$0x1]  ;;  %879 = vst [vmem:[#allocation2 + $0x1c] sm:$0xf] %v706_v36  ;;  %v748_v42 = vor.u32 %v746_v22, %v4823_v30  ;;  %v555_v62 = vadd.f32 %v3834_v34, %v4762_v38  ;;  %v547_v16 = vadd.f32 %v4762_v38, %v546_v46 }
 0x16c   : > { %882 = vst [vmem:[#allocation2 + $0x20] sm:$0x1] %v881_v37  ;;  %v749_v43 = vrot.slane %v4823_v30, 4  ;;  %v4835_v44 = vrot.slane %v726_v31, 7  ;;  %v585_v45 = vmax.f32 %v539_v33, 0.0  ;;  %v942_v47 = vsel %vm4777_vm6, 0, %v941_v41  ;;  %v4845_v56 = vpop.f32.mrf.mxu0 }
 0x16d   : > { %v583_v49 = vmax.f32 %v531_v40, 0.0  ;;  %943 = vst [vmem:[#allocation2 + $0x24] sm:$0x1] %v942_v47  ;;  %v898_v52 = vsel %vm4769_vm4, %v748_v42, %v897_v39  ;;  %v588_v60 = vmax.f32 %v552_v50, 0.0  ;;  %v586_v61 = vmax.f32 %v544_v51, 0.0 }
 0x16e   : > { %v731_v53 = vor.u32 %v729_v32, %v4835_v44  ;;  %v732_v54 = vrot.slane %v4835_v44, 4  ;;  %v3518_v55 = vpack.c.bf16 %v585_v45, %v585_v45  ;;  %v938_v57 = vld [vmem:[#allocation2 + $0x18] sm:$0x1]  ;;  %899 = vst [vmem:[#allocation2 + $0x3c] sm:$0xf] %v898_v52  ;;  %v559_v4 = vpop.f32.mrf.mxu0  ;;  %v589_v14 = vmax.f32 %v555_v62, 0.0 }
 0x16f   : > { %v3516_v59 = vpack.c.bf16 %v583_v49, %v583_v49  ;;  %v939_v63 = vsel %vm4777_vm6, 0, %v938_v57  ;;  %v3521_v8 = vpack.c.bf16 %v588_v60, %v588_v60  ;;  %v3519_v9 = vpack.c.bf16 %v586_v61, %v586_v61  ;;  %v911_v35 = vld [vmem:[#allocation2 + $0x54] sm:$0xf]  ;;  %v904_v44 = vld [vmem:[#allocation2 + $0x48] sm:$0xf] }
 0x170   : > { %v891_v1 = vsel %vm4769_vm4, %v731_v53, %v890_v48  ;;  %v751_v2 = vshrl.u32 %v3518_v55, 16  ;;  %v754_v3 = vshll.u32 %v3518_v55, 16  ;;  %940 = vst [vmem:[#allocation2 + $0x18] sm:$0x1] %v939_v63  ;;  %v972_v5 = vld [vmem:[#allocation2 + $0x2c] sm:$0x1]  ;;  %v3838_v27 = vpop.f32.mrf.mxu0  ;;  %v3522_v36 = vpack.c.bf16 %v589_v14, %v589_v14 }
 0x171   : > { %892 = vst [vmem:[#allocation2 + $0x30] sm:$0xf] %v891_v1  ;;  %v734_v6 = vshrl.u32 %v3516_v59, 16  ;;  %v737_v7 = vshll.u32 %v3516_v59, 16  ;;  %v973_v11 = vsel %vm4809_vm8, 0, %v972_v5  ;;  %v777_v19 = vshrl.u32 %v3521_v8, 16 }
 0x172   : > { %v753_v12 = vrot.slane %v751_v2, 7  ;;  %974 = vst [vmem:[#allocation2 + $0x2c] sm:$0x1] %v973_v11  ;;  %v780_v20 = vshll.u32 %v3521_v8, 16  ;;  %v760_v21 = vshrl.u32 %v3519_v9, 16  ;;  %v763_v26 = vshll.u32 %v3519_v9, 16  ;;  %v562_v48 = vpop.f32.mrf.mxu0 }
 0x173   : > { %v969_v17 = vld [vmem:[#allocation2 + $0x20] sm:$0x1]  ;;  %v736_v18 = vrot.slane %v734_v6, 7  ;;  %v779_v30 = vrot.slane %v777_v19, 7  ;;  %v587_v37 = vmax.f32 %v547_v16, 0.0  ;;  %v785_v47 = vshrl.u32 %v3522_v36, 16 }
 0x174   : > { %v970_v22 = vsel %vm4809_vm8, 0, %v969_v17  ;;  %v756_v23 = vor.u32 %v754_v3, %v753_v12  ;;  %v758_v24 = vrot.slane %v753_v12, 4  ;;  %v4857_v31 = vrot.slane %v760_v21, 7  ;;  %v915_v60 = vld [vmem:[#allocation2 + $0x5c] sm:$0x1] }
 0x175   : > { %971 = vst [vmem:[#allocation2 + $0x20] sm:$0x1] %v970_v22  ;;  %v739_v28 = vor.u32 %v737_v7, %v736_v18  ;;  %v741_v29 = vrot.slane %v736_v18, 4  ;;  %v947_v32 = vld [vmem:[#allocation2 + $0x3c] sm:$0x1]  ;;  %v782_v42 = vor.u32 %v780_v20, %v779_v30  ;;  %v783_v45 = vrot.slane %v779_v30, 4 }
 0x176   : > { %v757_v33 = vsel %vm4785_vm7, %v749_v43, %v756_v23  ;;  %v902_v34 = vsel %vm4777_vm6, %v758_v24, %v901_v13  ;;  %v948_v39 = vsel %vm4777_vm6, 0, %v947_v32  ;;  %v765_v46 = vor.u32 %v763_v26, %v4857_v31  ;;  %v908_v12 = vld [vmem:[#allocation2 + $0x50] sm:$0x1] }
 0x177   : > { %900 = vst [vmem:[#allocation2 + $0x40] sm:$0xf] %v757_v33  ;;  %903 = vst [vmem:[#allocation2 + $0x44] sm:$0x1] %v902_v34  ;;  %v740_v40 = vsel %vm4785_vm7, %v732_v54, %v739_v28  ;;  %v895_v41 = vsel %vm4777_vm6, %v741_v29, %v894_v25  ;;  %v912_v50 = vsel %vm4769_vm4, %v782_v42, %v911_v35  ;;  %v788_v51 = vshll.u32 %v3522_v36, 16 }
 0x178   : > { %949 = vst [vmem:[#allocation2 + $0x3c] sm:$0x1] %v948_v39  ;;  %v944_v43 = vld [vmem:[#allocation2 + $0x30] sm:$0x1]  ;;  %893 = vst [vmem:[#allocation2 + $0x34] sm:$0xf] %v740_v40  ;;  %v3520_v52 = vpack.c.bf16 %v587_v37, %v587_v37  ;;  %v905_v53 = vsel %vm4769_vm4, %v765_v46, %v904_v44  ;;  %v568_v55 = vadd.f32 %v4845_v56, %v4762_v38 }
 0x179   : > { %896 = vst [vmem:[#allocation2 + $0x38] sm:$0x1] %v895_v41  ;;  %v945_v49 = vsel %vm4777_vm6, 0, %v944_v43  ;;  %913 = vst [vmem:[#allocation2 + $0x54] sm:$0xf] %v912_v50  ;;  %v787_v54 = vrot.slane %v785_v47, 7  ;;  %v560_v57 = vadd.f32 %v4762_v38, %v559_v4  ;;  %v571_v62 = vadd.f32 %v3838_v27, %v4762_v38 }
 0x17a   : > { %946 = vst [vmem:[#allocation2 + $0x30] sm:$0x1] %v945_v49  ;;  %v766_v59 = vrot.slane %v4857_v31, 4  ;;  %906 = vst [vmem:[#allocation2 + $0x48] sm:$0xf] %v905_v53  ;;  %v768_v61 = vshrl.u32 %v3520_v52, 16  ;;  %v563_v63 = vadd.f32 %v4762_v38, %v562_v48 }
 0x17b   : > { %v790_v1 = vor.u32 %v788_v51, %v787_v54  ;;  %v792_v2 = vrot.slane %v787_v54, 4  ;;  %v592_v3 = vmax.f32 %v568_v55, 0.0  ;;  %v590_v5 = vmax.f32 %v560_v57, 0.0  ;;  %v925_v27 = vld [vmem:[#allocation2 + $0x6c] sm:$0xf] }
 0x17c   : > { %v770_v6 = vrot.slane %v768_v61, 7  ;;  %v771_v7 = vshll.u32 %v3520_v52, 16  ;;  %v593_v8 = vmax.f32 %v571_v62, 0.0  ;;  %v591_v9 = vmax.f32 %v563_v63, 0.0  ;;  %v918_v35 = vld [vmem:[#allocation2 + $0x60] sm:$0xf] }
 0x17d   : > { %v791_v4 = vsel %vm4785_vm7, %v783_v45, %v790_v1  ;;  %v916_v11 = vsel %vm4777_vm6, %v792_v2, %v915_v60  ;;  %v3525_v13 = vpack.c.bf16 %v592_v3, %v592_v3  ;;  %v3523_v14 = vpack.c.bf16 %v590_v5, %v590_v5  ;;  %v929_v42 = vld [vmem:[#allocation2 + $0x74] sm:$0x1]  ;;  %v922_v55 = vld [vmem:[#allocation2 + $0x68] sm:$0x1] }
 0x17e   : > { %v978_v56 = vld [vmem:[#allocation2 + $0x44] sm:$0x1]  ;;  %914 = vst [vmem:[#allocation2 + $0x58] sm:$0xf] %v791_v4  ;;  %917 = vst [vmem:[#allocation2 + $0x5c] sm:$0x1] %v916_v11  ;;  %v773_v17 = vor.u32 %v771_v7, %v770_v6  ;;  %v3526_v19 = vpack.c.bf16 %v593_v8, %v593_v8  ;;  %v3524_v39 = vpack.c.bf16 %v591_v9, %v591_v9 }
 0x17f   : > { %v979_v38 = vsel %vm4809_vm8, 0, %v978_v56  ;;  %v775_v18 = vrot.slane %v770_v6, 4  ;;  %v811_v21 = vshrl.u32 %v3525_v13, 16  ;;  %v794_v22 = vshrl.u32 %v3523_v14, 16 }
 0x180   : > { %v975_v16 = vld [vmem:[#allocation2 + $0x38] sm:$0x1]  ;;  %980 = vst [vmem:[#allocation2 + $0x44] sm:$0x1] %v979_v38  ;;  %v953_v23 = vld [vmem:[#allocation2 + $0x54] sm:$0x1]  ;;  %v774_v24 = vsel %vm4785_vm7, %v766_v59, %v773_v17 }
 0x181   : > { %v976_v20 = vsel %vm4809_vm8, 0, %v975_v16  ;;  %v909_v25 = vsel %vm4777_vm6, %v775_v18, %v908_v12  ;;  %v814_v26 = vshll.u32 %v3525_v13, 16  ;;  %v819_v28 = vshrl.u32 %v3526_v19, 16  ;;  %v950_v30 = vld [vmem:[#allocation2 + $0x48] sm:$0x1] }
 0x182   : > { %977 = vst [vmem:[#allocation2 + $0x38] sm:$0x1] %v976_v20  ;;  %v954_v29 = vsel %vm4777_vm6, 0, %v953_v23  ;;  %907 = vst [vmem:[#allocation2 + $0x4c] sm:$0xf] %v774_v24  ;;  %v813_v31 = vrot.slane %v811_v21, 7 }
 0x183   : > { %910 = vst [vmem:[#allocation2 + $0x50] sm:$0x1] %v909_v25  ;;  %v796_v32 = vrot.slane %v794_v22, 7  ;;  %v797_v33 = vshll.u32 %v3523_v14, 16  ;;  %955 = vst [vmem:[#allocation2 + $0x54] sm:$0x1] %v954_v29 }
 0x184   : > { %v951_v34 = vsel %vm4777_vm6, 0, %v950_v30  ;;  %v821_v36 = vrot.slane %v819_v28, 7  ;;  %v822_v37 = vshll.u32 %v3526_v19, 16  ;;  %v816_v40 = vor.u32 %v814_v26, %v813_v31 }
 0x185   : > { %952 = vst [vmem:[#allocation2 + $0x48] sm:$0x1] %v951_v34  ;;  %v799_v41 = vor.u32 %v797_v33, %v796_v32  ;;  %v817_v44 = vrot.slane %v813_v31, 4  ;;  %v802_v46 = vshrl.u32 %v3524_v39, 16  ;;  %v984_v47 = vld [vmem:[#allocation2 + $0x5c] sm:$0x1] }
 0x186   : > { %v824_v43 = vor.u32 %v822_v37, %v821_v36  ;;  %v826_v45 = vrot.slane %v821_v36, 4  ;;  %v926_v48 = vsel %vm4769_vm4, %v816_v40, %v925_v27  ;;  %v805_v50 = vshll.u32 %v3524_v39, 16 }
 0x187   : > { %v919_v49 = vsel %vm4769_vm4, %v799_v41, %v918_v35  ;;  %v985_v51 = vsel %vm4809_vm8, 0, %v984_v47  ;;  %927 = vst [vmem:[#allocation2 + $0x6c] sm:$0xf] %v926_v48  ;;  %v804_v54 = vrot.slane %v802_v46, 7  ;;  %v800_v58 = vrot.slane %v796_v32, 4 }
 0x188   : > { %920 = vst [vmem:[#allocation2 + $0x60] sm:$0xf] %v919_v49  ;;  %v825_v52 = vsel %vm4785_vm7, %v817_v44, %v824_v43  ;;  %v930_v53 = vsel %vm4777_vm6, %v826_v45, %v929_v42  ;;  %986 = vst [vmem:[#allocation2 + $0x5c] sm:$0x1] %v985_v51 }
 0x189   : > { %928 = vst [vmem:[#allocation2 + $0x70] sm:$0xf] %v825_v52  ;;  %931 = vst [vmem:[#allocation2 + $0x74] sm:$0x1] %v930_v53  ;;  %v807_v59 = vor.u32 %v805_v50, %v804_v54  ;;  %v809_v60 = vrot.slane %v804_v54, 4 }
 0x18a   : > { %v981_v57 = vld [vmem:[#allocation2 + $0x50] sm:$0x1] }
 0x18b   : > { %v982_v61 = vsel %vm4809_vm8, 0, %v981_v57  ;;  %v808_v62 = vsel %vm4785_vm7, %v800_v58, %v807_v59  ;;  %v923_v63 = vsel %vm4777_vm6, %v809_v60, %v922_v55 }
 0x18c   : > { %983 = vst [vmem:[#allocation2 + $0x50] sm:$0x1] %v982_v61  ;;  %921 = vst [vmem:[#allocation2 + $0x64] sm:$0xf] %v808_v62 }
 0x18d   : > { %924 = vst [vmem:[#allocation2 + $0x68] sm:$0x1] %v923_v63 }
 0x18e   : > { %v959_v1 = vld [vmem:[#allocation2 + $0x6c] sm:$0x1] }
 0x18f   : > { %v956_v2 = vld [vmem:[#allocation2 + $0x60] sm:$0x1]  ;;  %v960_v3 = vsel %vm4777_vm6, 0, %v959_v1 }
 0x190   : > { %v957_v5 = vsel %vm4777_vm6, 0, %v956_v2  ;;  %v990_v6 = vld [vmem:[#allocation2 + $0x74] sm:$0x1]  ;;  %961 = vst [vmem:[#allocation2 + $0x6c] sm:$0x1] %v960_v3 }
 0x191   : > { %958 = vst [vmem:[#allocation2 + $0x60] sm:$0x1] %v957_v5  ;;  %v991_v15 = vsel %vm4809_vm8, 0, %v990_v6 }
 0x192   : > { %992 = vst [vmem:[#allocation2 + $0x74] sm:$0x1] %v991_v15  ;;  %996 = sbr.rel (%p3349_p11) target bundleno = 410 (0x19a), region = 68 }
 0x194   : > { %v987_v7 = vld [vmem:[#allocation2 + $0x68] sm:$0x1] }
 0x195   : > { %v988_v8 = vsel %vm4809_vm8, 0, %v987_v7 }
 0x196   : > { %989 = vst [vmem:[#allocation2 + $0x68] sm:$0x1] %v988_v8 }
 0x197   : > { %v4507_v9 = vmov 0  }
 0x198   : > { %997 = vst [vmem:[#allocation2] sm:$0xf] %v4507_v9  ;;  %998 = vst [vmem:[#allocation2 + $0x4] sm:$0xf] %v4507_v9 }
 0x199   : > { %999 = vst [vmem:[#allocation2 + $0x8] sm:$0x1] %v4507_v9 }
 0x19a PF: > { %p3350_p5 = scmp.ne.s32.totalorder %s4481_s30, 1 }
 0x19c   : > { %1003 = sbr.rel (%p3350_p5) target bundleno = 420 (0x1a4), region = 72 }
 0x1a1   : > { %v4508_v10 = vmov 0  }
 0x1a2   : > { %1005 = vst [vmem:[#allocation2 + $0x6c] sm:$0xf] %v4508_v10  ;;  %1006 = vst [vmem:[#allocation2 + $0x70] sm:$0xf] %v4508_v10 }
 0x1a3   : > { %1007 = vst [vmem:[#allocation2 + $0x74] sm:$0x1] %v4508_v10 }
 0x1a4 PF: > { %v4135_v0 = vld [vmem:[#allocation8 + $0x138] sm:$0xff]   ;;  %v4138_v11 = vld [vmem:[#allocation8 + $0x130] sm:$0xff]   ;;  %v4141_v14 = vld [vmem:[#allocation8 + $0x128] sm:$0xff]   ;;  %vm1209_vm9 = vcmask 1046528   ;;  %vm1104_vm10 = vsmask.f32 7424 }
 0x1a5   : > { %v4136_v56 = vld [vmem:[#allocation8 + $0xf8] sm:$0xff]   ;;  %3547 = vmatprep.subr.bf16.mxu1 %v4135_v0  ;;  %v4139_v12 = vld [vmem:[#allocation8 + $0xf0] sm:$0xff]   ;;  %v4142_v38 = vld [vmem:[#allocation8 + $0xe8] sm:$0xff]   ;;  %s5554_s7 = sld [smem:[#allocation17_spill]]  ;;  %s3528_s17 = sshll.u32 %s4481_s30, 4 }
 0x1a6   : > { %v4137_v4 = vld [vmem:[#allocation8 + $0x178] sm:$0xff]   ;;  %3548 = vmatpush3.bf16.msra.mxu1 %v4136_v56  ;;  %v4140_v13 = vld [vmem:[#allocation8 + $0x170] sm:$0xff]   ;;  %v4143_v16 = vld [vmem:[#allocation8 + $0x168] sm:$0xff]   ;;  %s5555_s30 = sld [smem:[#allocation19_spill]]  ;;  %s3183_s15 = sshll.u32 %s4923_s24, 4  ;;  %s5435_s15 = int_to_ptr.vmem [resolvable:$true] %s3183_s15 }
 0x1a7   : > { %3839 = vmatprep.subr.bf16.mxu0 %v4137_v4  ;;  %3549 = vmatprep.subr.bf16.mxu1 %v4138_v11  ;;  %v4144_v17 = vld [vmem:[#allocation8 + $0x120] sm:$0xff]   ;;  %v4147_v20 = vld [vmem:[#allocation8 + $0x118] sm:$0xff]   ;;  %v4150_v23 = vld [vmem:[#allocation8 + $0x110] sm:$0xff]   ;;  %s5556_s16 = sld [smem:[#allocation26_spill]]  ;;  %s4369_s27 = scalar_lea.vmem %s5435_s15, 2048 }
 0x1a8   : > { %3840 = vmatpush3.bf16.msra.mxu0 %v4137_v4  ;;  %v4145_v18 = vld [vmem:[#allocation8 + $0xe0] sm:$0xff]   ;;  %v4149_v21 = vld [vmem:[#allocation8 + $0x158] sm:$0xff]   ;;  %v4152_v24 = vld [vmem:[#allocation8 + $0x150] sm:$0xff]   ;;  %p4370_p8 = scmp.ne.s32.totalorder %s5435_s15, %s4369_s27  ;;  %s4509_s12 = smov [#allocation11]  }
 0x1a9   : > { %3841 = vmatprep.subr.bf16.mxu0 %v4140_v13  ;;  %v4146_v19 = vld [vmem:[#allocation8 + $0x160] sm:$0xff]   ;;  %v4148_v22 = vld [vmem:[#allocation8 + $0xd8] sm:$0xff]   ;;  %v4151_v25 = vld [vmem:[#allocation8 + $0xd0] sm:$0xff]   ;;  %s4373_s22 = sshll.u32 %s4509_s12, 4  ;;  %s4374_s22 = int_to_ptr.vmem [resolvable:$false] %s4373_s22 }
 0x1aa   : > { %3550 = vmatpush3.bf16.msra.mxu1 %v4139_v12  ;;  %v4153_v26 = vld [vmem:[#allocation8 + $0x108] sm:$0xff]   ;;  %v4156_v29 = vld [vmem:[#allocation8 + $0x100] sm:$0xff]   ;;  %v4159_v32 = vld [vmem:[#allocation2 + $0xc] sm:$0xff]   ;;  %s4375_s1 = scalar_lea.vmem %s4374_s22, 4096  ;;  %p4376_p2 = scmp.lt.s32.totalorder %s5435_s15, %s4374_s22 }
 0x1ab   : > { %3551 = vmatprep.subr.bf16.mxu1 %v4141_v14  ;;  %v4154_v27 = vld [vmem:[#allocation8 + $0xc8] sm:$0xff]   ;;  %v4158_v30 = vld [vmem:[#allocation8 + $0x140] sm:$0xff]   ;;  %v4160_v33 = vld [vmem:[#allocation2 + $0x14] ss:$0 sps:$4 sm:$0x11]   ;;  %v1388_v34 = vshrl.u32 %v4159_v32, 16  ;;  %p4377_p1 = scmp.lt.s32.totalorder %s4375_s1, %s4369_s27 }
 0x1ac   : > { %3842 = vmatpush3.bf16.msra.mxu0 %v4140_v13  ;;  %v4155_v28 = vld [vmem:[#allocation8 + $0x148] sm:$0xff]   ;;  %v4157_v31 = vld [vmem:[#allocation8 + $0xc0] sm:$0xff]   ;;  %v1390_v35 = vshll.u32 %v4159_v32, 16  ;;  %v1395_v36 = vshll.u32 %v4160_v33, 16  ;;  %v1491_v37 = vrot.slane %v4159_v32, 1  ;;  %v4161_v39 = vld [vmem:[#allocation8 + $0x78] sm:$0xff]  }
 0x1ad   : > { %3843 = vmatprep.subr.bf16.mxu0 %v4143_v16  ;;  %v1492_v40 = vrot.slane %v4160_v33, 1  ;;  %v4163_v43 = vld [vmem:[#allocation2 + $0x18] sm:$0xff]   ;;  %v4164_v45 = vld [vmem:[#allocation2 + $0x20] ss:$0 sps:$4 sm:$0x11]   ;;  %v4162_v47 = vld [vmem:[#allocation8 + $0x38] sm:$0xff]   ;;  %p4378_p3 = por %p4377_p1, %p4376_p2 }
 0x1ae   : > { %3552 = vmatpush3.bf16.msra.mxu1 %v4142_v38  ;;  %v1392_v41 = vrot.slane %v1390_v35, 1  ;;  %v1397_v42 = vrot.slane %v1395_v36, 1  ;;  %v1494_v48 = vrot.slane %v4163_v43, 1  ;;  %v1495_v49 = vrot.slane %v4164_v45, 1  ;;  %v4165_v54 = vld [vmem:[#allocation8 + $0x70] sm:$0xff]   ;;  %v4169_v5 = vld [vmem:[#allocation8 + $0x68] sm:$0xff]  }
 0x1af   : > { %3553 = vmatprep.subr.bf16.mxu1 %v4144_v17  ;;  %v1493_v44 = vsel %vm1209_vm9, %v1491_v37, %v1492_v40  ;;  %v1400_v50 = vshrl.u32 %v4163_v43, 16  ;;  %v1402_v51 = vshll.u32 %v4163_v43, 16  ;;  %v1407_v53 = vshll.u32 %v4164_v45, 16  ;;  %v4930_v58 = vld [vmem:[#allocation2 + $0x24] sm:$0xff]   ;;  %v4935_v15 = vld [vmem:[#allocation2 + $0x30] sm:$0xff]   ;;  %v4173_v14 = vld [vmem:[#allocation8 + $0x60] sm:$0xff]  }
 0x1b0   : > { %3844 = vmatpush3.bf16.msra.mxu0 %v4143_v16  ;;  %v1393_v46 = vor.u32 %v1392_v41, %v1388_v34  ;;  %3855 = vmatprep.mubr.bf16.mxu0 %v1493_v44  ;;  %v1496_v55 = vsel %vm1209_vm9, %v1494_v48, %v1495_v49  ;;  %v4168_v60 = vld [vmem:[#allocation2 + $0x2c] ss:$0 sps:$4 sm:$0x11]   ;;  %v1412_v63 = vshrl.u32 %v4930_v58, 16  ;;  %v1414_v1 = vshll.u32 %v4930_v58, 16  ;;  %v4170_v9 = vld [vmem:[#allocation8 + $0x28] sm:$0xff]  }
 0x1b1   : > { %3845 = vmatprep.subr.bf16.mxu0 %v4146_v19  ;;  %v1404_v57 = vrot.slane %v1402_v51, 1  ;;  %v1409_v59 = vrot.slane %v1407_v53, 1  ;;  %v4166_v62 = vld [vmem:[#allocation8 + $0x30] sm:$0xff]   ;;  %v1497_v2 = vrot.slane %v4930_v58, 1  ;;  %v1419_v3 = vshll.u32 %v4168_v60, 16  ;;  %v4180_v35 = vld [vmem:[#allocation8 + $0x18] sm:$0xff]  }
 0x1b2   : > { %3554 = vmatpush3.bf16.msra.mxu1 %v4145_v18  ;;  %v1398_v52 = vsel %vm1104_vm10, %v1393_v46, %v1397_v42  ;;  %v1498_v6 = vrot.slane %v4168_v60, 1  ;;  %v1416_v8 = vrot.slane %v1414_v1, 1  ;;  %v4172_v56 = vld [vmem:[#allocation2 + $0x38] ss:$0 sps:$4 sm:$0x11]   ;;  %v1500_v11 = vrot.slane %v4935_v15, 1 }
 0x1b3   : > { %3555 = vmatprep.subr.bf16.mxu1 %v4147_v20  ;;  %1748 = vmatprep.mubr.bf16.mxu1 %v1398_v52  ;;  %v1405_v61 = vor.u32 %v1404_v57, %v1400_v50  ;;  %v1421_v10 = vrot.slane %v1419_v3, 1  ;;  %v1424_v12 = vshrl.u32 %v4935_v15, 16  ;;  %v1426_v13 = vshll.u32 %v4935_v15, 16  ;;  %v4175_v20 = vld [vmem:[#allocation8 + $0xb8] sm:$0xff]   ;;  %v4951_v37 = vld [vmem:[#allocation2 + $0x48] sm:$0xff]   ;;  %v4183_v40 = vld [vmem:[#allocation8 + $0xa8] sm:$0xff]  }
 0x1b4   : > { %3846 = vmatpush3.bf16.msra.mxu0 %v4146_v19  ;;  %v1499_v0 = vsel %vm1209_vm9, %v1497_v2, %v1498_v6  ;;  %v1417_v4 = vor.u32 %v1416_v8, %v1412_v63  ;;  %v1501_v38 = vrot.slane %v4172_v56, 1  ;;  %v1431_v16 = vshll.u32 %v4172_v56, 16  ;;  %v4174_v19 = vld [vmem:[#allocation8 + $0x20] sm:$0xff]   ;;  %v4185_v48 = vld [vmem:[#allocation8 + $0x50] sm:$0xff]   ;;  %v4192_v2 = vld [vmem:[#allocation8 + $0x8] sm:$0xff]   ;;  %s3502_s13 = sshll.u32 %s5554_s7, 5 }
 0x1b5   : > { %3847 = vmatprep.subr.bf16.mxu0 %v4149_v21  ;;  %v1410_v7 = vsel %vm1104_vm10, %v1405_v61, %v1409_v59  ;;  %v1428_v18 = vrot.slane %v1426_v13, 1  ;;  %v1506_v42 = vrot.slane %v4951_v37, 1  ;;  %v4184_v45 = vld [vmem:[#allocation8 + $0xa0] sm:$0xff]   ;;  %v1450_v46 = vshll.u32 %v4951_v37, 16  ;;  %v4186_v51 = vld [vmem:[#allocation8 + $0x10] sm:$0xff]   ;;  %v4965_v6 = vld [vmem:[#allocation2 + $0x60] sm:$0xff]   ;;  %s3180_s20 = sadd.s32 %s3528_s17, %s3502_s13 }
 0x1b6   : > { %3556 = vmatpush3.bf16.msra.mxu1 %v4148_v22  ;;  %v1422_v17 = vsel %vm1104_vm10, %v1417_v4, %v1421_v10  ;;  %v1433_v22 = vrot.slane %v1431_v16, 1  ;;  %v1448_v49 = vshrl.u32 %v4951_v37, 16  ;;  %v4190_v57 = vld [vmem:[#allocation2 + $0x5c] ss:$0 sps:$4 sm:$0x11]   ;;  %v4188_v60 = vld [vmem:[#allocation8 + $0x90] sm:$0xff]  }
 0x1b7   : > { %3557 = vmatprep.subr.bf16.mxu1 %v4150_v23  ;;  %v4176_v23 = vld [vmem:[#allocation8 + $0xb0] sm:$0xff]   ;;  %v1452_v53 = vrot.slane %v1450_v46, 1  ;;  %v1510_v1 = vrot.slane %v4190_v57, 1  ;;  %v1467_v3 = vshll.u32 %v4190_v57, 16  ;;  %v1512_v10 = vrot.slane %v4965_v6, 1  ;;  %v4195_v56 = vld [vmem:[#allocation8 + $0x88] sm:$0xff]  }
 0x1b8   : > { %3848 = vmatpush3.bf16.msra.mxu0 %v4149_v21  ;;  %v1502_v21 = vsel %vm1209_vm9, %v1500_v11, %v1501_v38  ;;  %v1474_v11 = vshll.u32 %v4965_v6, 16  ;;  %v4196_v13 = vld [vmem:[#allocation8 + $0x80] sm:$0xff]   ;;  %v4997_v46 = vld [vmem:[#allocation2 + $0x24] sm:$0xff]   ;;  %s3503_s23 = sshll.u32 %s3180_s20, 7  ;;  %p5557_p10 = scmp.ne.s32.totalorder %s5555_s30, 0 }
 0x1b9   : > { %3849 = vmatprep.subr.bf16.mxu0 %v4152_v24  ;;  %v1453_v63 = vor.u32 %v1452_v53, %v1448_v49  ;;  %v1469_v4 = vrot.slane %v1467_v3, 1  ;;  %v4197_v38 = vld [vmem:[#allocation8 + $0x40] sm:$0xff]   ;;  %s5433_s14 = scalar_lea.hbm %s5556_s16, %s3503_s23 }
 0x1ba   : > { %3558 = vmatpush3.bf16.msra.mxu1 %v4151_v25  ;;  %v4944_v25 = vld [vmem:[#allocation2 + $0x3c] sm:$0xff]   ;;  %v1476_v16 = vrot.slane %v1474_v11, 1  ;;  %v5013_v3 = vld [vmem:[#allocation2 + $0x38] ss:$0 sps:$4 sm:$0x11]   ;;  %p4371_p9 = pnand %p4370_p8, %p5557_p10 }
 0x1bb   : > { %3559 = vmatprep.subr.bf16.mxu1 %v4153_v26  ;;  %v4178_v26 = vld [vmem:[#allocation2 + $0x44] ss:$0 sps:$4 sm:$0x11]  }
 0x1bc   : > { %3850 = vmatpush3.bf16.msra.mxu0 %v4152_v24  ;;  %v1429_v24 = vor.u32 %v1428_v18, %v1424_v12  ;;  %v4198_v18 = vld [vmem:[#allocation8] sm:$0xff]   ;;  %p4372_p12 = pneg %p4371_p9 }
 0x1bd   : > { %3851 = vmatprep.subr.bf16.mxu0 %v4155_v28 }
 0x1be   : > { %3560 = vmatpush3.bf16.msra.mxu1 %v4154_v27  ;;  %v4179_v27 = vld [vmem:[#allocation8 + $0x58] sm:$0xff]   ;;  %v1434_v33 = vsel %vm1104_vm10, %v1429_v24, %v1433_v22  ;;  %p4379_p7 = pnand %p4378_p3, %p4372_p12 }
 0x1bf   : > { %3561 = vmatprep.subr.bf16.mxu1 %v4156_v29  ;;  %v1438_v29 = vshll.u32 %v4944_v25, 16  ;;  %v4979_v24 = vld [vmem:[#allocation2 + $0x14] ss:$0 sps:$4 sm:$0x11]  }
 0x1c0   : > { %3852 = vmatpush3.bf16.msra.mxu0 %v4155_v28  ;;  %v1436_v28 = vshrl.u32 %v4944_v25, 16 }
 0x1c1   : > { %3853 = vmatprep.subr.bf16.mxu0 %v4158_v30  ;;  %v1440_v34 = vrot.slane %v1438_v29, 1  ;;  %v1214_v29 = vrot.slane %v4979_v24, 1 }
 0x1c2   : > { %3562 = vmatpush3.bf16.msra.mxu1 %v4157_v31  ;;  %v1443_v31 = vshll.u32 %v4178_v26, 16 }
 0x1c3   : > { %3627 = vmatprep.subr.bf16.mxu1 %v4161_v39  ;;  %v4182_v39 = vld [vmem:[#allocation2 + $0x50] ss:$0 sps:$4 sm:$0x11]  }
 0x1c4   : > { %3854 = vmatpush3.bf16.msra.mxu0 %v4158_v30  ;;  %v1503_v30 = vrot.slane %v4944_v25, 1  ;;  %v1445_v41 = vrot.slane %v1443_v31, 1  ;;  %v1507_v44 = vrot.slane %v4182_v39, 1  ;;  %v1455_v50 = vshll.u32 %v4182_v39, 16 }
 0x1c5   : > { %1749 = vmatmul.mubr.bf16.vlgmr.msra.gmra.mxu1 %v4159_v32  ;;  %3871 = vmatprep.subr.bf16.mxu0 %v4175_v20  ;;  %v1504_v32 = vrot.slane %v4178_v26, 1  ;;  %v4203_v26 = vld [vmem:[#allocation8 + $0x1f8] sm:$0xff]  }
 0x1c6   : > { %3628 = vmatpush3.bf16.msra.mxu1 %v4162_v47  ;;  %1756 = vmatprep.mubr.bf16.mxu1 %v1410_v7  ;;  %v1508_v47 = vsel %vm1209_vm9, %v1506_v42, %v1507_v44  ;;  %v1457_v59 = vrot.slane %v1455_v50, 1  ;;  %v4989_v42 = vld [vmem:[#allocation8 + $0x238] sm:$0xff]   ;;  %v4991_v44 = vld [vmem:[#allocation2 + $0x18] sm:$0xff]   ;;  %v4212_v50 = vld [vmem:[#allocation8 + $0x1e8] sm:$0xff]  }
 0x1c7   : > { %3856 = vmatmul.mubr.bf16.vlgmr.msra.gmra.mxu0 %v1496_v55  ;;  %3629 = vmatprep.subr.bf16.mxu1 %v4165_v54  ;;  %v1505_v36 = vsel %vm1209_vm9, %v1503_v30, %v1504_v32  ;;  %v4187_v54 = vld [vmem:[#allocation8 + $0x98] sm:$0xff]  }
 0x1c8   : > { %3859 = vmatprep.mubr.bf16.mxu0 %v1499_v0  ;;  %3872 = vmatpush3.bf16.msra.mxu0 %v4175_v20  ;;  %v4959_v55 = vld [vmem:[#allocation2 + $0x54] sm:$0xff]   ;;  %v1458_v8 = vsel %vm1104_vm10, %v1453_v63, %v1457_v59 }
 0x1c9   : > { %3873 = vmatprep.subr.bf16.mxu0 %v4176_v23  ;;  %v1462_v61 = vshll.u32 %v4959_v55, 16  ;;  %v1460_v7 = vshrl.u32 %v4959_v55, 16  ;;  %v4204_v32 = vld [vmem:[#allocation8 + $0x1b8] sm:$0xff]   ;;  %v4214_v59 = vld [vmem:[#allocation8 + $0x1e0] sm:$0xff]  }
 0x1ca   : > { %3630 = vmatpush3.bf16.msra.mxu1 %v4166_v62  ;;  %v1509_v62 = vrot.slane %v4959_v55, 1 }
 0x1cb   : > { %3631 = vmatprep.subr.bf16.mxu1 %v4169_v5 }
 0x1cc   : > { %3874 = vmatpush3.bf16.msra.mxu0 %v4176_v23  ;;  %v1511_v5 = vsel %vm1209_vm9, %v1509_v62, %v1510_v1  ;;  %v4977_v23 = vld [vmem:[#allocation2 + $0xc] sm:$0xff]   ;;  %v1125_v1 = vshll.u32 %v4979_v24, 16 }
 0x1cd   : > { %1757 = vmatmul.mubr.bf16.gmra.mxu1 %v4163_v43  ;;  %v1441_v43 = vor.u32 %v1440_v34, %v1436_v28  ;;  %3875 = vmatprep.subr.bf16.mxu0 %v4183_v40  ;;  %v1213_v28 = vrot.slane %v4977_v23, 1 }
 0x1ce   : > { %1764 = vmatprep.mubr.bf16.mxu1 %v1422_v17  ;;  %3632 = vmatpush3.bf16.msra.mxu1 %v4170_v9  ;;  %v1464_v9 = vrot.slane %v1462_v61, 1  ;;  %v1120_v61 = vshll.u32 %v4977_v23, 16 }
 0x1cf   : > { %3860 = vmatmul.mubr.bf16.gmra.mxu0 %v1502_v21  ;;  %3633 = vmatprep.subr.bf16.mxu1 %v4173_v14  ;;  %v1446_v52 = vsel %vm1104_vm10, %v1441_v43, %v1445_v41  ;;  %v1472_v14 = vshrl.u32 %v4965_v6, 16  ;;  %v4200_v21 = vld [vmem:[#allocation2 + $0x8] ss:$0 sps:$4 sm:$0x11]  }
 0x1d0   : > { %3863 = vmatprep.mubr.bf16.mxu0 %v1505_v36  ;;  %3876 = vmatpush3.bf16.msra.mxu0 %v4183_v40  ;;  %v1465_v20 = vor.u32 %v1464_v9, %v1460_v7  ;;  %v1215_v36 = vsel %vm1209_vm9, %v1213_v28, %v1214_v29  ;;  %v1113_v41 = vshll.u32 %v4200_v21, 16  ;;  %v4994_v43 = vld [vmem:[#allocation2 + $0x20] ss:$0 sps:$4 sm:$0x11]   ;;  %v1122_v63 = vrot.slane %v1120_v61, 1  ;;  %v4237_v61 = vld [vmem:[#allocation8 + $0x218] sm:$0xff]  }
 0x1d1   : > { %3877 = vmatprep.subr.bf16.mxu0 %v4184_v45  ;;  %v1477_v39 = vor.u32 %v1476_v16, %v1472_v14  ;;  %v1217_v49 = vrot.slane %v4994_v43, 1  ;;  %v5017_v7 = vld [vmem:[#allocation2 + $0x3c] sm:$0xff]   ;;  %v1223_v9 = vrot.slane %v5013_v3, 1  ;;  %v1130_v16 = vshrl.u32 %v4991_v44, 16 }
 0x1d2   : > { %3634 = vmatpush3.bf16.msra.mxu1 %v4174_v19  ;;  %v4974_v19 = vld [vmem:[#allocation2] sm:$0xff]   ;;  %v1115_v53 = vrot.slane %v1113_v41, 1  ;;  %v5038_v28 = vld [vmem:[#allocation2 + $0x5c] ss:$0 sps:$4 sm:$0x11]   ;;  %v1144_v41 = vshll.u32 %v4997_v46, 16 }
 0x1d3   : > { %3635 = vmatprep.subr.bf16.mxu1 %v4179_v27  ;;  %v1210_v22 = vrot.slane %v4974_v19, 1  ;;  %v1470_v27 = vsel %vm1104_vm10, %v1465_v20, %v1469_v4  ;;  %v1106_v34 = vshrl.u32 %v4974_v19, 16  ;;  %v1127_v4 = vrot.slane %v1125_v1, 1  ;;  %v4225_v29 = vld [vmem:[#allocation8 + $0x228] sm:$0xff]  }
 0x1d4   : > { %3878 = vmatpush3.bf16.msra.mxu0 %v4184_v45  ;;  %v1216_v45 = vrot.slane %v4991_v44, 1  ;;  %v1137_v20 = vshll.u32 %v4994_v43, 16  ;;  %v4233_v43 = vld [vmem:[#allocation8 + $0x180] sm:$0xff]   ;;  %v5062_v1 = vld [vmem:[#allocation2 + $0x2c] ss:$0 sps:$4 sm:$0x11]  }
 0x1d5   : > { %1765 = vmatmul.mubr.bf16.gmra.mxu1 %v4930_v58  ;;  %v4191_v58 = vld [vmem:[#allocation8 + $0x48] sm:$0xff]   ;;  %3879 = vmatprep.subr.bf16.mxu0 %v4187_v54 }
 0x1d6   : > { %1772 = vmatprep.mubr.bf16.mxu1 %v1434_v33  ;;  %3636 = vmatpush3.bf16.msra.mxu1 %v4180_v35  ;;  %v4205_v33 = vld [vmem:[#allocation8 + $0x1f0] sm:$0xff]   ;;  %v1108_v35 = vshll.u32 %v4974_v19, 16 }
 0x1d7   : > { %3864 = vmatmul.mubr.bf16.gmra.mxu0 %v1508_v47  ;;  %3637 = vmatprep.subr.bf16.mxu1 %v4185_v48  ;;  %v4999_v47 = vld [vmem:[#allocation2 + $0x2c] ss:$0 sps:$4 sm:$0x11]  }
 0x1d8   : > { %3880 = vmatpush3.bf16.msra.mxu0 %v4187_v54  ;;  %3867 = vmatprep.mubr.bf16.mxu0 %v1511_v5  ;;  %v1110_v40 = vrot.slane %v1108_v35, 1  ;;  %v1218_v54 = vsel %vm1209_vm9, %v1216_v45, %v1217_v49  ;;  %v1139_v35 = vrot.slane %v1137_v20, 1  ;;  %v5050_v45 = vld [vmem:[#allocation2 + $0x18] sm:$0xff]   ;;  %v1146_v49 = vrot.slane %v1144_v41, 1 }
 0x1d9   : > { %3881 = vmatprep.subr.bf16.mxu0 %v4188_v60 }
 0x1da   : > { %3638 = vmatpush3.bf16.msra.mxu1 %v4186_v51  ;;  %v1219_v51 = vrot.slane %v4997_v46, 1  ;;  %v1111_v62 = vor.u32 %v1110_v40, %v1106_v34  ;;  %v4232_v40 = vld [vmem:[#allocation8 + $0x1c0] sm:$0xff]  }
 0x1db   : > { %3639 = vmatprep.subr.bf16.mxu1 %v4191_v58  ;;  %v4213_v58 = vld [vmem:[#allocation8 + $0x1a8] sm:$0xff]  }
 0x1dc   : > { %3882 = vmatpush3.bf16.msra.mxu0 %v4188_v60  ;;  %v1118_v60 = vshrl.u32 %v4977_v23, 16 }
 0x1dd   : > { %1773 = vmatmul.mubr.bf16.gmra.mxu1 %v4935_v15  ;;  %v4194_v15 = vld [vmem:[#allocation2 + $0x68] ss:$0 sps:$4 sm:$0x11]   ;;  %3883 = vmatprep.subr.bf16.mxu0 %v4195_v56 }
 0x1de   : > { %1780 = vmatprep.mubr.bf16.mxu1 %v1446_v52  ;;  %3640 = vmatpush3.bf16.msra.mxu1 %v4192_v2  ;;  %v1513_v0 = vrot.slane %v4194_v15, 1  ;;  %v1479_v17 = vshll.u32 %v4194_v15, 16  ;;  %v1220_v52 = vrot.slane %v4999_v47, 1  ;;  %v5011_v2 = vld [vmem:[#allocation2 + $0x30] sm:$0xff]   ;;  %v1116_v15 = vsel %vm1104_vm10, %v1111_v62, %v1115_v53 }
 0x1df   : > { %3641 = vmatprep.subr.bf16.mxu1 %v4197_v38  ;;  %v1222_v5 = vrot.slane %v5011_v2, 1  ;;  %v4223_v38 = vld [vmem:[#allocation8 + $0x1d0] sm:$0xff]   ;;  %v2348_v53 = vshll.u32 %v5050_v45, 16 }
 0x1e0   : > { %v1514_v12 = vsel %vm1209_vm9, %v1512_v10, %v1513_v0  ;;  %3884 = vmatpush3.bf16.msra.mxu0 %v4195_v56  ;;  %v1481_v30 = vrot.slane %v1479_v17, 1  ;;  %v1221_v57 = vsel %vm1209_vm9, %v1219_v51, %v1220_v52  ;;  %v4221_v10 = vld [vmem:[#allocation8 + $0x1d8] sm:$0xff]   ;;  %v1225_v0 = vrot.slane %v5017_v7, 1  ;;  %v4216_v17 = vld [vmem:[#allocation8 + $0x230] sm:$0xff]  }
 0x1e1   : > { %3868 = vmatmul.mubr.bf16.gmra.mxu0 %v1514_v12  ;;  %3885 = vmatprep.subr.bf16.mxu0 %v4196_v13  ;;  %v1224_v11 = vsel %vm1209_vm9, %v1222_v5, %v1223_v9  ;;  %v4222_v12 = vld [vmem:[#allocation8 + $0x198] sm:$0xff]   ;;  %v5053_v51 = vld [vmem:[#allocation2 + $0x20] ss:$0 sps:$4 sm:$0x11]   ;;  %v2346_v52 = vshrl.u32 %v5050_v45, 16  ;;  %v1154_v5 = vshrl.u32 %v5011_v2, 16 }
 0x1e2   : > { %3642 = vmatpush3.bf16.msra.mxu1 %v4198_v18  ;;  %v1482_v48 = vsel %vm1104_vm10, %v1477_v39, %v1481_v30  ;;  %v4231_v39 = vld [vmem:[#allocation8 + $0x188] sm:$0xff]   ;;  %v1161_v9 = vshll.u32 %v5013_v3, 16 }
 0x1e3   : > { %3903 = vmatprep.subr.bf16.mxu1 %v4989_v42 }
 0x1e4   : > { %3886 = vmatpush3.bf16.msra.mxu0 %v4196_v13  ;;  %v1123_v13 = vor.u32 %v1122_v63, %v1118_v60  ;;  %v1156_v60 = vshll.u32 %v5011_v2, 16 }
 0x1e5   : > { %1781 = vmatmul.mubr.bf16.gmra.mxu1 %v4944_v25  ;;  %v1211_v25 = vrot.slane %v4200_v21, 1  ;;  %3707 = vmatprep.subr.bf16.mxu0 %v4203_v26  ;;  %v4224_v21 = vld [vmem:[#allocation8 + $0x190] sm:$0xff]  }
 0x1e6   : > { %1788 = vmatprep.mubr.bf16.mxu1 %v1458_v8  ;;  %v5019_v8 = vld [vmem:[#allocation2 + $0x44] ss:$0 sps:$4 sm:$0x11]   ;;  %v1128_v24 = vsel %vm1104_vm10, %v1123_v13, %v1127_v4 }
 0x1e7   : > { %v1212_v31 = vsel %vm1209_vm9, %v1210_v22, %v1211_v25  ;;  %v1226_v56 = vrot.slane %v5019_v8, 1  ;;  %v5030_v22 = vld [vmem:[#allocation2 + $0x48] sm:$0xff]   ;;  %v5033_v25 = vld [vmem:[#allocation2 + $0x50] ss:$0 sps:$4 sm:$0x11]   ;;  %v1173_v41 = vshll.u32 %v5019_v8, 16 }
 0x1e8   : > { %3887 = vmatprep.mubr.bf16.mxu0 %v1212_v31  ;;  %v1228_v26 = vrot.slane %v5030_v22, 1  ;;  %v1229_v30 = vrot.slane %v5033_v25, 1  ;;  %v4230_v31 = vld [vmem:[#allocation8 + $0x1c8] sm:$0xff]   ;;  %v1180_v8 = vshll.u32 %v5030_v22, 16 }
 0x1e9   : > { %3888 = vmatmul.mubr.bf16.vlgmr.msra.gmra.mxu0 %v1215_v36  ;;  %v1227_v14 = vsel %vm1209_vm9, %v1225_v0, %v1226_v56  ;;  %v2365_v0 = vshll.u32 %v5062_v1, 16  ;;  %v5070_v56 = vld [vmem:[#allocation2 + $0x30] sm:$0xff]  }
 0x1ea   : > { %3708 = vmatpush3.bf16.msra.mxu0 %v4204_v32  ;;  %3891 = vmatprep.mubr.bf16.mxu0 %v1218_v54  ;;  %v1230_v36 = vsel %vm1209_vm9, %v1228_v26, %v1229_v30  ;;  %v2350_v54 = vrot.slane %v2348_v53, 1  ;;  %v2372_v3 = vshll.u32 %v5070_v56, 16  ;;  %v1163_v26 = vrot.slane %v1161_v9, 1 }
 0x1eb   : > { %3709 = vmatprep.subr.bf16.mxu0 %v4205_v33  ;;  %v1232_v33 = vrot.slane %v5038_v28, 1  ;;  %v1175_v53 = vrot.slane %v1173_v41, 1 }
 0x1ec   : > { %v2351_v62 = vor.u32 %v2350_v54, %v2346_v52 }
 0x1ed   : > { %1789 = vmatmul.mubr.bf16.gmra.mxu1 %v4951_v37  ;;  %v4206_v37 = vld [vmem:[#allocation8 + $0x1b0] sm:$0xff]  }
 0x1ee   : > { %1796 = vmatprep.mubr.bf16.mxu1 %v1470_v27  ;;  %3710 = vmatpush3.bf16.msra.mxu0 %v4206_v37  ;;  %v5036_v27 = vld [vmem:[#allocation2 + $0x54] sm:$0xff]   ;;  %v1149_v37 = vshll.u32 %v4999_v47, 16 }
 0x1ef   : > { %3711 = vmatprep.subr.bf16.mxu0 %v4212_v50  ;;  %v1231_v32 = vrot.slane %v5036_v27, 1  ;;  %v4234_v50 = vld [vmem:[#allocation8 + $0x220] sm:$0xff]  }
 0x1f0   : > { %v1151_v47 = vrot.slane %v1149_v37, 1  ;;  %v5094_v37 = vld [vmem:[#allocation2 + $0x48] sm:$0xff]  }
 0x1f1   : > { %3892 = vmatmul.mubr.bf16.gmra.mxu0 %v1221_v57  ;;  %v2353_v57 = vshll.u32 %v5053_v51, 16 }
 0x1f2   : > { %3712 = vmatpush3.bf16.msra.mxu0 %v4213_v58  ;;  %3895 = vmatprep.mubr.bf16.mxu0 %v1224_v11  ;;  %v5059_v58 = vld [vmem:[#allocation2 + $0x24] sm:$0xff]   ;;  %v1158_v11 = vrot.slane %v1156_v60, 1  ;;  %v5105_v60 = vld [vmem:[#allocation2 + $0x54] sm:$0xff]  }
 0x1f3   : > { %3713 = vmatprep.subr.bf16.mxu0 %v4214_v59  ;;  %v2355_v63 = vrot.slane %v2353_v57, 1  ;;  %v2408_v9 = vshll.u32 %v5105_v60, 16 }
 0x1f5   : > { %1797 = vmatmul.mubr.bf16.gmra.mxu1 %v4959_v55  ;;  %v4215_v55 = vld [vmem:[#allocation8 + $0x1a0] sm:$0xff]  }
 0x1f6   : > { %1804 = vmatprep.mubr.bf16.mxu1 %v1482_v48  ;;  %3714 = vmatpush3.bf16.msra.mxu0 %v4215_v55  ;;  %v2360_v55 = vshll.u32 %v5059_v58, 16 }
 0x1f7   : > { %3715 = vmatprep.subr.bf16.mxu0 %v4221_v10 }
 0x1f8   : > { %v2362_v10 = vrot.slane %v2360_v55, 1 }
 0x1f9   : > { %3896 = vmatmul.mubr.bf16.gmra.mxu0 %v1227_v14  ;;  %v2367_v14 = vrot.slane %v2365_v0, 1 }
 0x1fa   : > { %3716 = vmatpush3.bf16.msra.mxu0 %v4222_v12  ;;  %3899 = vmatprep.mubr.bf16.mxu0 %v1230_v36  ;;  %v4240_v12 = vld [vmem:[#allocation8 + $0x210] sm:$0xff]  }
 0x1fb   : > { %3717 = vmatprep.subr.bf16.mxu0 %v4223_v38  ;;  %v5074_v38 = vld [vmem:[#allocation2 + $0x38] ss:$0 sps:$4 sm:$0x11]  }
 0x1fc   : > { %v2377_v20 = vshll.u32 %v5074_v38, 16 }
 0x1fd   : > { %1805 = vmatmul.mubr.bf16.gmra.mxu1 %v4965_v6  ;;  %v1132_v6 = vshll.u32 %v4991_v44, 16 }
 0x1fe   : > { %2086 = vmatprep.mubr.bf16.mxu1 %v1116_v15  ;;  %3718 = vmatpush3.bf16.msra.mxu0 %v4224_v21  ;;  %v2356_v15 = vsel %vm1104_vm10, %v2351_v62, %v2355_v63  ;;  %v5082_v21 = vld [vmem:[#allocation2 + $0x3c] sm:$0xff]   ;;  %v1182_v62 = vrot.slane %v1180_v8, 1  ;;  %v1185_v63 = vshll.u32 %v5033_v25, 16  ;;  %v1197_v25 = vshll.u32 %v5038_v28, 16 }
 0x1ff   : > { %v1134_v18 = vrot.slane %v1132_v6, 1  ;;  %3719 = vmatprep.subr.bf16.mxu0 %v4230_v31  ;;  %v1168_v6 = vshll.u32 %v5017_v7, 16  ;;  %v2379_v31 = vrot.slane %v2377_v20, 1  ;;  %v4252_v28 = vld [vmem:[#allocation2 + $0x68] ss:$0 sps:$4 sm:$0x11]  }
 0x200   : > { %v1187_v0 = vrot.slane %v1185_v63, 1 }
 0x201   : > { %v1135_v34 = vor.u32 %v1134_v18, %v1130_v16  ;;  %v2370_v16 = vshrl.u32 %v5070_v56, 16  ;;  %v2374_v18 = vrot.slane %v2372_v3, 1 }
 0x202   : > { %3720 = vmatpush3.bf16.msra.mxu0 %v4231_v39 }
 0x203   : > { %v1140_v48 = vsel %vm1104_vm10, %v1135_v34, %v1139_v35  ;;  %3721 = vmatprep.subr.bf16.mxu0 %v4232_v40  ;;  %v2375_v30 = vor.u32 %v2374_v18, %v2370_v16  ;;  %v1170_v34 = vrot.slane %v1168_v6, 1  ;;  %v2382_v35 = vshrl.u32 %v5082_v21, 16 }
 0x205   : > { %2087 = vmatmul.mubr.bf16.vlgmr.msra.gmra.mxu1 %v4974_v19  ;;  %v1233_v19 = vsel %vm1209_vm9, %v1231_v32, %v1232_v33  ;;  %v5084_v32 = vld [vmem:[#allocation2 + $0x44] ss:$0 sps:$4 sm:$0x11]   ;;  %v1166_v33 = vshrl.u32 %v5017_v7, 16  ;;  %v2380_v36 = vsel %vm1104_vm10, %v2375_v30, %v2379_v31  ;;  %v2425_v31 = vshll.u32 %v4252_v28, 16 }
 0x206   : > { %3904 = vmatpush3.bf16.msra.mxu1 %v4989_v42  ;;  %2094 = vmatprep.mubr.bf16.mxu1 %v1128_v24  ;;  %v1142_v42 = vshrl.u32 %v4997_v46, 16  ;;  %v1159_v24 = vor.u32 %v1158_v11, %v1154_v5 }
 0x207   : > { %3905 = vmatprep.subr.bf16.mxu1 %v4216_v17  ;;  %3900 = vmatmul.mubr.bf16.gmra.mxu0 %v1233_v19  ;;  %v2389_v19 = vshll.u32 %v5084_v32, 16  ;;  %v1171_v52 = vor.u32 %v1170_v34, %v1166_v33  ;;  %v2427_v34 = vrot.slane %v2425_v31, 1  ;;  %v4262_v31 = vld [vmem:[#allocation9] sm:$0xff]  }
 0x208   : > { %v1147_v59 = vor.u32 %v1146_v49, %v1142_v42  ;;  %3722 = vmatpush3.bf16.msra.mxu0 %v4233_v43  ;;  %2706 = vmatprep.mubr.bf16.mxu0 %v2356_v15  ;;  %v1164_v40 = vsel %vm1104_vm10, %v1159_v24, %v1163_v26  ;;  %v4246_v42 = vld [vmem:[#allocation8 + $0x200] sm:$0xff]   ;;  %v5097_v49 = vld [vmem:[#allocation2 + $0x50] ss:$0 sps:$4 sm:$0x11]   ;;  %v1199_v24 = vrot.slane %v1197_v25, 1 }
 0x209   : > { %v2391_v43 = vrot.slane %v2389_v19, 1  ;;  %v5112_v15 = vld [vmem:[#allocation2 + $0x5c] ss:$0 sps:$4 sm:$0x11]   ;;  %v2450_v19 = vrot.slane %v5053_v51, 1  ;;  %v2455_v51 = vrot.slane %v5070_v56, 1 }
 0x20a   : > { %3906 = vmatpush3.bf16.msra.mxu1 %v4216_v17  ;;  %v1152_v4 = vsel %vm1104_vm10, %v1147_v59, %v1151_v47  ;;  %v1178_v47 = vshrl.u32 %v5030_v22, 16  ;;  %v2401_v59 = vshll.u32 %v5097_v49, 16  ;;  %v2413_v16 = vshll.u32 %v5112_v15, 16 }
 0x20b   : > { %3907 = vmatprep.subr.bf16.mxu1 %v4225_v29 }
 0x20c   : > { %v2403_v5 = vrot.slane %v2401_v59, 1  ;;  %v2465_v59 = vrot.slane %v5112_v15, 1 }
 0x20d   : > { %2095 = vmatmul.mubr.bf16.gmra.mxu1 %v4977_v23  ;;  %v2358_v23 = vshrl.u32 %v5059_v58, 16 }
 0x20e   : > { %2102 = vmatprep.mubr.bf16.mxu1 %v1140_v48  ;;  %3908 = vmatpush3.bf16.msra.mxu1 %v4225_v29  ;;  %v4243_v29 = vld [vmem:[#allocation8 + $0x208] sm:$0xff]  }
 0x20f   : > { %3909 = vmatprep.subr.bf16.mxu1 %v4234_v50  ;;  %2707 = vmatmul.mubr.bf16.vlgmr.msra.gmra.mxu0 %v5050_v45  ;;  %v2363_v13 = vor.u32 %v2362_v10, %v2358_v23  ;;  %v1192_v23 = vshll.u32 %v5036_v27, 16  ;;  %v1183_v10 = vor.u32 %v1182_v62, %v1178_v47 }
 0x211   : > { %v2368_v17 = vsel %vm1104_vm10, %v2363_v13, %v2367_v14  ;;  %v1194_v11 = vrot.slane %v1192_v23, 1  ;;  %v5118_v13 = vld [vmem:[#allocation2 + $0x60] sm:$0xff]   ;;  %v2410_v14 = vrot.slane %v2408_v9, 1  ;;  %v1188_v3 = vsel %vm1104_vm10, %v1183_v10, %v1187_v0  ;;  %v4255_v23 = vld [vmem:[#allocation9 + $0x38] sm:$0xff]  }
 0x212   : > { %3910 = vmatpush3.bf16.msra.mxu1 %v4234_v50  ;;  %2714 = vmatprep.mubr.bf16.mxu0 %v2368_v17  ;;  %v2396_v50 = vshll.u32 %v5094_v37, 16  ;;  %v2415_v17 = vrot.slane %v2413_v16, 1  ;;  %v2420_v18 = vshll.u32 %v5118_v13, 16  ;;  %v4259_v9 = vld [vmem:[#allocation9 + $0x18] sm:$0xff]  }
 0x213   : > { %3911 = vmatprep.subr.bf16.mxu1 %v4237_v61  ;;  %3935 = vmatprep.subr.bf16.mxu0 %v4255_v23 }
 0x214   : > { %v2398_v57 = vrot.slane %v2396_v50, 1  ;;  %v2422_v30 = vrot.slane %v2420_v18, 1  ;;  %v2453_v50 = vrot.slane %v5062_v1, 1  ;;  %v2461_v1 = vrot.slane %v5094_v37, 1  ;;  %3936 = vmatpush3.bf16.msra.mxu0 %v4255_v23 }
 0x215   : > { %2103 = vmatmul.mubr.bf16.gmra.mxu1 %v4991_v44  ;;  %v2384_v44 = vshll.u32 %v5082_v21, 16 }
 0x216   : > { %2110 = vmatprep.mubr.bf16.mxu1 %v1152_v4  ;;  %3912 = vmatpush3.bf16.msra.mxu1 %v4237_v61  ;;  %v1176_v61 = vsel %vm1104_vm10, %v1171_v52, %v1175_v53  ;;  %v1190_v4 = vshrl.u32 %v5036_v27, 16  ;;  %v2456_v53 = vrot.slane %v5074_v38, 1 }
 0x217   : > { %3913 = vmatprep.subr.bf16.mxu1 %v4240_v12  ;;  %v2386_v39 = vrot.slane %v2384_v44, 1  ;;  %2715 = vmatmul.mubr.bf16.gmra.mxu0 %v5059_v58  ;;  %v4253_v44 = vld [vmem:[#allocation2 + $0x6c] sm:$0xff]  }
 0x218   : > { %2722 = vmatprep.mubr.bf16.mxu0 %v2380_v36  ;;  %v1195_v20 = vor.u32 %v1194_v11, %v1190_v4  ;;  %v2432_v36 = vshll.u32 %v4253_v44, 16  ;;  %v2430_v41 = vshrl.u32 %v4253_v44, 16 }
 0x219   : > { %v2387_v48 = vor.u32 %v2386_v39, %v2382_v35  ;;  %v4254_v35 = vld [vmem:[#allocation2 + $0x74] ss:$0 sps:$4 sm:$0x11]   ;;  %v2449_v39 = vrot.slane %v5050_v45, 1 }
 0x21a   : > { %3914 = vmatpush3.bf16.msra.mxu1 %v4240_v12  ;;  %v2406_v12 = vshrl.u32 %v5105_v60, 16  ;;  %v1200_v33 = vsel %vm1104_vm10, %v1195_v20, %v1199_v24  ;;  %v2471_v62 = vrot.slane %v4254_v35, 1 }
 0x21b   : > { %3915 = vmatprep.subr.bf16.mxu1 %v4243_v29  ;;  %v2392_v54 = vsel %vm1104_vm10, %v2387_v48, %v2391_v43  ;;  %v2437_v43 = vshll.u32 %v4254_v35, 16  ;;  %v2451_v48 = vsel %vm1209_vm9, %v2449_v39, %v2450_v19 }
 0x21c   : > { %v2411_v6 = vor.u32 %v2410_v14, %v2406_v12  ;;  %v4260_v12 = vld [vmem:[#allocation9 + $0x10] sm:$0xff]  }
 0x21d   : > { %2111 = vmatmul.mubr.bf16.gmra.mxu1 %v4997_v46  ;;  %v2394_v46 = vshrl.u32 %v5094_v37, 16  ;;  %v2439_v52 = vrot.slane %v2437_v43, 1 }
 0x21e   : > { %2118 = vmatprep.mubr.bf16.mxu1 %v1164_v40  ;;  %3916 = vmatpush3.bf16.msra.mxu1 %v4243_v29  ;;  %v2416_v26 = vsel %vm1104_vm10, %v2411_v6, %v2415_v17  ;;  %v2418_v29 = vshrl.u32 %v5118_v13, 16  ;;  %v4261_v17 = vld [vmem:[#allocation9 + $0x8] sm:$0xff]  }
 0x21f   : > { %3917 = vmatprep.subr.bf16.mxu1 %v4246_v42  ;;  %2723 = vmatmul.mubr.bf16.gmra.mxu0 %v5070_v56  ;;  %v2399_v55 = vor.u32 %v2398_v57, %v2394_v46  ;;  %v2462_v56 = vrot.slane %v5097_v49, 1  ;;  %v2464_v57 = vrot.slane %v5105_v60, 1  ;;  %v2470_v49 = vrot.slane %v4253_v44, 1 }
 0x220   : > { %2730 = vmatprep.mubr.bf16.mxu0 %v2392_v54  ;;  %v2457_v54 = vsel %vm1209_vm9, %v2455_v51, %v2456_v53 }
 0x221   : > { %v2463_v46 = vsel %vm1209_vm9, %v2461_v1, %v2462_v56  ;;  %v2472_v63 = vsel %vm1209_vm9, %v2470_v49, %v2471_v62 }
 0x222   : > { %3918 = vmatpush3.bf16.msra.mxu1 %v4246_v42  ;;  %v2434_v42 = vrot.slane %v2432_v36, 1 }
 0x223   : > { %3967 = vmatprep.subr.bf16.mxu1 %v4255_v23 }
 0x224   : > { %v2435_v45 = vor.u32 %v2434_v42, %v2430_v41 }
 0x225   : > { %2119 = vmatmul.mubr.bf16.gmra.mxu1 %v5011_v2  ;;  %v2404_v2 = vsel %vm1104_vm10, %v2399_v55, %v2403_v5  ;;  %v4257_v55 = vld [vmem:[#allocation9 + $0x28] sm:$0xff]   ;;  %v4258_v5 = vld [vmem:[#allocation9 + $0x20] sm:$0xff]  }
 0x226   : > { %2126 = vmatprep.mubr.bf16.mxu1 %v1176_v61  ;;  %v2440_v47 = vsel %vm1104_vm10, %v2435_v45, %v2439_v52  ;;  %v2467_v61 = vrot.slane %v5118_v13, 1 }
 0x227   : > { %2731 = vmatmul.mubr.bf16.gmra.mxu0 %v5082_v21 }
 0x228   : > { %2738 = vmatprep.mubr.bf16.mxu0 %v2404_v2 }
 0x22d   : > { %2127 = vmatmul.mubr.bf16.gmra.mxu1 %v5017_v7  ;;  %v2423_v7 = vor.u32 %v2422_v30, %v2418_v29 }
 0x22e   : > { %2134 = vmatprep.mubr.bf16.mxu1 %v1188_v3 }
 0x22f   : > { %2739 = vmatmul.mubr.bf16.gmra.mxu0 %v5094_v37  ;;  %v2428_v40 = vsel %vm1104_vm10, %v2423_v7, %v2427_v34 }
 0x230   : > { %2746 = vmatprep.mubr.bf16.mxu0 %v2416_v26 }
 0x235   : > { %2135 = vmatmul.mubr.bf16.gmra.mxu1 %v5030_v22  ;;  %v2452_v22 = vrot.slane %v5059_v58, 1  ;;  %v2459_v58 = vrot.slane %v5084_v32, 1  ;;  %v2466_v32 = vsel %vm1209_vm9, %v2464_v57, %v2465_v59 }
 0x236   : > { %2142 = vmatprep.mubr.bf16.mxu1 %v1200_v33 }
 0x237   : > { %2747 = vmatmul.mubr.bf16.gmra.mxu0 %v5105_v60  ;;  %v2454_v8 = vsel %vm1209_vm9, %v2452_v22, %v2453_v50  ;;  %v4256_v60 = vld [vmem:[#allocation9 + $0x30] sm:$0xff]  }
 0x238   : > { %2754 = vmatprep.mubr.bf16.mxu0 %v2428_v40  ;;  %3937 = vmatprep.subr.bf16.mxu0 %v4256_v60 }
 0x239   : > { %3938 = vmatpush3.bf16.msra.mxu0 %v4256_v60 }
 0x23a   : > { %3939 = vmatprep.subr.bf16.mxu0 %v4257_v55 }
 0x23d   : > { %2143 = vmatmul.mubr.bf16.gmra.mxu1 %v5036_v27  ;;  %v2458_v27 = vrot.slane %v5082_v21, 1  ;;  %v2468_v21 = vrot.slane %v4252_v28, 1  ;;  %3940 = vmatpush3.bf16.msra.mxu0 %v4257_v55 }
 0x23e   : > { %3919 = vmatprep.mubr.bf16.mxu1 %v2451_v48  ;;  %3941 = vmatprep.subr.bf16.mxu0 %v4258_v5 }
 0x23f   : > { %2755 = vmatmul.mubr.bf16.gmra.mxu0 %v5118_v13  ;;  %v2460_v38 = vsel %vm1209_vm9, %v2458_v27, %v2459_v58  ;;  %v2469_v37 = vsel %vm1209_vm9, %v2467_v61, %v2468_v21 }
 0x240   : > { %2762 = vmatprep.mubr.bf16.mxu0 %v2440_v47 }
 0x241   : > { %3942 = vmatpush3.bf16.msra.mxu0 %v4258_v5 }
 0x242   : > { %3943 = vmatprep.subr.bf16.mxu0 %v4259_v9 }
 0x245   : > { %3920 = vmatmul.mubr.bf16.vlgmr.msra.gmra.mxu1 %v2454_v8  ;;  %3944 = vmatpush3.bf16.msra.mxu0 %v4259_v9 }
 0x246   : > { %3923 = vmatprep.mubr.bf16.mxu1 %v2457_v54  ;;  %3975 = vmatpush3.bf16.msra.mxu1 %v4255_v23 }
 0x247   : > { %2763 = vmatmul.mubr.bf16.gmra.mxu0 %v4253_v44  ;;  %3968 = vmatprep.subr.bf16.mxu1 %v4256_v60 }
 0x248   : > { %3945 = vmatprep.subr.bf16.mxu0 %v4260_v12 }
 0x249   : > { %3946 = vmatpush3.bf16.msra.mxu0 %v4260_v12 }
 0x24a   : > { %3976 = vmatpush3.bf16.msra.mxu1 %v4256_v60  ;;  %3947 = vmatprep.subr.bf16.mxu0 %v4261_v17 }
 0x24b   : > { %3969 = vmatprep.subr.bf16.mxu1 %v4257_v55 }
 0x24d   : > { %3924 = vmatmul.mubr.bf16.gmra.mxu1 %v2460_v38  ;;  %3948 = vmatpush3.bf16.msra.mxu0 %v4261_v17 }
 0x24e   : > { %3927 = vmatprep.mubr.bf16.mxu1 %v2463_v46  ;;  %3977 = vmatpush3.bf16.msra.mxu1 %v4257_v55 }
 0x24f   : > { %3970 = vmatprep.subr.bf16.mxu1 %v4258_v5  ;;  %3949 = vmatprep.subr.bf16.mxu0 %v4262_v31 }
 0x251   : > { %3950 = vmatpush3.bf16.msra.mxu0 %v4262_v31 }
 0x252   : > { %3978 = vmatpush3.bf16.msra.mxu1 %v4258_v5 }
 0x253   : > { %3971 = vmatprep.subr.bf16.mxu1 %v4259_v9 }
 0x255   : > { %3928 = vmatmul.mubr.bf16.gmra.mxu1 %v2466_v32 }
 0x256   : > { %3931 = vmatprep.mubr.bf16.mxu1 %v2469_v37  ;;  %3979 = vmatpush3.bf16.msra.mxu1 %v4259_v9 }
 0x257   : > { %3972 = vmatprep.subr.bf16.mxu1 %v4260_v12 }
 0x25a   : > { %3980 = vmatpush3.bf16.msra.mxu1 %v4260_v12 }
 0x25b   : > { %3973 = vmatprep.subr.bf16.mxu1 %v4261_v17 }
 0x25d   : > { %3932 = vmatmul.mubr.bf16.gmra.mxu1 %v2472_v63 }
 0x25e   : > { %3981 = vmatpush3.bf16.msra.mxu1 %v4261_v17 }
 0x25f   : > { %3974 = vmatprep.subr.bf16.mxu1 %v4262_v31 }
 0x262   : > { %3982 = vmatpush3.bf16.msra.mxu1 %v4262_v31 }
 0x285   : > { %v3563_v15 = vpop.f32.mrf.mxu1 }
 0x287   : > { %v3857_v10 = vpop.f32.mrf.mxu0  ;;  %v3564_v0 = vpop.f32.mrf.mxu1 }
 0x288   : > { %v3565_v4 = vadd.f32 %v3564_v0, %v3563_v15 }
 0x289   : > { %v1847_v11 = vpop.f32.mrf.mxu0  ;;  %v3566_v25 = vpop.f32.mrf.mxu1 }
 0x28a   : > { %v5157_v13 = vadd.f32 %v3565_v4, %v1847_v11 }
 0x28b   : > { %v3858_v2 = vpop.f32.mrf.mxu0  ;;  %v3567_v14 = vpop.f32.mrf.mxu1 }
 0x28c   : > { %v3568_v16 = vadd.f32 %v3567_v14, %v3566_v25 }
 0x28d   : > { %v1850_v3 = vpop.f32.mrf.mxu0  ;;  %v3569_v6 = vpop.f32.mrf.mxu1 }
 0x28e   : > { %v5159_v28 = vadd.f32 %v3568_v16, %v1850_v3 }
 0x28f   : > { %v3570_v18 = vpop.f32.mrf.mxu1  ;;  %v3861_v20 = vpop.f32.mrf.mxu0 }
 0x290   : > { %v3571_v24 = vadd.f32 %v3570_v18, %v3569_v6 }
 0x291   : > { %v3572_v26 = vpop.f32.mrf.mxu1  ;;  %v1863_v29 = vpop.f32.mrf.mxu0 }
 0x292   : > { %v5161_v30 = vadd.f32 %v3857_v10, %v3571_v24 }
 0x293   : > { %v3573_v44 = vpop.f32.mrf.mxu1  ;;  %v3862_v33 = vpop.f32.mrf.mxu0 }
 0x294   : > { %v3574_v7 = vadd.f32 %v3573_v44, %v3572_v26 }
 0x295   : > { %v3575_v34 = vpop.f32.mrf.mxu1  ;;  %v1866_v39 = vpop.f32.mrf.mxu0 }
 0x296   : > { %v5163_v35 = vadd.f32 %v3858_v2, %v3574_v7 }
 0x297   : > { %v3576_v36 = vpop.f32.mrf.mxu1  ;;  %v3865_v41 = vpop.f32.mrf.mxu0 }
 0x298   : > { %v3577_v19 = vadd.f32 %v3576_v36, %v3575_v34 }
 0x299   : > { %v3578_v40 = vpop.f32.mrf.mxu1  ;;  %v1879_v50 = vpop.f32.mrf.mxu0 }
 0x29a   : > { %v5165_v42 = vadd.f32 %v3577_v19, %v1863_v29 }
 0x29b   : > { %v3579_v43 = vpop.f32.mrf.mxu1  ;;  %v3866_v8 = vpop.f32.mrf.mxu0 }
 0x29c   : > { %v3580_v48 = vadd.f32 %v3579_v43, %v3578_v40 }
 0x29d   : > { %v3581_v22 = vpop.f32.mrf.mxu1  ;;  %v1882_v1 = vpop.f32.mrf.mxu0 }
 0x29e   : > { %v5167_v45 = vadd.f32 %v3580_v48, %v1866_v39 }
 0x29f   : > { %v3582_v52 = vpop.f32.mrf.mxu1 }
 0x2a0   : > { %v3583_v51 = vadd.f32 %v3582_v52, %v3581_v22 }
 0x2a1   : > { %v3584_v53 = vpop.f32.mrf.mxu1  ;;  %v3869_v46 = vpop.f32.mrf.mxu0 }
 0x2a2   : > { %v5169_v47 = vadd.f32 %v3861_v20, %v3583_v51 }
 0x2a3   : > { %v3585_v54 = vpop.f32.mrf.mxu1  ;;  %v1895_v61 = vpop.f32.mrf.mxu0 }
 0x2a4   : > { %v3586_v27 = vadd.f32 %v3585_v54, %v3584_v53 }
 0x2a5   : > { %v3587_v58 = vpop.f32.mrf.mxu1  ;;  %v3870_v37 = vpop.f32.mrf.mxu0 }
 0x2a6   : > { %v5171_v56 = vadd.f32 %v3862_v33, %v3586_v27 }
 0x2a7   : > { %v3588_v38 = vpop.f32.mrf.mxu1  ;;  %v1898_v63 = vpop.f32.mrf.mxu0 }
 0x2a8   : > { %v3589_v57 = vadd.f32 %v3588_v38, %v3587_v58 }
 0x2a9   : > { %v3590_v59 = vpop.f32.mrf.mxu1  ;;  %v3889_v15 = vpop.f32.mrf.mxu0 }
 0x2aa   : > { %v5173_v21 = vadd.f32 %v3589_v57, %v1879_v50 }
 0x2ab   : > { %v3591_v32 = vpop.f32.mrf.mxu1  ;;  %v2185_v0 = vpop.f32.mrf.mxu0 }
 0x2ac   : > { %v3592_v49 = vadd.f32 %v3591_v32, %v3590_v59 }
 0x2ad   : > { %v3593_v62 = vpop.f32.mrf.mxu1  ;;  %v3890_v25 = vpop.f32.mrf.mxu0 }
 0x2ae   : > { %v5175_v23 = vadd.f32 %v3592_v49, %v1882_v1 }
 0x2af   : > { %v3594_v60 = vpop.f32.mrf.mxu1  ;;  %v2188_v14 = vpop.f32.mrf.mxu0 }
 0x2b0   : > { %v3595_v55 = vadd.f32 %v3594_v60, %v3593_v62 }
 0x2b1   : > { %v3596_v5 = vpop.f32.mrf.mxu1  ;;  %v5181_v6 = vpop.f32.mrf.mxu0 }
 0x2b2   : > { %v5177_v9 = vadd.f32 %v3865_v41, %v3595_v55 }
 0x2b3   : > { %v3597_v10 = vpop.f32.mrf.mxu1  ;;  %v2201_v20 = vpop.f32.mrf.mxu0 }
 0x2b4   : > { %v3598_v4 = vadd.f32 %v3597_v10, %v3596_v5 }
 0x2b5   : > { %v3599_v11 = vpop.f32.mrf.mxu1  ;;  %v5185_v29 = vpop.f32.mrf.mxu0 }
 0x2b6   : > { %v5179_v12 = vadd.f32 %v3866_v8, %v3598_v4 }
 0x2b7   : > { %v3600_v2 = vpop.f32.mrf.mxu1  ;;  %v2204_v33 = vpop.f32.mrf.mxu0 }
 0x2b8   : > { %v3601_v16 = vadd.f32 %v3600_v2, %v3599_v11 }
 0x2b9   : > { %v3602_v3 = vpop.f32.mrf.mxu1  ;;  %v5189_v36 = vpop.f32.mrf.mxu0 }
 0x2ba   : > { %v5183_v17 = vadd.f32 %v3601_v16, %v1895_v61 }
 0x2bb   : > { %v3603_v18 = vpop.f32.mrf.mxu1  ;;  %v5193_v40 = vpop.f32.mrf.mxu0 }
 0x2bc   : > { %v3604_v24 = vadd.f32 %v3603_v18, %v3602_v3 }
 0x2bd   : > { %v3605_v26 = vpop.f32.mrf.mxu1  ;;  %v5195_v48 = vpop.f32.mrf.mxu0 }
 0x2be   : > { %v5187_v31 = vadd.f32 %v3604_v24, %v1898_v63 }
 0x2bf   : > { %v3606_v44 = vpop.f32.mrf.mxu1  ;;  %v5199_v52 = vpop.f32.mrf.mxu0 }
 0x2c0   : > { %v3607_v7 = vadd.f32 %v3606_v44, %v3605_v26 }
 0x2c1   : > { %v3608_v34 = vpop.f32.mrf.mxu1 }
 0x2c2   : > { %v5191_v39 = vadd.f32 %v3869_v46, %v3607_v7 }
 0x2c3   : > { %v3609_v19 = vpop.f32.mrf.mxu1 }
 0x2c4   : > { %v3610_v41 = vadd.f32 %v3609_v19, %v3608_v34 }
 0x2c5   : > { %v3643_v43 = vpop.f32.mrf.mxu1 }
 0x2c6   : > { %v5197_v22 = vadd.f32 %v3870_v37, %v3610_v41 }
 0x2c7   : > { %v3644_v50 = vpop.f32.mrf.mxu1  ;;  %v5201_v8 = vpop.f32.mrf.mxu0 }
 0x2c8   : > { %v3645_v51 = vadd.f32 %v3644_v50, %v3643_v43 }
 0x2c9   : > { %v3646_v53 = vpop.f32.mrf.mxu1  ;;  %v5204_v58 = vpop.f32.mrf.mxu0 }
 0x2ca   : > { %v2089_v54 = vadd.f32 %v3645_v51, %v5157_v13 }
 0x2cb   : > { %v3647_v27 = vpop.f32.mrf.mxu1  ;;  %v5208_v57 = vpop.f32.mrf.mxu0 }
 0x2cc   : > { %v3648_v1 = vadd.f32 %v3647_v27, %v3646_v53  ;;  %v5206_v38 = vadd.f32 %v2185_v0, %v2089_v54 }
 0x2cd   : > { %v3649_v46 = vpop.f32.mrf.mxu1  ;;  %v5211_v37 = vpop.f32.mrf.mxu0 }
 0x2ce   : > { %v2092_v59 = vadd.f32 %v3648_v1, %v5159_v28 }
 0x2cf   : > { %v3650_v61 = vpop.f32.mrf.mxu1  ;;  %v5216_v55 = vpop.f32.mrf.mxu0 }
 0x2d0   : > { %v3651_v32 = vadd.f32 %v3650_v61, %v3649_v46  ;;  %v5213_v49 = vadd.f32 %v2188_v14, %v2092_v59 }
 0x2d1   : > { %v3652_v62 = vpop.f32.mrf.mxu1  ;;  %v5221_v4 = vpop.f32.mrf.mxu0 }
 0x2d2   : > { %v2097_v13 = vadd.f32 %v3651_v32, %v5161_v30 }
 0x2d3   : > { %v3653_v63 = vpop.f32.mrf.mxu1  ;;  %v5223_v2 = vpop.f32.mrf.mxu0 }
 0x2d4   : > { %v3654_v60 = vadd.f32 %v3653_v63, %v3652_v62  ;;  %v5218_v5 = vadd.f32 %v3889_v15, %v2097_v13 }
 0x2d5   : > { %v3655_v10 = vpop.f32.mrf.mxu1  ;;  %v5228_v3 = vpop.f32.mrf.mxu0 }
 0x2d6   : > { %v2100_v0 = vadd.f32 %v3654_v60, %v5163_v35 }
 0x2d7   : > { %v3656_v28 = vpop.f32.mrf.mxu1  ;;  %v5230_v15 = vpop.f32.mrf.mxu0 }
 0x2d8   : > { %v3657_v11 = vadd.f32 %v3656_v28, %v3655_v10  ;;  %v5225_v14 = vadd.f32 %v3890_v25, %v2100_v0 }
 0x2d9   : > { %v3658_v16 = vpop.f32.mrf.mxu1  ;;  %v5235_v7 = vpop.f32.mrf.mxu0 }
 0x2da   : > { %v2105_v30 = vadd.f32 %v3657_v11, %v5165_v42 }
 0x2db   : > { %v3659_v18 = vpop.f32.mrf.mxu1  ;;  %v5237_v25 = vpop.f32.mrf.mxu0 }
 0x2dc   : > { %v3660_v24 = vadd.f32 %v3659_v18, %v3658_v16  ;;  %v5232_v26 = vadd.f32 %v2201_v20, %v2105_v30 }
 0x2dd   : > { %v3661_v35 = vpop.f32.mrf.mxu1  ;;  %v5242_v50 = vpop.f32.mrf.mxu0 }
 0x2de   : > { %v2108_v44 = vadd.f32 %v3660_v24, %v5167_v45 }
 0x2df   : > { %v3662_v34 = vpop.f32.mrf.mxu1  ;;  %v5244_v20 = vpop.f32.mrf.mxu0 }
 0x2e0   : > { %v3663_v19 = vadd.f32 %v3662_v34, %v3661_v35  ;;  %v5239_v41 = vadd.f32 %v2204_v33, %v2108_v44 }
 0x2e1   : > { %v3664_v42 = vpop.f32.mrf.mxu1  ;;  %v5250_v1 = vpop.f32.mrf.mxu0 }
 0x2e2   : > { %v2113_v43 = vadd.f32 %v3663_v19, %v5169_v47 }
 0x2e3   : > { %v3665_v51 = vpop.f32.mrf.mxu1  ;;  %v5252_v59 = vpop.f32.mrf.mxu0 }
 0x2e4   : > { %v3666_v53 = vadd.f32 %v3665_v51, %v3664_v42  ;;  %v5247_v54 = vadd.f32 %v5181_v6, %v2113_v43 }
 0x2e5   : > { %v3667_v45 = vpop.f32.mrf.mxu1  ;;  %v5258_v62 = vpop.f32.mrf.mxu0 }
 0x2e6   : > { %v2116_v27 = vadd.f32 %v3666_v53, %v5171_v56 }
 0x2e7   : > { %v3668_v46 = vpop.f32.mrf.mxu1  ;;  %v3741_v63 = vpop.f32.mrf.mxu0 }
 0x2e8   : > { %v3669_v33 = vadd.f32 %v3668_v46, %v3667_v45  ;;  %v5255_v47 = vadd.f32 %v5185_v29, %v2116_v27 }
 0x2e9   : > { %v3670_v61 = vpop.f32.mrf.mxu1  ;;  %v3742_v0 = vpop.f32.mrf.mxu0 }
 0x2ea   : > { %v2121_v32 = vadd.f32 %v3669_v33, %v5173_v21 }
 0x2eb   : > { %v3671_v13 = vpop.f32.mrf.mxu1  ;;  %v5264_v16 = vpop.f32.mrf.mxu0 }
 0x2ec   : > { %v3672_v6 = vadd.f32 %v3671_v13, %v3670_v61  ;;  %v5261_v60 = vadd.f32 %v5193_v40, %v2121_v32 }
 0x2ed   : > { %v3673_v56 = vpop.f32.mrf.mxu1  ;;  %v5270_v18 = vpop.f32.mrf.mxu0 }
 0x2ee   : > { %v2124_v10 = vadd.f32 %v3672_v6, %v5175_v23 }
 0x2ef   : > { %v3674_v28 = vpop.f32.mrf.mxu1  ;;  %v5272_v40 = vpop.f32.mrf.mxu0 }
 0x2f0   : > { %v3675_v11 = vadd.f32 %v3674_v28, %v3673_v56  ;;  %v5267_v29 = vadd.f32 %v5199_v52, %v2124_v10 }
 0x2f1   : > { %v3676_v21 = vpop.f32.mrf.mxu1  ;;  %v5278_v19 = vpop.f32.mrf.mxu0 }
 0x2f2   : > { %v2129_v30 = vadd.f32 %v3675_v11, %v5177_v9 }
 0x2f3   : > { %v3677_v24 = vpop.f32.mrf.mxu1  ;;  %v5280_v43 = vpop.f32.mrf.mxu0 }
 0x2f4   : > { %v3678_v35 = vadd.f32 %v3677_v24, %v3676_v21  ;;  %v5275_v44 = vadd.f32 %v5189_v36, %v2129_v30 }
 0x2f5   : > { %v3679_v23 = vpop.f32.mrf.mxu1  ;;  %v5286_v45 = vpop.f32.mrf.mxu0 }
 0x2f6   : > { %v2132_v34 = vadd.f32 %v3678_v35, %v5179_v12 }
 0x2f7   : > { %v3680_v42 = vpop.f32.mrf.mxu1  ;;  %v3753_v46 = vpop.f32.mrf.mxu0 }
 0x2f8   : > { %v3681_v52 = vadd.f32 %v3680_v42, %v3679_v23  ;;  %v5283_v9 = vadd.f32 %v5195_v48, %v2132_v34  ;;  %v3734_v42 = vadd.f32 %v5242_v50, %v5237_v25 }
 0x2f9   : > { %v3682_v51 = vpop.f32.mrf.mxu1  ;;  %v3754_v32 = vpop.f32.mrf.mxu0 }
 0x2fa   : > { %v2137_v53 = vadd.f32 %v3681_v52, %v5183_v17 }
 0x2fb   : > { %v3683_v27 = vpop.f32.mrf.mxu1  ;;  %v5292_v56 = vpop.f32.mrf.mxu0 }
 0x2fc   : > { %v3684_v36 = vadd.f32 %v3683_v27, %v3682_v51  ;;  %v5289_v33 = vadd.f32 %v5204_v58, %v2137_v53  ;;  %v3731_v58 = vadd.f32 %v5235_v7, %v5230_v15 }
 0x2fd   : > { %v3685_v12 = vpop.f32.mrf.mxu1  ;;  %v5298_v28 = vpop.f32.mrf.mxu0 }
 0x2fe   : > { %v2140_v61 = vadd.f32 %v3684_v36, %v5187_v31 }
 0x2ff   : > { %v3686_v13 = vpop.f32.mrf.mxu1  ;;  %v5302_v30 = vpop.f32.mrf.mxu0 }
 0x300   : > { %v3687_v6 = vadd.f32 %v3686_v13, %v3685_v12  ;;  %v5295_v48 = vadd.f32 %v5211_v37, %v2140_v61  ;;  %v3725_v37 = vadd.f32 %v5221_v4, %v5216_v55  ;;  %v5323_v55 = vld [vmem:[%s5505_s4] ss:$0 sm:$0xff]  ;;  %v3728_v4 = vadd.f32 %v5228_v3, %v5223_v2 }
 0x301   : > { %v3688_v17 = vpop.f32.mrf.mxu1  ;;  %v3737_v12 = vadd.f32 %v5250_v1, %v5244_v20 }
 0x302   : > { %v2145_v10 = vadd.f32 %v3687_v6, %v5191_v39  ;;  %v5310_v39 = vpop.f32.mrf.mxu0 }
 0x303   : > { %v3689_v11 = vpop.f32.mrf.mxu1 }
 0x304   : > { %v3690_v21 = vadd.f32 %v3689_v11, %v3688_v17  ;;  %v5305_v31 = vadd.f32 %v5201_v8, %v2145_v10  ;;  %v5315_v52 = vpop.f32.mrf.mxu0  ;;  %v3746_v11 = vadd.f32 %v5270_v18, %v5264_v16  ;;  %v3749_v18 = vadd.f32 %v5278_v19, %v5272_v40 }
 0x305   : > { %v3921_v24 = vpop.f32.mrf.mxu1  ;;  %v3752_v19 = vadd.f32 %v5286_v45, %v5280_v43 }
 0x306   : > { %v2148_v35 = vadd.f32 %v3690_v21, %v5197_v22  ;;  %v2814_v23 = vadd.f32 %v3921_v24, %v3731_v58  ;;  %v5330_v36 = vpop.f32.mrf.mxu0  ;;  %v3740_v58 = vadd.f32 %v5258_v62, %v5252_v59 }
 0x307   : > { %v2805_v34 = vpop.f32.mrf.mxu1 }
 0x308   : > { %v2870_v15 = vadd.f32 %v2814_v23, %v5218_v5  ;;  %v2806_v7 = vadd.f32 %v3725_v37, %v2805_v34  ;;  %v5318_v8 = vadd.f32 %v5208_v57, %v2148_v35  ;;  %v3743_v5 = vadd.f32 %v3742_v0, %v3741_v63  ;;  %v3765_v10 = vpop.f32.mrf.mxu0 }
 0x309   : > { %v3922_v22 = vpop.f32.mrf.mxu1  ;;  %v3755_v34 = vadd.f32 %v3754_v32, %v3753_v46  ;;  %v3758_v32 = vadd.f32 %v5298_v28, %v5292_v56 }
 0x30a   : > { %v2868_v51 = vadd.f32 %v2806_v7, %v5206_v38  ;;  %v2817_v25 = vadd.f32 %v3922_v22, %v3734_v42  ;;  %v2893_v53 = vadd.f32 %v5323_v55, %v2870_v15  ;;  %v3766_v7 = vpop.f32.mrf.mxu0 }
 0x30b   : > { %v2808_v50 = vpop.f32.mrf.mxu1 }
 0x30c   : > { %v2871_v27 = vadd.f32 %v2817_v25, %v5225_v14  ;;  %v2809_v57 = vadd.f32 %v3728_v4, %v2808_v50  ;;  %v2891_v13 = vadd.f32 %v5323_v55, %v2868_v51  ;;  %v2909_v63 = vmax.f32 %v2893_v53, 0.0  ;;  %v3768_v25 = vpop.f32.mrf.mxu0 }
 0x30d   : > { %v3925_v61 = vpop.f32.mrf.mxu1 }
 0x30e   : > { %v2894_v2 = vadd.f32 %v5323_v55, %v2871_v27  ;;  %v2869_v38 = vadd.f32 %v2809_v57, %v5213_v49  ;;  %v2830_v3 = vadd.f32 %v3925_v61, %v3743_v5  ;;  %v2907_v21 = vmax.f32 %v2891_v13, 0.0 }
 0x30f   : > { %v2821_v6 = vpop.f32.mrf.mxu1  ;;  %v3767_v27 = vadd.f32 %v3766_v7, %v3765_v10 }
 0x310   : > { %v2910_v0 = vmax.f32 %v2894_v2, 0.0  ;;  %v2892_v17 = vadd.f32 %v5323_v55, %v2869_v38  ;;  %v2822_v14 = vadd.f32 %v3737_v12, %v2821_v6  ;;  %v2874_v20 = vadd.f32 %v2830_v3, %v5247_v54  ;;  %v3769_v38 = vpop.f32.mrf.mxu0 }
 0x311   : > { %v3926_v1 = vpop.f32.mrf.mxu1 }
 0x312   : > { %v2924_v24 = vpack.c.bf16 %v2910_v0, %v2909_v63  ;;  %v2908_v49 = vmax.f32 %v2892_v17, 0.0  ;;  %v2872_v37 = vadd.f32 %v2822_v14, %v5232_v26  ;;  %v2833_v35 = vadd.f32 %v3926_v1, %v3746_v11 }
 0x313   : > { %v2824_v23 = vpop.f32.mrf.mxu1  ;;  %v2897_v22 = vadd.f32 %v5323_v55, %v2874_v20  ;;  %v3761_v63 = vadd.f32 %v5310_v39, %v5302_v30  ;;  %v3764_v30 = vadd.f32 %v5330_v36, %v5315_v52 }
 0x314   : > { %v2825_v42 = vadd.f32 %v3740_v58, %v2824_v23  ;;  %v2923_v15 = vpack.c.bf16 %v2908_v49, %v2907_v21  ;;  %v2875_v16 = vadd.f32 %v2833_v35, %v5255_v47  ;;  %v2895_v26 = vadd.f32 %v5323_v55, %v2872_v37 }
 0x315   : > { %v3929_v54 = vpop.f32.mrf.mxu1  ;;  %v2913_v50 = vmax.f32 %v2897_v22, 0.0 }
 0x316   : > { %v2873_v59 = vadd.f32 %v2825_v42, %v5239_v41  ;;  %v2846_v62 = vadd.f32 %v3929_v54, %v3755_v34  ;;  %3951 = vmatprep.mubr.bf16.mxu0 %v2923_v15  ;;  %v2898_v4 = vadd.f32 %v5323_v55, %v2875_v16  ;;  %v2911_v12 = vmax.f32 %v2895_v26, 0.0 }
 0x317   : > { %v2837_v46 = vpop.f32.mrf.mxu1  ;;  %3952 = vmatmul.mubr.bf16.vlgmr.msra.gmra.mxu0 %v2924_v24 }
 0x318   : > { %v2896_v51 = vadd.f32 %v5323_v55, %v2873_v59  ;;  %v2838_v47 = vadd.f32 %v3749_v18, %v2837_v46  ;;  %v2914_v5 = vmax.f32 %v2898_v4, 0.0  ;;  %v2878_v40 = vadd.f32 %v2846_v62, %v5275_v44  ;;  %v3476_v18 = vld [vmem:[%s4737_s19 + $0x20] sm:$0xff] }
 0x319   : > { %v3930_v41 = vpop.f32.mrf.mxu1 }
 0x31a   : > { %v2912_v53 = vmax.f32 %v2896_v51, 0.0  ;;  %v2849_v57 = vadd.f32 %v3930_v41, %v3758_v32  ;;  %v2926_v61 = vpack.c.bf16 %v2914_v5, %v2913_v50  ;;  %v2876_v13 = vadd.f32 %v2838_v47, %v5261_v60  ;;  %v3477_v32 = vld [vmem:[%s4737_s19 + $0x28] sm:$0xff]  ;;  %v3475_v5 = vld [vmem:[%s4737_s19 + $0x18] sm:$0xff] }
 0x31b   : > { %v2840_v56 = vpop.f32.mrf.mxu1  ;;  %v2901_v3 = vadd.f32 %v5323_v55, %v2878_v40  ;;  %v3770_v60 = vadd.f32 %v3769_v38, %v3768_v25 }
 0x31c   : > { %v2879_v28 = vadd.f32 %v2849_v57, %v5283_v9  ;;  %v2841_v2 = vadd.f32 %v3752_v19, %v2840_v56  ;;  %v2925_v44 = vpack.c.bf16 %v2912_v53, %v2911_v12  ;;  %v2899_v17 = vadd.f32 %v5323_v55, %v2876_v13  ;;  %v3480_v12 = vld [vmem:[%s4737_s19 + $0x40] sm:$0xff] }
 0x31d   : > { %v3933_v6 = vpop.f32.mrf.mxu1  ;;  %v2917_v1 = vmax.f32 %v2901_v3, 0.0 }
 0x31e   : > { %v2902_v43 = vadd.f32 %v5323_v55, %v2879_v28  ;;  %v2877_v45 = vadd.f32 %v2841_v2, %v5267_v29  ;;  %v2862_v0 = vadd.f32 %v3933_v6, %v3767_v27  ;;  %3955 = vmatprep.mubr.bf16.mxu1 %v2925_v44  ;;  %v2915_v24 = vmax.f32 %v2899_v17, 0.0  ;;  %v3478_v28 = vld [vmem:[%s4737_s19 + $0x30] sm:$0xff]  ;;  %v3481_v6 = vld [vmem:[%s4737_s19 + $0x48] sm:$0xff] }
 0x31f   : > { %v2853_v14 = vpop.f32.mrf.mxu1  ;;  %3956 = vmatmul.mubr.bf16.vlgmr.msra.gmra.mxu1 %v2926_v61 }
 0x320   : > { %v2918_v9 = vmax.f32 %v2902_v43, 0.0  ;;  %v2900_v10 = vadd.f32 %v5323_v55, %v2877_v45  ;;  %v2882_v11 = vadd.f32 %v2862_v0, %v5305_v31  ;;  %v2854_v20 = vadd.f32 %v3761_v63, %v2853_v14  ;;  %v3479_v0 = vld [vmem:[%s4737_s19 + $0x38] sm:$0xff] }
 0x321   : > { %v3934_v58 = vpop.f32.mrf.mxu1 }
 0x322   : > { %v2916_v39 = vmax.f32 %v2900_v10, 0.0  ;;  %v2880_v29 = vadd.f32 %v2854_v20, %v5289_v33  ;;  %v2865_v21 = vadd.f32 %v3934_v58, %v3770_v60  ;;  %v2928_v37 = vpack.c.bf16 %v2918_v9, %v2917_v1  ;;  %v3484_v10 = vld [vmem:[%s4737_s19 + $0x60] sm:$0xff] }
 0x323   : > { %v2856_v49 = vpop.f32.mrf.mxu1  ;;  %v2905_v35 = vadd.f32 %v5323_v55, %v2882_v11 }
 0x324   : > { %v2883_v23 = vadd.f32 %v2865_v21, %v5318_v8  ;;  %v2857_v34 = vadd.f32 %v3764_v30, %v2856_v49  ;;  %v2927_v31 = vpack.c.bf16 %v2916_v39, %v2915_v24  ;;  %v2903_v42 = vadd.f32 %v5323_v55, %v2880_v29  ;;  %v3482_v30 = vld [vmem:[%s4737_s19 + $0x50] sm:$0xff]  ;;  %v3485_v49 = vld [vmem:[%s4737_s19 + $0x68] sm:$0xff] }
 0x325   : > { %v2921_v33 = vmax.f32 %v2905_v35, 0.0 }
 0x326   : > { %v2906_v15 = vadd.f32 %v5323_v55, %v2883_v23  ;;  %v2881_v52 = vadd.f32 %v2857_v34, %v5295_v48  ;;  %3959 = vmatprep.mubr.bf16.mxu1 %v2927_v31  ;;  %v2919_v22 = vmax.f32 %v2903_v42, 0.0  ;;  %v5379_v48 = vld [vmem:[%s5507_s6] ss:$0 sm:$0xff]  ;;  %v3483_v31 = vld [vmem:[%s4737_s19 + $0x58] sm:$0xff] }
 0x327   : > { %3960 = vmatmul.mubr.bf16.gmra.mxu1 %v2928_v37 }
 0x328   : > { %v2922_v36 = vmax.f32 %v2906_v15, 0.0  ;;  %v2904_v7 = vadd.f32 %v5323_v55, %v2881_v52  ;;  %v3474_v55 = vld [vmem:[%s4737_s19 + $0x10] sm:$0xff] }
 0x32a   : > { %v2920_v16 = vmax.f32 %v2904_v7, 0.0  ;;  %v2930_v8 = vpack.c.bf16 %v2922_v36, %v2921_v33  ;;  %v3488_v36 = vld [vmem:[%s4737_s19 + $0x80] sm:$0xff] }
 0x32c   : > { %v2929_v54 = vpack.c.bf16 %v2920_v16, %v2919_v22 }
 0x32e   : > { %3963 = vmatprep.mubr.bf16.mxu1 %v2929_v54  ;;  %v3486_v54 = vld [vmem:[%s4737_s19 + $0x70] sm:$0xff] }
 0x32f   : > { %3964 = vmatmul.mubr.bf16.gmra.mxu1 %v2930_v8 }
 0x3d7   : > { %v3953_v59 = vpop.f32.mrf.mxu0 }
 0x3d8   : > { %v3064_v62 = vadd.f32 %v3953_v59, %v5379_v48 }
 0x3d9   : > { %v3055_v26 = vpop.f32.mrf.mxu0 }
 0x3da   : > { %v3120_v4 = vadd.f32 %v3476_v18, %v3064_v62  ;;  %v3056_v46 = vadd.f32 %v5379_v48, %v3055_v26  ;;  %v3489_v26 = vld [vmem:[%s4737_s19 + $0x88] sm:$0xff] }
 0x3db   : > { %v3954_v51 = vpop.f32.mrf.mxu0 }
 0x3dc   : > { %v3136_v47 = vmax.f32 %v3120_v4, 0.0  ;;  %v3118_v25 = vadd.f32 %v3474_v55, %v3056_v46  ;;  %v3067_v50 = vadd.f32 %v3954_v51, %v5379_v48 }
 0x3dd   : > { %v3058_v40 = vpop.f32.mrf.mxu0 }
 0x3de   : > { %3152 = vst [vmem:[%s4923_s24 + $0x10] sm:$0xff] %v3136_v47  ;;  %v3134_v41 = vmax.f32 %v3118_v25, 0.0  ;;  %v3121_v19 = vadd.f32 %v3477_v32, %v3067_v50  ;;  %v3059_v53 = vadd.f32 %v5379_v48, %v3058_v40  ;;  %v3487_v47 = vld [vmem:[%s4737_s19 + $0x78] sm:$0xff]  ;;  %s5441_s19 = scalar_lea.sflag [#allocation5], %s352_s8 }
 0x3df   : > { %v3957_v61 = vpop.f32.mrf.mxu1 }
 0x3e0   : > { %3150 = vst [vmem:[%s4923_s24] sm:$0xff] %v3134_v41  ;;  %v3137_v27 = vmax.f32 %v3121_v19, 0.0  ;;  %v3119_v57 = vadd.f32 %v3475_v5, %v3059_v53  ;;  %v3080_v13 = vadd.f32 %v3957_v61, %v5379_v48 }
 0x3e1   : > { %v3071_v2 = vpop.f32.mrf.mxu1 }
 0x3e2   : > { %3153 = vst [vmem:[%s4923_s24 + $0x18] sm:$0xff] %v3137_v27  ;;  %v3135_v56 = vmax.f32 %v3119_v57, 0.0  ;;  %v3124_v38 = vadd.f32 %v3480_v12, %v3080_v13  ;;  %v3072_v3 = vadd.f32 %v5379_v48, %v3071_v2 }
 0x3e3   : > { %v3958_v44 = vpop.f32.mrf.mxu1 }
 0x3e4   : > { %3151 = vst [vmem:[%s4923_s24 + $0x8] sm:$0xff] %v3135_v56  ;;  %v3140_v63 = vmax.f32 %v3124_v38, 0.0  ;;  %v3122_v43 = vadd.f32 %v3478_v28, %v3072_v3  ;;  %v3083_v45 = vadd.f32 %v3958_v44, %v5379_v48 }
 0x3e5   : > { %v3074_v17 = vpop.f32.mrf.mxu1 }
 0x3e6   : > { %3156 = vst [vmem:[%s4923_s24 + $0x30] sm:$0xff] %v3140_v63  ;;  %v3138_v60 = vmax.f32 %v3122_v43, 0.0  ;;  %v3125_v14 = vadd.f32 %v3481_v6, %v3083_v45  ;;  %v3075_v9 = vadd.f32 %v5379_v48, %v3074_v17 }
 0x3e7   : > { %v3961_v11 = vpop.f32.mrf.mxu1 }
 0x3e8   : > { %3154 = vst [vmem:[%s4923_s24 + $0x20] sm:$0xff] %v3138_v60  ;;  %v3141_v20 = vmax.f32 %v3125_v14, 0.0  ;;  %v3123_v1 = vadd.f32 %v3479_v0, %v3075_v9  ;;  %v3096_v58 = vadd.f32 %v3961_v11, %v5379_v48 }
 0x3e9   : > { %v3087_v39 = vpop.f32.mrf.mxu1 }
 0x3ea   : > { %3157 = vst [vmem:[%s4923_s24 + $0x38] sm:$0xff] %v3141_v20  ;;  %v3139_v29 = vmax.f32 %v3123_v1, 0.0  ;;  %v3128_v21 = vadd.f32 %v3484_v10, %v3096_v58  ;;  %v3088_v24 = vadd.f32 %v5379_v48, %v3087_v39 }
 0x3eb   : > { %v3962_v37 = vpop.f32.mrf.mxu1 }
 0x3ec   : > { %3155 = vst [vmem:[%s4923_s24 + $0x28] sm:$0xff] %v3139_v29  ;;  %v3144_v35 = vmax.f32 %v3128_v21, 0.0  ;;  %v3126_v23 = vadd.f32 %v3482_v30, %v3088_v24  ;;  %v3099_v34 = vadd.f32 %v3962_v37, %v5379_v48 }
 0x3ed   : > { %v3090_v42 = vpop.f32.mrf.mxu1 }
 0x3ee   : > { %3160 = vst [vmem:[%s4923_s24 + $0x50] sm:$0xff] %v3144_v35  ;;  %v3142_v15 = vmax.f32 %v3126_v23, 0.0  ;;  %v3129_v52 = vadd.f32 %v3485_v49, %v3099_v34  ;;  %v3091_v33 = vadd.f32 %v5379_v48, %v3090_v42 }
 0x3ef   : > { %v3965_v7 = vpop.f32.mrf.mxu1 }
 0x3f0   : > { %3158 = vst [vmem:[%s4923_s24 + $0x40] sm:$0xff] %v3142_v15  ;;  %v3145_v22 = vmax.f32 %v3129_v52, 0.0  ;;  %v3127_v16 = vadd.f32 %v3483_v31, %v3091_v33  ;;  %v3112_v8 = vadd.f32 %v3965_v7, %v5379_v48 }
 0x3f1   : > { %v3103_v18 = vpop.f32.mrf.mxu1 }
 0x3f2   : > { %3161 = vst [vmem:[%s4923_s24 + $0x58] sm:$0xff] %v3145_v22  ;;  %v3143_v59 = vmax.f32 %v3127_v16, 0.0  ;;  %v3132_v62 = vadd.f32 %v3488_v36, %v3112_v8  ;;  %v3104_v55 = vadd.f32 %v5379_v48, %v3103_v18 }
 0x3f3   : > { %v3966_v4 = vpop.f32.mrf.mxu1 }
 0x3f4   : > { %3159 = vst [vmem:[%s4923_s24 + $0x48] sm:$0xff] %v3143_v59  ;;  %v3148_v46 = vmax.f32 %v3132_v62, 0.0  ;;  %v3130_v32 = vadd.f32 %v3486_v54, %v3104_v55  ;;  %v3115_v51 = vadd.f32 %v3966_v4, %v5379_v48 }
 0x3f5   : > { %v3106_v25 = vpop.f32.mrf.mxu1 }
 0x3f6   : > { %3164 = vst [vmem:[%s4923_s24 + $0x70] sm:$0xff] %v3148_v46  ;;  %v3146_v50 = vmax.f32 %v3130_v32, 0.0  ;;  %v3133_v5 = vadd.f32 %v3489_v26, %v3115_v51  ;;  %v3107_v40 = vadd.f32 %v5379_v48, %v3106_v25 }
 0x3f8   : > { %3162 = vst [vmem:[%s4923_s24 + $0x60] sm:$0xff] %v3146_v50  ;;  %v3149_v41 = vmax.f32 %v3133_v5, 0.0  ;;  %v3131_v19 = vadd.f32 %v3487_v47, %v3107_v40 }
 0x3fa   : > { %3165 = vst [vmem:[%s4923_s24 + $0x78] sm:$0xff] %v3149_v41  ;;  %v3147_v53 = vmax.f32 %v3131_v19, 0.0 }
 0x3fc   : > { %3163 = vst [vmem:[%s4923_s24 + $0x68] sm:$0xff] %v3147_v53 }
 0x3fd   : > { %4382 = shalt.err (!%p4379_p7)
}
 0x3fe   : > { %s4383_s8 = scalar_lea.hbm %s5433_s14, 2048  ;;  %s4387_s7 = scalar_lea.hbm %s5556_s16, 8192 }
 0x3ff   : > { %p4384_p0 = scmp.ne.s32.totalorder %s5433_s14, %s4383_s8  ;;  %p4388_p13 = scmp.lt.s32.totalorder %s5433_s14, %s5556_s16 }
 0x400   : > { %p4389_p11 = scmp.lt.s32.totalorder %s4387_s7, %s4383_s8 }
 0x401   : > { %p4385_p4 = pnand %p4384_p0, %p5557_p10 }
 0x402   : > { %p4390_p5 = por %p4389_p11, %p4388_p13 }
 0x403   : > { %p4386_p6 = pneg %p4385_p4 }
 0x405   : > { %p4391_p8 = pnand %p4390_p5, %p4386_p6 }
 0x407   : > { %4394 = shalt.err (!%p4391_p8)
}
 0x408   : > { %s4510_s20 = smov 128   ;;  %s4511_s23 = smov 8  }
 0x409   : > { %4000 = dma.vmem_to_hbm [thread:$0]  (%p5557_p10), %s5435_s15, 2048, %s5433_s14, %s5441_s19, %s4510_s20, %s4510_s20, %s4511_s23  }
 0x40a PF: > { %s5558_s18 = sld [smem:[#allocation16_spill]]  ;;  %p4027_p9 = scmp.ge.s32.totalorder %s4497_s11, 2 }
 0x40b   : > { %s5559_s9 = sld [smem:[#allocation20_spill]] }
 0x410   : > { %s3198_s27 = sand.u32 1, %s5558_s18  }
 0x411   : > { %p5560_p12 = scmp.ne.s32.totalorder %s5559_s9, 0  ;;  %s3199_s12 = scalar_lea.sflag [#allocation5], %s3198_s27 }
 0x413   : > { %p4017_p2 = pnand %p4027_p9, %p5560_p12 }
 0x415   : > { %p4018_p1 = pneg %p4017_p2 }
 0x417   : > { %4452 = dma.done.wait (%p4018_p1), %s3199_s12, 2048  }
 0x418   : > { %4454 = vsyncadd (%p4018_p1), %s3199_s12, 4294965248  ;;  %s25_s11 = sadd.s32 1, %s4497_s11   ;;  %s5561_s30 = sld [smem:[#allocation18_spill]] }
 0x419   : > { %p22_p3 = scmp.ge.s32.totalorder %s25_s11, 6   ;;  %s5562_s9 = sld [smem:[#allocation21_spill]] }
 0x41a   : > { %s5563_s15 = sld [smem:[#allocation22_spill]]  ;;  %s5564_s24 = smov %s4461_s25 }
 0x41b   : > { %s5565_s25 = smov %s4465_s26  ;;  %s5566_s26 = smov %s4699_s3 }
 0x41c   : > { %s5567_s27 = smov %s4473_s28  ;;  %s5568_s28 = smov %s4477_s29 }
 0x41d   : > { %s5569_s29 = smov %s4694_s21  ;;  %s5570_s8 = smov %s4493_s10 }
 0x41e   :  { %24 = sbr.rel (!%p22_p3) target bundleno = 16 (0x10), region = 120 }
 0x420   : > { %s5571_s10 = smov %s5563_s15 }
 0x423   :  { %3204 = vsyncpa [#allocation4], 1 }
 0x424   :  { %3206 = vsyncpa [#allocation4 + $0x1], 1 }
 0x425   :  { %3207 = vsyncpa [#allocation7], 1 }
 0x426   :  { %3208 = vsyncpa [#allocation10], 1 }
 0x427   :  { %3209 = vsyncpa [#allocation5], 1 }
 0x428   :  { %3211 = vsyncpa [#allocation5 + $0x1], 1 }

</bundles_post_ra>
